<compile_context>
chip_gen: v7x
topology: tpu7x:2x2x1
jax: 0.10.0
libtpu: 0.0.40
codegen_flags: <defaults>
</compile_context>

<pallas_src>
import jax
import jax.numpy as jnp
from jax.experimental import pallas as pl
from jax.experimental.pallas import tpu as pltpu

NUM_LAYERS = 12
HIDDEN = 768
NUM_CLASSES = 5
OUT_PAD = 128           # lane-dense classifier output width (>= NUM_CLASSES)
LN_EPS = 1e-5           # PyTorch nn.LayerNorm default
LEAKY_SLOPE = 0.01      # PyTorch nn.LeakyReLU default


def _round_up(x, m):
    return ((x + m - 1) // m) * m


def _device_kind():
    try:
        kind = jax.devices()[0].device_kind.lower()
    except Exception:
        return "unknown"
    if "v5 lite" in kind or "v5e" in kind or "v5litepod" in kind:
        return "v5e"
    if "v6" in kind or "trillium" in kind:
        return "v6e"
    if "v7" in kind:
        return "v7x"
    return "other"


def _pick_tile_b(B, dev):
    """Rows per grid step.

    v5e/v6e (128 MiB VMEM): up to 512 rows (big-tile / HBM-roofline regime).
    v7x (64 MiB VMEM, 2 TensorCores): cap at 256 and target ceil(B/2) rows so the
    batch grid has >=2 steps and both cores get work.
    Unknown devices: conservative 256.
    """
    if dev == "v7x":
        cap = 256
        target = _round_up(max(1, -(-B // 2)), 8)
    elif dev in ("v5e", "v6e"):
        cap = 512
        target = _round_up(B, 8)
    else:
        cap = 256
        target = _round_up(B, 8)
    return max(8, min(cap, target))


def _vmem_limit_bytes(tile_b, dev):
    """Raise the scoped-VMEM limit only when the tile actually needs it."""
    cls_b = 2 * NUM_LAYERS * tile_b * HIDDEN * 4              # double-buffered f32 CLS tile
    wts_b = 2 * (2 * HIDDEN * HIDDEN * 2 + HIDDEN * OUT_PAD * 2 + 10 * HIDDEN * 4)
    out_b = 2 * tile_b * OUT_PAD * 4
    tmp_b = 6 * tile_b * HIDDEN * 4                           # avg / h / bf16 copies
    need = cls_b + wts_b + out_b + tmp_b
    if need <= (12 << 20):
        return None                                           # fits every default scoped limit
    cap = (52 << 20) if dev == "v7x" else (100 << 20)         # leave physical-VMEM headroom
    return min(cap, need + (8 << 20))


def _layernorm(x, gamma, beta):
    mean = jnp.mean(x, axis=-1, keepdims=True)
    var = jnp.mean((x - mean) ** 2, axis=-1, keepdims=True)
    return (x - mean) * jax.lax.rsqrt(var + LN_EPS) * gamma + beta


def _leaky_relu(x):
    return jnp.where(x > 0, x, LEAKY_SLOPE * x)


def modality_kernel(
    probs_ref,    # (12,) f32 in SMEM  — softmax(layer-mixing logits)
    cls_ref,      # (12, TB, H) f32    — CLS hidden states, gathered by the BlockSpec
    w1_ref, b1_ref, g1_ref, be1_ref,   # Linear1 (bf16 weight) + LayerNorm1 (f32)
    w2_ref, b2_ref, g2_ref, be2_ref,   # Linear2 (bf16 weight) + LayerNorm2 (f32)
    wc_ref, bc_ref,                    # classifier (bf16 weight, f32 bias), lane-padded
    out_ref,      # (TB, OUT_PAD) f32
):
    # Weighted average over the 12 layers, f32 accumulation, scalar weights from SMEM.
    avg = probs_ref[0] * cls_ref[0]
    for l in range(1, NUM_LAYERS):
        avg = avg + probs_ref[l] * cls_ref[l]

    # feed_forward block 1: bf16 MXU operands, f32 accumulation, f32 epilogue.
    h = (
        jnp.dot(avg.astype(jnp.bfloat16), w1_ref[...],
                preferred_element_type=jnp.float32)
        + b1_ref[...]
    )
    h = _leaky_relu(_layernorm(h, g1_ref[...], be1_ref[...]))
    # Dropout(p=0.2): identity in eval mode

    # feed_forward block 2
    h = (
        jnp.dot(h.astype(jnp.bfloat16), w2_ref[...],
                preferred_element_type=jnp.float32)
        + b2_ref[...]
    )
    h = _leaky_relu(_layernorm(h, g2_ref[...], be2_ref[...]))
    # Dropout(p=0.2): identity in eval mode

    # classifier (lane-dense 128-wide padded output)
    out_ref[...] = (
        jnp.dot(h.astype(jnp.bfloat16), wc_ref[...],
                preferred_element_type=jnp.float32)
        + bc_ref[...]
    )


def modality_forward(hidden_states, params, *, tile_b=None):
    """hidden_states: (12, B, S, 768) stacked backbone hidden_states[1:]."""
    L, B, S, H = hidden_states.shape
    assert L == NUM_LAYERS and H == HIDDEN

    dev = _device_kind()
    if tile_b is None:
        tile_b = _pick_tile_b(B, dev)
    assert tile_b % 8 == 0, "tile_b must be a multiple of 8 (f32 sublane tiling)"

    # Fused CLS gather: view (L, B, S*H) (free reshape of contiguous trailing dims);
    # block 0 of the flattened last dim == seq position 0 == the CLS token. The kernel
    # DMA therefore reads only the CLS stream, once, in f32.
    hs_flat = hidden_states.reshape(L, B, S * H)

    # Grid-invariant prep hoisted out of the kernel: mixing softmax, bf16 weight
    # casts, lane-dense classifier padding.
    probs = jax.nn.softmax(params["mix_weights"].astype(jnp.float32).reshape(-1), axis=-1)
    w1 = params["w1"].astype(jnp.bfloat16)
    w2 = params["w2"].astype(jnp.bfloat16)
    wc = jnp.pad(params["wc"], ((0, 0), (0, OUT_PAD - NUM_CLASSES))).astype(jnp.bfloat16)
    bc = jnp.pad(params["bc"], ((0, 0), (0, OUT_PAD - NUM_CLASSES)))

    grid = (pl.cdiv(B, tile_b),)
    b_pad = grid[0] * tile_b
    full = lambda shape: pl.BlockSpec(shape, lambda i: (0,) * len(shape))

    in_specs = [
        pl.BlockSpec(memory_space=pltpu.MemorySpace.SMEM),                    # probs (scalars)
        pl.BlockSpec((NUM_LAYERS, tile_b, HIDDEN), lambda i: (0, i, 0)),      # fused CLS gather
        full((HIDDEN, HIDDEN)), full((1, HIDDEN)), full((1, HIDDEN)), full((1, HIDDEN)),
        full((HIDDEN, HIDDEN)), full((1, HIDDEN)), full((1, HIDDEN)), full((1, HIDDEN)),
        full((HIDDEN, OUT_PAD)), full((1, OUT_PAD)),
    ]
    out_specs = pl.BlockSpec((tile_b, OUT_PAD), lambda i: (i, 0))

    cp_kwargs = dict(dimension_semantics=("parallel",))
    vmem_limit = _vmem_limit_bytes(tile_b, dev)
    if vmem_limit is not None:
        cp_kwargs["vmem_limit_bytes"] = int(vmem_limit)

    out = pl.pallas_call(
        modality_kernel,
        out_shape=jax.ShapeDtypeStruct((b_pad, OUT_PAD), jnp.float32),
        grid=grid,
        in_specs=in_specs,
        out_specs=out_specs,
        compiler_params=pltpu.CompilerParams(**cp_kwargs),
    )(
        probs, hs_flat,
        w1, params["b1"], params["g1"], params["beta1"],
        w2, params["b2"], params["g2"], params["beta2"],
        wc, bc,
    )
    return out[:B, :NUM_CLASSES]


def modality_reference(hidden_states, params):
    """Pure-JAX f32 reference matching the PyTorch module semantics (eval mode)."""
    cls = hidden_states[:, :, 0, :].astype(jnp.float32)                  # (12, B, H)
    probs = jax.nn.softmax(params["mix_weights"].astype(jnp.float32).reshape(-1), axis=-1)
    avg = jnp.einsum("l,lbh->bh", probs, cls)

    def block(x, w, b, g, beta):
        h = x @ w + b
        return _leaky_relu(_layernorm(h, g, beta))

    h = block(avg, params["w1"], params["b1"], params["g1"], params["beta1"])
    h = block(h, params["w2"], params["b2"], params["g2"], params["beta2"])
    return h @ params["wc"] + params["bc"]


def init_params(key):
    ks = jax.random.split(key, 8)
    return {
        "mix_weights": jax.random.normal(ks[0], (NUM_LAYERS,), jnp.float32),
        "w1": jax.random.normal(ks[1], (HIDDEN, HIDDEN), jnp.float32) * 0.02,
        "b1": jnp.zeros((1, HIDDEN), jnp.float32),
        "g1": jnp.ones((1, HIDDEN), jnp.float32),
        "beta1": jnp.zeros((1, HIDDEN), jnp.float32),
        "w2": jax.random.normal(ks[2], (HIDDEN, HIDDEN), jnp.float32) * 0.02,
        "b2": jnp.zeros((1, HIDDEN), jnp.float32),
        "g2": jnp.ones((1, HIDDEN), jnp.float32),
        "beta2": jnp.zeros((1, HIDDEN), jnp.float32),
        "wc": jax.random.normal(ks[3], (HIDDEN, NUM_CLASSES), jnp.float32) * 0.02,
        "bc": jnp.zeros((1, NUM_CLASSES), jnp.float32),
    }


if __name__ == "__main__":
    key = jax.random.PRNGKey(0)
    k_hs, k_p = jax.random.split(key)

    B, S = 8, 8
    # stacked backbone hidden_states[1:] -> (12, B, S, 768)
    hidden_states = jax.random.normal(k_hs, (NUM_LAYERS, B, S, HIDDEN), jnp.float32)
    params = init_params(k_p)

    out = modality_forward(hidden_states, params)
    jax.block_until_ready(out)
    assert out.shape == (B, NUM_CLASSES)

    ref = modality_reference(hidden_states, params)
    max_err = float(jnp.max(jnp.abs(out - ref)))
    assert max_err < 0.1, f"max abs err vs f32 reference too large: {max_err}"

    print("KERNEL_OK")
</pallas_src>

<mosaic_0001>
module attributes {stable_mosaic.version = 11 : i64} {
  func.func @modality_kernel(%arg0: i32, %arg1: memref<12xf32, #tpu.memory_space<smem>>, %arg2: memref<12x8x768xf32, #tpu.memory_space<vmem>>, %arg3: memref<768x768xbf16, #tpu.memory_space<vmem>>, %arg4: memref<1x768xf32, #tpu.memory_space<vmem>>, %arg5: memref<1x768xf32, #tpu.memory_space<vmem>>, %arg6: memref<1x768xf32, #tpu.memory_space<vmem>>, %arg7: memref<768x768xbf16, #tpu.memory_space<vmem>>, %arg8: memref<1x768xf32, #tpu.memory_space<vmem>>, %arg9: memref<1x768xf32, #tpu.memory_space<vmem>>, %arg10: memref<1x768xf32, #tpu.memory_space<vmem>>, %arg11: memref<768x128xbf16, #tpu.memory_space<vmem>>, %arg12: memref<1x128xf32, #tpu.memory_space<vmem>>, %arg13: memref<8x128xf32, #tpu.memory_space<vmem>>) attributes {dimension_semantics = [#tpu.dimension_semantics<parallel>], iteration_bounds = array<i64: 1>, scalar_prefetch = 0 : i64, scratch_operands = 0 : i64, tpu.core_type = #tpu.core_type<tc>, window_params = [{transform_indices = @transform_0, window_bounds = array<i64: 12>}, {transform_indices = @transform_1, window_bounds = array<i64: 12, 8, 768>}, {pipeline_mode = #tpu.pipeline_mode<synchronous>, transform_indices = @transform_2, window_bounds = array<i64: 768, 768>}, {pipeline_mode = #tpu.pipeline_mode<synchronous>, transform_indices = @transform_3, window_bounds = array<i64: 1, 768>}, {pipeline_mode = #tpu.pipeline_mode<synchronous>, transform_indices = @transform_4, window_bounds = array<i64: 1, 768>}, {pipeline_mode = #tpu.pipeline_mode<synchronous>, transform_indices = @transform_5, window_bounds = array<i64: 1, 768>}, {pipeline_mode = #tpu.pipeline_mode<synchronous>, transform_indices = @transform_6, window_bounds = array<i64: 768, 768>}, {pipeline_mode = #tpu.pipeline_mode<synchronous>, transform_indices = @transform_7, window_bounds = array<i64: 1, 768>}, {pipeline_mode = #tpu.pipeline_mode<synchronous>, transform_indices = @transform_8, window_bounds = array<i64: 1, 768>}, {pipeline_mode = #tpu.pipeline_mode<synchronous>, transform_indices = @transform_9, window_bounds = array<i64: 1, 768>}, {pipeline_mode = #tpu.pipeline_mode<synchronous>, transform_indices = @transform_10, window_bounds = array<i64: 768, 128>}, {pipeline_mode = #tpu.pipeline_mode<synchronous>, transform_indices = @transform_11, window_bounds = array<i64: 1, 128>}, {transform_indices = @transform_12, window_bounds = array<i64: 8, 128>}]} {
    %c0 = arith.constant 0 : index
    %0 = memref.load %arg1[%c0] : memref<12xf32, #tpu.memory_space<smem>>
    %c0_0 = arith.constant 0 : index
    %c0_1 = arith.constant 0 : index
    %c0_2 = arith.constant 0 : index
    %1 = vector.load %arg2[%c0_0, %c0_1, %c0_2] : memref<12x8x768xf32, #tpu.memory_space<vmem>>, vector<1x8x768xf32>
    %2 = vector.shape_cast %1 : vector<1x8x768xf32> to vector<8x768xf32>
    %3 = vector.broadcast %0 : f32 to vector<8x768xf32>
    %4 = arith.mulf %3, %2 : vector<8x768xf32>
    %c1 = arith.constant 1 : index
    %5 = memref.load %arg1[%c1] : memref<12xf32, #tpu.memory_space<smem>>
    %c1_3 = arith.constant 1 : index
    %c0_4 = arith.constant 0 : index
    %c0_5 = arith.constant 0 : index
    %6 = vector.load %arg2[%c1_3, %c0_4, %c0_5] : memref<12x8x768xf32, #tpu.memory_space<vmem>>, vector<1x8x768xf32>
    %7 = vector.shape_cast %6 : vector<1x8x768xf32> to vector<8x768xf32>
    %8 = vector.broadcast %5 : f32 to vector<8x768xf32>
    %9 = arith.mulf %8, %7 : vector<8x768xf32>
    %10 = arith.addf %4, %9 : vector<8x768xf32>
    %c2 = arith.constant 2 : index
    %11 = memref.load %arg1[%c2] : memref<12xf32, #tpu.memory_space<smem>>
    %c2_6 = arith.constant 2 : index
    %c0_7 = arith.constant 0 : index
    %c0_8 = arith.constant 0 : index
    %12 = vector.load %arg2[%c2_6, %c0_7, %c0_8] : memref<12x8x768xf32, #tpu.memory_space<vmem>>, vector<1x8x768xf32>
    %13 = vector.shape_cast %12 : vector<1x8x768xf32> to vector<8x768xf32>
    %14 = vector.broadcast %11 : f32 to vector<8x768xf32>
    %15 = arith.mulf %14, %13 : vector<8x768xf32>
    %16 = arith.addf %10, %15 : vector<8x768xf32>
    %c3 = arith.constant 3 : index
    %17 = memref.load %arg1[%c3] : memref<12xf32, #tpu.memory_space<smem>>
    %c3_9 = arith.constant 3 : index
    %c0_10 = arith.constant 0 : index
    %c0_11 = arith.constant 0 : index
    %18 = vector.load %arg2[%c3_9, %c0_10, %c0_11] : memref<12x8x768xf32, #tpu.memory_space<vmem>>, vector<1x8x768xf32>
    %19 = vector.shape_cast %18 : vector<1x8x768xf32> to vector<8x768xf32>
    %20 = vector.broadcast %17 : f32 to vector<8x768xf32>
    %21 = arith.mulf %20, %19 : vector<8x768xf32>
    %22 = arith.addf %16, %21 : vector<8x768xf32>
    %c4 = arith.constant 4 : index
    %23 = memref.load %arg1[%c4] : memref<12xf32, #tpu.memory_space<smem>>
    %c4_12 = arith.constant 4 : index
    %c0_13 = arith.constant 0 : index
    %c0_14 = arith.constant 0 : index
    %24 = vector.load %arg2[%c4_12, %c0_13, %c0_14] : memref<12x8x768xf32, #tpu.memory_space<vmem>>, vector<1x8x768xf32>
    %25 = vector.shape_cast %24 : vector<1x8x768xf32> to vector<8x768xf32>
    %26 = vector.broadcast %23 : f32 to vector<8x768xf32>
    %27 = arith.mulf %26, %25 : vector<8x768xf32>
    %28 = arith.addf %22, %27 : vector<8x768xf32>
    %c5 = arith.constant 5 : index
    %29 = memref.load %arg1[%c5] : memref<12xf32, #tpu.memory_space<smem>>
    %c5_15 = arith.constant 5 : index
    %c0_16 = arith.constant 0 : index
    %c0_17 = arith.constant 0 : index
    %30 = vector.load %arg2[%c5_15, %c0_16, %c0_17] : memref<12x8x768xf32, #tpu.memory_space<vmem>>, vector<1x8x768xf32>
    %31 = vector.shape_cast %30 : vector<1x8x768xf32> to vector<8x768xf32>
    %32 = vector.broadcast %29 : f32 to vector<8x768xf32>
    %33 = arith.mulf %32, %31 : vector<8x768xf32>
    %34 = arith.addf %28, %33 : vector<8x768xf32>
    %c6 = arith.constant 6 : index
    %35 = memref.load %arg1[%c6] : memref<12xf32, #tpu.memory_space<smem>>
    %c6_18 = arith.constant 6 : index
    %c0_19 = arith.constant 0 : index
    %c0_20 = arith.constant 0 : index
    %36 = vector.load %arg2[%c6_18, %c0_19, %c0_20] : memref<12x8x768xf32, #tpu.memory_space<vmem>>, vector<1x8x768xf32>
    %37 = vector.shape_cast %36 : vector<1x8x768xf32> to vector<8x768xf32>
    %38 = vector.broadcast %35 : f32 to vector<8x768xf32>
    %39 = arith.mulf %38, %37 : vector<8x768xf32>
    %40 = arith.addf %34, %39 : vector<8x768xf32>
    %c7 = arith.constant 7 : index
    %41 = memref.load %arg1[%c7] : memref<12xf32, #tpu.memory_space<smem>>
    %c7_21 = arith.constant 7 : index
    %c0_22 = arith.constant 0 : index
    %c0_23 = arith.constant 0 : index
    %42 = vector.load %arg2[%c7_21, %c0_22, %c0_23] : memref<12x8x768xf32, #tpu.memory_space<vmem>>, vector<1x8x768xf32>
    %43 = vector.shape_cast %42 : vector<1x8x768xf32> to vector<8x768xf32>
    %44 = vector.broadcast %41 : f32 to vector<8x768xf32>
    %45 = arith.mulf %44, %43 : vector<8x768xf32>
    %46 = arith.addf %40, %45 : vector<8x768xf32>
    %c8 = arith.constant 8 : index
    %47 = memref.load %arg1[%c8] : memref<12xf32, #tpu.memory_space<smem>>
    %c8_24 = arith.constant 8 : index
    %c0_25 = arith.constant 0 : index
    %c0_26 = arith.constant 0 : index
    %48 = vector.load %arg2[%c8_24, %c0_25, %c0_26] : memref<12x8x768xf32, #tpu.memory_space<vmem>>, vector<1x8x768xf32>
    %49 = vector.shape_cast %48 : vector<1x8x768xf32> to vector<8x768xf32>
    %50 = vector.broadcast %47 : f32 to vector<8x768xf32>
    %51 = arith.mulf %50, %49 : vector<8x768xf32>
    %52 = arith.addf %46, %51 : vector<8x768xf32>
    %c9 = arith.constant 9 : index
    %53 = memref.load %arg1[%c9] : memref<12xf32, #tpu.memory_space<smem>>
    %c9_27 = arith.constant 9 : index
    %c0_28 = arith.constant 0 : index
    %c0_29 = arith.constant 0 : index
    %54 = vector.load %arg2[%c9_27, %c0_28, %c0_29] : memref<12x8x768xf32, #tpu.memory_space<vmem>>, vector<1x8x768xf32>
    %55 = vector.shape_cast %54 : vector<1x8x768xf32> to vector<8x768xf32>
    %56 = vector.broadcast %53 : f32 to vector<8x768xf32>
    %57 = arith.mulf %56, %55 : vector<8x768xf32>
    %58 = arith.addf %52, %57 : vector<8x768xf32>
    %c10 = arith.constant 10 : index
    %59 = memref.load %arg1[%c10] : memref<12xf32, #tpu.memory_space<smem>>
    %c10_30 = arith.constant 10 : index
    %c0_31 = arith.constant 0 : index
    %c0_32 = arith.constant 0 : index
    %60 = vector.load %arg2[%c10_30, %c0_31, %c0_32] : memref<12x8x768xf32, #tpu.memory_space<vmem>>, vector<1x8x768xf32>
    %61 = vector.shape_cast %60 : vector<1x8x768xf32> to vector<8x768xf32>
    %62 = vector.broadcast %59 : f32 to vector<8x768xf32>
    %63 = arith.mulf %62, %61 : vector<8x768xf32>
    %64 = arith.addf %58, %63 : vector<8x768xf32>
    %c11 = arith.constant 11 : index
    %65 = memref.load %arg1[%c11] : memref<12xf32, #tpu.memory_space<smem>>
    %c11_33 = arith.constant 11 : index
    %c0_34 = arith.constant 0 : index
    %c0_35 = arith.constant 0 : index
    %66 = vector.load %arg2[%c11_33, %c0_34, %c0_35] : memref<12x8x768xf32, #tpu.memory_space<vmem>>, vector<1x8x768xf32>
    %67 = vector.shape_cast %66 : vector<1x8x768xf32> to vector<8x768xf32>
    %68 = vector.broadcast %65 : f32 to vector<8x768xf32>
    %69 = arith.mulf %68, %67 : vector<8x768xf32>
    %70 = arith.addf %64, %69 : vector<8x768xf32>
    %71 = arith.truncf %70 : vector<8x768xf32> to vector<8x768xbf16>
    %c0_36 = arith.constant 0 : index
    %c0_37 = arith.constant 0 : index
    %72 = vector.load %arg3[%c0_36, %c0_37] : memref<768x768xbf16, #tpu.memory_space<vmem>>, vector<768x768xbf16>
    %cst = arith.constant dense<0.000000e+00> : vector<8x768xf32>
    %73 = tpu.matmul %71, %72, %cst {dimension_numbers = #tpu.dot_dimension_numbers<[1], [0], [0], [1], [0, 0, 1, 1], [], []>} : vector<8x768xbf16>, vector<768x768xbf16>, vector<8x768xf32> -> vector<8x768xf32>
    %c0_38 = arith.constant 0 : index
    %c0_39 = arith.constant 0 : index
    %74 = vector.load %arg4[%c0_38, %c0_39] : memref<1x768xf32, #tpu.memory_space<vmem>>, vector<1x768xf32>
    %75 = vector.broadcast %74 : vector<1x768xf32> to vector<8x768xf32>
    %76 = arith.addf %73, %75 : vector<8x768xf32>
    %c0_40 = arith.constant 0 : index
    %c0_41 = arith.constant 0 : index
    %77 = vector.load %arg5[%c0_40, %c0_41] : memref<1x768xf32, #tpu.memory_space<vmem>>, vector<1x768xf32>
    %c0_42 = arith.constant 0 : index
    %c0_43 = arith.constant 0 : index
    %78 = vector.load %arg6[%c0_42, %c0_43] : memref<1x768xf32, #tpu.memory_space<vmem>>, vector<1x768xf32>
    %cst_44 = arith.constant dense<0.000000e+00> : vector<8xf32>
    %79 = vector.multi_reduction <add>, %76, %cst_44 [1] : vector<8x768xf32> to vector<8xf32>
    %80 = vector.shape_cast %79 : vector<8xf32> to vector<8x1xf32>
    %cst_45 = arith.constant 7.680000e+02 : f32
    %81 = vector.broadcast %cst_45 : f32 to vector<8x1xf32>
    %82 = arith.divf %80, %81 : vector<8x1xf32>
    %83 = vector.broadcast %82 : vector<8x1xf32> to vector<8x768xf32>
    %84 = arith.subf %76, %83 : vector<8x768xf32>
    %85 = arith.mulf %84, %84 : vector<8x768xf32>
    %cst_46 = arith.constant dense<0.000000e+00> : vector<8xf32>
    %86 = vector.multi_reduction <add>, %85, %cst_46 [1] : vector<8x768xf32> to vector<8xf32>
    %87 = vector.shape_cast %86 : vector<8xf32> to vector<8x1xf32>
    %cst_47 = arith.constant 7.680000e+02 : f32
    %88 = vector.broadcast %cst_47 : f32 to vector<8x1xf32>
    %89 = arith.divf %87, %88 : vector<8x1xf32>
    %90 = vector.broadcast %82 : vector<8x1xf32> to vector<8x768xf32>
    %91 = arith.subf %76, %90 : vector<8x768xf32>
    %cst_48 = arith.constant 9.99999974E-6 : f32
    %92 = vector.broadcast %cst_48 : f32 to vector<8x1xf32>
    %93 = arith.addf %89, %92 : vector<8x1xf32>
    %94 = math.rsqrt %93 : vector<8x1xf32>
    %95 = vector.broadcast %94 : vector<8x1xf32> to vector<8x768xf32>
    %96 = arith.mulf %91, %95 : vector<8x768xf32>
    %97 = vector.broadcast %77 : vector<1x768xf32> to vector<8x768xf32>
    %98 = arith.mulf %96, %97 : vector<8x768xf32>
    %99 = vector.broadcast %78 : vector<1x768xf32> to vector<8x768xf32>
    %100 = arith.addf %98, %99 : vector<8x768xf32>
    %cst_49 = arith.constant 0.000000e+00 : f32
    %101 = vector.broadcast %cst_49 : f32 to vector<8x768xf32>
    %102 = arith.cmpf ogt, %100, %101 : vector<8x768xf32>
    %cst_50 = arith.constant 0.00999999977 : f32
    %103 = vector.broadcast %cst_50 : f32 to vector<8x768xf32>
    %104 = arith.mulf %103, %100 : vector<8x768xf32>
    %105 = arith.select %102, %100, %104 : vector<8x768xi1>, vector<8x768xf32>
    %106 = arith.truncf %105 : vector<8x768xf32> to vector<8x768xbf16>
    %c0_51 = arith.constant 0 : index
    %c0_52 = arith.constant 0 : index
    %107 = vector.load %arg7[%c0_51, %c0_52] : memref<768x768xbf16, #tpu.memory_space<vmem>>, vector<768x768xbf16>
    %cst_53 = arith.constant dense<0.000000e+00> : vector<8x768xf32>
    %108 = tpu.matmul %106, %107, %cst_53 {dimension_numbers = #tpu.dot_dimension_numbers<[1], [0], [0], [1], [0, 0, 1, 1], [], []>} : vector<8x768xbf16>, vector<768x768xbf16>, vector<8x768xf32> -> vector<8x768xf32>
    %c0_54 = arith.constant 0 : index
    %c0_55 = arith.constant 0 : index
    %109 = vector.load %arg8[%c0_54, %c0_55] : memref<1x768xf32, #tpu.memory_space<vmem>>, vector<1x768xf32>
    %110 = vector.broadcast %109 : vector<1x768xf32> to vector<8x768xf32>
    %111 = arith.addf %108, %110 : vector<8x768xf32>
    %c0_56 = arith.constant 0 : index
    %c0_57 = arith.constant 0 : index
    %112 = vector.load %arg9[%c0_56, %c0_57] : memref<1x768xf32, #tpu.memory_space<vmem>>, vector<1x768xf32>
    %c0_58 = arith.constant 0 : index
    %c0_59 = arith.constant 0 : index
    %113 = vector.load %arg10[%c0_58, %c0_59] : memref<1x768xf32, #tpu.memory_space<vmem>>, vector<1x768xf32>
    %cst_60 = arith.constant dense<0.000000e+00> : vector<8xf32>
    %114 = vector.multi_reduction <add>, %111, %cst_60 [1] : vector<8x768xf32> to vector<8xf32>
    %115 = vector.shape_cast %114 : vector<8xf32> to vector<8x1xf32>
    %cst_61 = arith.constant 7.680000e+02 : f32
    %116 = vector.broadcast %cst_61 : f32 to vector<8x1xf32>
    %117 = arith.divf %115, %116 : vector<8x1xf32>
    %118 = vector.broadcast %117 : vector<8x1xf32> to vector<8x768xf32>
    %119 = arith.subf %111, %118 : vector<8x768xf32>
    %120 = arith.mulf %119, %119 : vector<8x768xf32>
    %cst_62 = arith.constant dense<0.000000e+00> : vector<8xf32>
    %121 = vector.multi_reduction <add>, %120, %cst_62 [1] : vector<8x768xf32> to vector<8xf32>
    %122 = vector.shape_cast %121 : vector<8xf32> to vector<8x1xf32>
    %cst_63 = arith.constant 7.680000e+02 : f32
    %123 = vector.broadcast %cst_63 : f32 to vector<8x1xf32>
    %124 = arith.divf %122, %123 : vector<8x1xf32>
    %125 = vector.broadcast %117 : vector<8x1xf32> to vector<8x768xf32>
    %126 = arith.subf %111, %125 : vector<8x768xf32>
    %cst_64 = arith.constant 9.99999974E-6 : f32
    %127 = vector.broadcast %cst_64 : f32 to vector<8x1xf32>
    %128 = arith.addf %124, %127 : vector<8x1xf32>
    %129 = math.rsqrt %128 : vector<8x1xf32>
    %130 = vector.broadcast %129 : vector<8x1xf32> to vector<8x768xf32>
    %131 = arith.mulf %126, %130 : vector<8x768xf32>
    %132 = vector.broadcast %112 : vector<1x768xf32> to vector<8x768xf32>
    %133 = arith.mulf %131, %132 : vector<8x768xf32>
    %134 = vector.broadcast %113 : vector<1x768xf32> to vector<8x768xf32>
    %135 = arith.addf %133, %134 : vector<8x768xf32>
    %cst_65 = arith.constant 0.000000e+00 : f32
    %136 = vector.broadcast %cst_65 : f32 to vector<8x768xf32>
    %137 = arith.cmpf ogt, %135, %136 : vector<8x768xf32>
    %cst_66 = arith.constant 0.00999999977 : f32
    %138 = vector.broadcast %cst_66 : f32 to vector<8x768xf32>
    %139 = arith.mulf %138, %135 : vector<8x768xf32>
    %140 = arith.select %137, %135, %139 : vector<8x768xi1>, vector<8x768xf32>
    %141 = arith.truncf %140 : vector<8x768xf32> to vector<8x768xbf16>
    %c0_67 = arith.constant 0 : index
    %c0_68 = arith.constant 0 : index
    %142 = vector.load %arg11[%c0_67, %c0_68] : memref<768x128xbf16, #tpu.memory_space<vmem>>, vector<768x128xbf16>
    %cst_69 = arith.constant dense<0.000000e+00> : vector<8x128xf32>
    %143 = tpu.matmul %141, %142, %cst_69 {dimension_numbers = #tpu.dot_dimension_numbers<[1], [0], [0], [1], [0, 0, 1, 1], [], []>} : vector<8x768xbf16>, vector<768x128xbf16>, vector<8x128xf32> -> vector<8x128xf32>
    %c0_70 = arith.constant 0 : index
    %c0_71 = arith.constant 0 : index
    %144 = vector.load %arg12[%c0_70, %c0_71] : memref<1x128xf32, #tpu.memory_space<vmem>>, vector<1x128xf32>
    %145 = vector.broadcast %144 : vector<1x128xf32> to vector<8x128xf32>
    %146 = arith.addf %143, %145 : vector<8x128xf32>
    %c0_72 = arith.constant 0 : index
    %c0_73 = arith.constant 0 : index
    %147 = vector.load %arg13[%c0_72, %c0_73] : memref<8x128xf32, #tpu.memory_space<vmem>>, vector<8x128xf32>
    tpu.vector_store %arg13[%c0_72, %c0_73], %146 {strides = array<i32>} : memref<8x128xf32, #tpu.memory_space<vmem>>, vector<8x128xf32>,
    return
  }
  func.func @transform_0(%arg0: i32) -> i32 {
    %c0_i32 = arith.constant 0 : i32
    %c0_i32_0 = arith.constant 0 : i32
    return %c0_i32 : i32
  }
  func.func @transform_1(%arg0: i32) -> (i32, i32, i32) {
    %c0_i32 = arith.constant 0 : i32
    %c0_i32_0 = arith.constant 0 : i32
    %c0_i32_1 = arith.constant 0 : i32
    return %c0_i32, %arg0, %c0_i32_0 : i32, i32, i32
  }
  func.func @transform_2(%arg0: i32) -> (i32, i32) {
    %c0_i32 = arith.constant 0 : i32
    %c0_i32_0 = arith.constant 0 : i32
    %c0_i32_1 = arith.constant 0 : i32
    return %c0_i32, %c0_i32_0 : i32, i32
  }
  func.func @transform_3(%arg0: i32) -> (i32, i32) {
    %c0_i32 = arith.constant 0 : i32
    %c0_i32_0 = arith.constant 0 : i32
    %c0_i32_1 = arith.constant 0 : i32
    return %c0_i32, %c0_i32_0 : i32, i32
  }
  func.func @transform_4(%arg0: i32) -> (i32, i32) {
    %c0_i32 = arith.constant 0 : i32
    %c0_i32_0 = arith.constant 0 : i32
    %c0_i32_1 = arith.constant 0 : i32
    return %c0_i32, %c0_i32_0 : i32, i32
  }
  func.func @transform_5(%arg0: i32) -> (i32, i32) {
    %c0_i32 = arith.constant 0 : i32
    %c0_i32_0 = arith.constant 0 : i32
    %c0_i32_1 = arith.constant 0 : i32
    return %c0_i32, %c0_i32_0 : i32, i32
  }
  func.func @transform_6(%arg0: i32) -> (i32, i32) {
    %c0_i32 = arith.constant 0 : i32
    %c0_i32_0 = arith.constant 0 : i32
    %c0_i32_1 = arith.constant 0 : i32
    return %c0_i32, %c0_i32_0 : i32, i32
  }
  func.func @transform_7(%arg0: i32) -> (i32, i32) {
    %c0_i32 = arith.constant 0 : i32
    %c0_i32_0 = arith.constant 0 : i32
    %c0_i32_1 = arith.constant 0 : i32
    return %c0_i32, %c0_i32_0 : i32, i32
  }
  func.func @transform_8(%arg0: i32) -> (i32, i32) {
    %c0_i32 = arith.constant 0 : i32
    %c0_i32_0 = arith.constant 0 : i32
    %c0_i32_1 = arith.constant 0 : i32
    return %c0_i32, %c0_i32_0 : i32, i32
  }
  func.func @transform_9(%arg0: i32) -> (i32, i32) {
    %c0_i32 = arith.constant 0 : i32
    %c0_i32_0 = arith.constant 0 : i32
    %c0_i32_1 = arith.constant 0 : i32
    return %c0_i32, %c0_i32_0 : i32, i32
  }
  func.func @transform_10(%arg0: i32) -> (i32, i32) {
    %c0_i32 = arith.constant 0 : i32
    %c0_i32_0 = arith.constant 0 : i32
    %c0_i32_1 = arith.constant 0 : i32
    return %c0_i32, %c0_i32_0 : i32, i32
  }
  func.func @transform_11(%arg0: i32) -> (i32, i32) {
    %c0_i32 = arith.constant 0 : i32
    %c0_i32_0 = arith.constant 0 : i32
    %c0_i32_1 = arith.constant 0 : i32
    return %c0_i32, %c0_i32_0 : i32, i32
  }
  func.func @transform_12(%arg0: i32) -> (i32, i32) {
    %c0_i32 = arith.constant 0 : i32
    %c0_i32_0 = arith.constant 0 : i32
    return %arg0, %c0_i32 : i32, i32
  }
}

</mosaic_0001>

<bundles_post_ra>
// kernel: tpu_custom_call.1
= control target key start
LH: loop header
LB: loop body
LE: loop exit
PB: predicated region body
PF: predicated region fallthrough
CT: control target
= control target key end

     0   :  { %17 = vsyncpa [#allocation5], 0  ;;  %s8085_s0 = inlined_call_operand.hbm [shape: f32[12], index: 0, kind: input, shape index: {}]   ;;  %s8086_s1 = inlined_call_operand.hbm [shape: f32[12,8,6144], index: 1, kind: input, shape index: {}]   ;;  %s8087_s2 = inlined_call_operand.hbm [shape: bf16[768,768], index: 2, kind: input, shape index: {}]   ;;  %s8088_s3 = inlined_call_operand.hbm [shape: f32[1,768], index: 3, kind: input, shape index: {}]   ;;  %s8089_s4 = inlined_call_operand.hbm [shape: f32[1,768], index: 4, kind: input, shape index: {}]   ;;  %s8090_s5 = inlined_call_operand.hbm [shape: f32[1,768], index: 5, kind: input, shape index: {}]   ;;  %s8091_s6 = inlined_call_operand.hbm [shape: bf16[768,768], index: 6, kind: input, shape index: {}]   ;;  %s8092_s7 = inlined_call_operand.hbm [shape: f32[1,768], index: 7, kind: input, shape index: {}]   ;;  %s8093_s8 = inlined_call_operand.hbm [shape: f32[1,768], index: 8, kind: input, shape index: {}]   ;;  %s8094_s9 = inlined_call_operand.hbm [shape: f32[1,768], index: 9, kind: input, shape index: {}]   ;;  %s8095_s10 = inlined_call_operand.hbm [shape: bf16[768,128], index: 10, kind: input, shape index: {}]   ;;  %s8096_s11 = inlined_call_operand.hbm [shape: f32[1,128], index: 11, kind: input, shape index: {}]   ;;  %s8097_s12 = inlined_call_operand.hbm [shape: f32[8,128], index: 12, kind: output, shape index: {}]  }
   0x1   :  { %18 = vsyncpa [#allocation3], 0 }
   0x2   :  { %19 = vsyncpa [#allocation8], 0 }
   0x3   :  { %20 = vsyncpa [#allocation11], 0 }
   0x4   :  { %21 = vsyncpa [#allocation14], 0 }
   0x5   :  { %22 = vsyncpa [#allocation17], 0 }
   0x6   :  { %23 = vsyncpa [#allocation20], 0 }
   0x7   :  { %24 = vsyncpa [#allocation4], 0  ;;  %s7492_s21 = smov [#allocation7]   ;;  %s7202_s25 = scalar_lea.hbm %s8087_s2, 36864 }
   0x8   :  { %s50_s22 = sshll.u32 %s7492_s21, 4  ;;  %p7203_p0 = scmp.ne.s32.totalorder %s8087_s2, %s7202_s25  ;;  %s51_s22 = int_to_ptr.vmem [resolvable:$true] %s50_s22 }
   0x9   :  { %p7206_p1 = scmp.lt.u32.totalorder %s7202_s25, %s8087_s2 }
   0xb   :  { %p7208_p2 = pnand %p7206_p1, %p7203_p0 }
   0xd   :  { %7211 = shalt.err (!%p7208_p2)
}
   0xe   :  { %s7212_s30 = scalar_lea.vmem %s51_s22, 36864  ;;  %p7217_p4 = scmp.lt.s32.totalorder %s51_s22, %s51_s22 }
   0xf   :  { %p7213_p3 = scmp.ne.s32.totalorder %s51_s22, %s7212_s30  ;;  %p7218_p5 = scmp.lt.s32.totalorder %s7212_s30, %s7212_s30 }
  0x11   :  { %p7219_p6 = por %p7218_p5, %p7217_p4 }
  0x13   :  { %p7220_p7 = pnand %p7219_p6, %p7213_p3 }
  0x15   :  { %7223 = shalt.err (!%p7220_p7)
}
  0x16   :  { %s7493_s13 = smov 384   ;;  %s7494_s14 = smov 24  }
  0x17   :  { %56 = dma.hbm_to_vmem [thread:$0]  %s8087_s2, 36864, %s51_s22, [#allocation8], %s7493_s13, %s7493_s13, %s7494_s14  }
  0x18   :  { %s7495_s17 = smov [#allocation10]   ;;  %s7496_s19 = smov [#allocation13]  }
  0x19   :  { %s73_s18 = sshll.u32 %s7495_s17, 4  ;;  %s92_s20 = sshll.u32 %s7496_s19, 4  ;;  %s74_s18 = int_to_ptr.vmem [resolvable:$true] %s73_s18  ;;  %s93_s20 = int_to_ptr.vmem [resolvable:$true] %s92_s20 }
  0x1a   :  { %s7224_s24 = scalar_lea.hbm %s8089_s4, 96 }
  0x1b   :  { %p7225_p8 = scmp.ne.s32.totalorder %s8089_s4, %s7224_s24  ;;  %p7228_p9 = scmp.lt.u32.totalorder %s7224_s24, %s8089_s4 }
  0x1d   :  { %p7230_p10 = pnand %p7228_p9, %p7225_p8 }
  0x1f   :  { %7233 = shalt.err (!%p7230_p10)
}
  0x20   :  { %s7234_s2 = scalar_lea.vmem %s74_s18, 96  ;;  %p7239_p12 = scmp.lt.s32.totalorder %s74_s18, %s74_s18 }
  0x21   :  { %p7235_p11 = scmp.ne.s32.totalorder %s74_s18, %s7234_s2  ;;  %p7240_p13 = scmp.lt.s32.totalorder %s7234_s2, %s7234_s2 }
  0x23   :  { %p7241_p0 = por %p7240_p13, %p7239_p12 }
  0x25   :  { %p7242_p1 = pnand %p7241_p0, %p7235_p11 }
  0x27   :  { %7245 = shalt.err (!%p7242_p1)
}
  0x28   :  { %76 = dma.hbm_to_vmem [thread:$0]  %s8089_s4, 96, %s74_s18, [#allocation11]  }
  0x29   :  { %s7246_s16 = scalar_lea.hbm %s8091_s6, 36864 }
  0x2a   :  { %p7247_p2 = scmp.ne.s32.totalorder %s8091_s6, %s7246_s16  ;;  %p7250_p3 = scmp.lt.u32.totalorder %s7246_s16, %s8091_s6 }
  0x2c   :  { %p7252_p4 = pnand %p7250_p3, %p7247_p2 }
  0x2e   :  { %7255 = shalt.err (!%p7252_p4)
}
  0x2f   :  { %s7256_s24 = scalar_lea.vmem %s93_s20, 36864  ;;  %p7261_p6 = scmp.lt.s32.totalorder %s93_s20, %s93_s20 }
  0x30   :  { %p7257_p5 = scmp.ne.s32.totalorder %s93_s20, %s7256_s24  ;;  %p7262_p7 = scmp.lt.s32.totalorder %s7256_s24, %s7256_s24 }
  0x32   :  { %p7263_p8 = por %p7262_p7, %p7261_p6 }
  0x34   :  { %p7264_p9 = pnand %p7263_p8, %p7257_p5 }
  0x36   :  { %7267 = shalt.err (!%p7264_p9)
}
  0x37   :  { %98 = dma.hbm_to_vmem [thread:$0]  %s8091_s6, 36864, %s93_s20, [#allocation14], %s7493_s13, %s7493_s13, %s7494_s14  }
  0x38   :  { %s7497_s25 = smov [#allocation16]   ;;  %s7498_s27 = smov [#allocation19]  }
  0x39   :  { %s115_s26 = sshll.u32 %s7497_s25, 4  ;;  %s134_s28 = sshll.u32 %s7498_s27, 4  ;;  %s116_s26 = int_to_ptr.vmem [resolvable:$true] %s115_s26  ;;  %s135_s28 = int_to_ptr.vmem [resolvable:$true] %s134_s28 }
  0x3a   :  { %s7268_s29 = scalar_lea.hbm %s8093_s8, 96 }
  0x3b   :  { %p7269_p10 = scmp.ne.s32.totalorder %s8093_s8, %s7268_s29  ;;  %p7272_p11 = scmp.lt.u32.totalorder %s7268_s29, %s8093_s8 }
  0x3d   :  { %p7274_p12 = pnand %p7272_p11, %p7269_p10 }
  0x3f   :  { %7277 = shalt.err (!%p7274_p12)
}
  0x40   :  { %s7278_s6 = scalar_lea.vmem %s116_s26, 96  ;;  %p7283_p0 = scmp.lt.s32.totalorder %s116_s26, %s116_s26 }
  0x41   :  { %p7279_p13 = scmp.ne.s32.totalorder %s116_s26, %s7278_s6  ;;  %p7284_p1 = scmp.lt.s32.totalorder %s7278_s6, %s7278_s6 }
  0x43   :  { %p7285_p2 = por %p7284_p1, %p7283_p0 }
  0x45   :  { %p7286_p3 = pnand %p7285_p2, %p7279_p13 }
  0x47   :  { %7289 = shalt.err (!%p7286_p3)
}
  0x48   :  { %118 = dma.hbm_to_vmem [thread:$0]  %s8093_s8, 96, %s116_s26, [#allocation17]  }
  0x49   :  { %s7290_s21 = scalar_lea.hbm %s8095_s10, 6144 }
  0x4a   :  { %p7291_p4 = scmp.ne.s32.totalorder %s8095_s10, %s7290_s21  ;;  %p7294_p5 = scmp.lt.u32.totalorder %s7290_s21, %s8095_s10 }
  0x4c   :  { %p7296_p6 = pnand %p7294_p5, %p7291_p4 }
  0x4e   :  { %7299 = shalt.err (!%p7296_p6)
}
  0x4f   :  { %s7300_s25 = scalar_lea.vmem %s135_s28, 6144  ;;  %p7305_p8 = scmp.lt.s32.totalorder %s135_s28, %s135_s28 }
  0x50   :  { %p7301_p7 = scmp.ne.s32.totalorder %s135_s28, %s7300_s25  ;;  %p7306_p9 = scmp.lt.s32.totalorder %s7300_s25, %s7300_s25 }
  0x52   :  { %p7307_p10 = por %p7306_p9, %p7305_p8 }
  0x54   :  { %p7308_p11 = pnand %p7307_p10, %p7301_p7 }
  0x56   :  { %7311 = shalt.err (!%p7308_p11)
}
  0x57   :  { %s7499_s8 = smov 64   ;;  %s7500_s26 = smov 4  }
  0x58   :  { %140 = dma.hbm_to_vmem [thread:$0]  %s8095_s10, 6144, %s135_s28, [#allocation20], %s7499_s8, %s7499_s8, %s7500_s26  }
  0x59   :  { %s7312_s30 = scalar_lea.hbm %s8085_s0, 16 }
  0x5a   :  { %p7313_p12 = scmp.ne.s32.totalorder %s8085_s0, %s7312_s30  ;;  %p7316_p13 = scmp.lt.u32.totalorder %s7312_s30, %s8085_s0 }
  0x5c   :  { %p7318_p0 = pnand %p7316_p13, %p7313_p12 }
  0x5e   :  { %7321 = shalt.err (!%p7318_p0)
}
  0x5f   :  { %s7501_s13 = smov [#allocation2]   ;;  %s7502_s10 = smov [#allocation6]  }
  0x60   :  { %32 = dma.hbm_to_smem %s8085_s0, 16, %s7501_s13, [#allocation5]  }
  0x61   :  { %s38_s28 = sshll.u32 %s7502_s10, 4  ;;  %s7322_s23 = scalar_lea.hbm %s8086_s1, 9216  ;;  %s39_s28 = int_to_ptr.vmem [resolvable:$true] %s38_s28 }
  0x62   :  { %p7323_p1 = scmp.ne.s32.totalorder %s8086_s1, %s7322_s23  ;;  %s7324_s8 = scalar_lea.hbm %s8086_s1, 73728 }
  0x63   :  { %p7325_p2 = scmp.lt.u32.totalorder %s7324_s8, %s7322_s23  ;;  %p7326_p3 = scmp.lt.u32.totalorder %s7322_s23, %s8086_s1 }
  0x65   :  { %p7327_p4 = por %p7326_p3, %p7325_p2 }
  0x67   :  { %p7328_p5 = pnand %p7327_p4, %p7323_p1 }
  0x69   :  { %7331 = shalt.err (!%p7328_p5)
}
  0x6a   :  { %s7332_s0 = scalar_lea.vmem %s39_s28, 9216  ;;  %p7337_p7 = scmp.lt.s32.totalorder %s39_s28, %s39_s28 }
  0x6b   :  { %p7333_p6 = scmp.ne.s32.totalorder %s39_s28, %s7332_s0  ;;  %p7338_p8 = scmp.lt.s32.totalorder %s7332_s0, %s7332_s0 }
  0x6d   :  { %p7339_p9 = por %p7338_p8, %p7337_p7 }
  0x6f   :  { %p7340_p10 = pnand %p7339_p9, %p7333_p6 }
  0x71   :  { %7343 = shalt.err (!%p7340_p10)
}
  0x72   :  { %s7503_s2 = smov 6144   ;;  %s7504_s22 = smov 768  }
  0x73   :  { %s7505_s29 = smov 48   ;;  %s7506_s16 = smov [#allocation9]  }
  0x74   :  { %44 = dma.hbm_to_vmem [thread:$0]  %s8086_s1, 9216, %s39_s28, [#allocation3], %s7503_s2, %s7504_s22, %s7505_s29  }
  0x75   :  { %s63_s17 = sshll.u32 %s7506_s16, 4  ;;  %s7507_s6 = smov [#allocation12]   ;;  %s64_s17 = int_to_ptr.vmem [resolvable:$true] %s63_s17 }
  0x76   :  { %s83_s13 = sshll.u32 %s7507_s6, 4  ;;  %s7344_s10 = scalar_lea.hbm %s8088_s3, 96  ;;  %s84_s13 = int_to_ptr.vmem [resolvable:$true] %s83_s13 }
  0x77   :  { %p7345_p11 = scmp.ne.s32.totalorder %s8088_s3, %s7344_s10  ;;  %p7348_p12 = scmp.lt.u32.totalorder %s7344_s10, %s8088_s3 }
  0x79   :  { %p7350_p13 = pnand %p7348_p12, %p7345_p11 }
  0x7b   :  { %7353 = shalt.err (!%p7350_p13)
}
  0x7c   :  { %s7354_s1 = scalar_lea.vmem %s64_s17, 96  ;;  %p7359_p1 = scmp.lt.s32.totalorder %s64_s17, %s64_s17 }
  0x7d   :  { %p7355_p0 = scmp.ne.s32.totalorder %s64_s17, %s7354_s1  ;;  %p7360_p2 = scmp.lt.s32.totalorder %s7354_s1, %s7354_s1 }
  0x7f   :  { %p7361_p3 = por %p7360_p2, %p7359_p1 }
  0x81   :  { %p7362_p4 = pnand %p7361_p3, %p7355_p0 }
  0x83   :  { %7365 = shalt.err (!%p7362_p4)
}
  0x84   :  { %66 = dma.hbm_to_vmem [thread:$0]  %s8088_s3, 96, %s64_s17, [#allocation8]  }
  0x85   :  { %s7366_s8 = scalar_lea.hbm %s8090_s5, 96 }
  0x86   :  { %p7367_p5 = scmp.ne.s32.totalorder %s8090_s5, %s7366_s8  ;;  %p7370_p6 = scmp.lt.u32.totalorder %s7366_s8, %s8090_s5 }
  0x88   :  { %p7372_p7 = pnand %p7370_p6, %p7367_p5 }
  0x8a   :  { %7375 = shalt.err (!%p7372_p7)
}
  0x8b   :  { %s7376_s22 = scalar_lea.vmem %s84_s13, 96  ;;  %p7381_p9 = scmp.lt.s32.totalorder %s84_s13, %s84_s13 }
  0x8c   :  { %p7377_p8 = scmp.ne.s32.totalorder %s84_s13, %s7376_s22  ;;  %p7382_p10 = scmp.lt.s32.totalorder %s7376_s22, %s7376_s22 }
  0x8e   :  { %p7383_p11 = por %p7382_p10, %p7381_p9 }
  0x90   :  { %p7384_p12 = pnand %p7383_p11, %p7377_p8 }
  0x92   :  { %7387 = shalt.err (!%p7384_p12)
}
  0x93   :  { %86 = dma.hbm_to_vmem [thread:$0]  %s8090_s5, 96, %s84_s13, [#allocation11]  }
  0x94   :  { %s7508_s30 = smov [#allocation15]   ;;  %s7509_s16 = smov [#allocation18]  }
  0x95   :  { %s105_s15 = sshll.u32 %s7508_s30, 4  ;;  %s125_s17 = sshll.u32 %s7509_s16, 4  ;;  %s106_s15 = int_to_ptr.vmem [resolvable:$true] %s105_s15  ;;  %s126_s17 = int_to_ptr.vmem [resolvable:$true] %s125_s17 }
  0x96   :  { %s7388_s20 = scalar_lea.hbm %s8092_s7, 96 }
  0x97   :  { %p7389_p13 = scmp.ne.s32.totalorder %s8092_s7, %s7388_s20  ;;  %p7392_p0 = scmp.lt.u32.totalorder %s7388_s20, %s8092_s7 }
  0x99   :  { %p7394_p1 = pnand %p7392_p0, %p7389_p13 }
  0x9b   :  { %7397 = shalt.err (!%p7394_p1)
}
  0x9c   :  { %s7398_s5 = scalar_lea.vmem %s106_s15, 96  ;;  %p7403_p3 = scmp.lt.s32.totalorder %s106_s15, %s106_s15 }
  0x9d   :  { %p7399_p2 = scmp.ne.s32.totalorder %s106_s15, %s7398_s5  ;;  %p7404_p4 = scmp.lt.s32.totalorder %s7398_s5, %s7398_s5 }
  0x9f   :  { %p7405_p5 = por %p7404_p4, %p7403_p3 }
  0xa1   :  { %p7406_p6 = pnand %p7405_p5, %p7399_p2 }
  0xa3   :  { %7409 = shalt.err (!%p7406_p6)
}
  0xa4   :  { %108 = dma.hbm_to_vmem [thread:$0]  %s8092_s7, 96, %s106_s15, [#allocation14]  }
  0xa5   :  { %s7410_s4 = scalar_lea.hbm %s8094_s9, 96 }
  0xa6   :  { %p7411_p7 = scmp.ne.s32.totalorder %s8094_s9, %s7410_s4  ;;  %p7414_p8 = scmp.lt.u32.totalorder %s7410_s4, %s8094_s9 }
  0xa8   :  { %p7416_p9 = pnand %p7414_p8, %p7411_p7 }
  0xaa   :  { %7419 = shalt.err (!%p7416_p9)
}
  0xab   :  { %s7420_s27 = scalar_lea.vmem %s126_s17, 96  ;;  %p7425_p11 = scmp.lt.s32.totalorder %s126_s17, %s126_s17 }
  0xac   :  { %p7421_p10 = scmp.ne.s32.totalorder %s126_s17, %s7420_s27  ;;  %p7426_p12 = scmp.lt.s32.totalorder %s7420_s27, %s7420_s27 }
  0xae   :  { %p7427_p13 = por %p7426_p12, %p7425_p11 }
  0xb0   :  { %p7428_p0 = pnand %p7427_p13, %p7421_p10 }
  0xb2   :  { %7431 = shalt.err (!%p7428_p0)
}
  0xb3   :  { %128 = dma.hbm_to_vmem [thread:$0]  %s8094_s9, 96, %s126_s17, [#allocation17]  }
  0xb4   :  { %s7510_s2 = smov [#allocation21]   ;;  %s7432_s30 = scalar_lea.hbm %s8096_s11, 16 }
  0xb5   :  { %s147_s22 = sshll.u32 %s7510_s2, 4  ;;  %p7433_p1 = scmp.ne.s32.totalorder %s8096_s11, %s7432_s30  ;;  %s148_s22 = int_to_ptr.vmem [resolvable:$true] %s147_s22 }
  0xb6   :  { %p7436_p2 = scmp.lt.u32.totalorder %s7432_s30, %s8096_s11 }
  0xb8   :  { %p7438_p3 = pnand %p7436_p2, %p7433_p1 }
  0xba   :  { %7441 = shalt.err (!%p7438_p3)
}
  0xbb   :  { %s7442_s20 = scalar_lea.vmem %s148_s22, 16  ;;  %s7446_s9 = scalar_lea.vmem %s148_s22, 32 }
  0xbc   :  { %p7443_p4 = scmp.ne.s32.totalorder %s148_s22, %s7442_s20  ;;  %p7447_p5 = scmp.lt.s32.totalorder %s148_s22, %s148_s22 }
  0xbd   :  { %p7448_p6 = scmp.lt.s32.totalorder %s7446_s9, %s7442_s20 }
  0xbf   :  { %p7449_p7 = por %p7448_p6, %p7447_p5 }
  0xc1   :  { %p7450_p8 = pnand %p7449_p7, %p7443_p4 }
  0xc3   :  { %7453 = shalt.err (!%p7450_p8)
}
  0xc4   :  { %150 = dma.hbm_to_vmem [thread:$0]  %s8096_s11, 16, %s148_s22, [#allocation20]  }
  0xc5   :  { %7476 = dma.done.wait [#allocation5], 16  }
  0xc6   :  { %7477 = vsyncadd [#allocation5], 4294967280 }
  0xc7   :  { %7478 = dma.done.wait [#allocation3], 9216  }
  0xc8   :  { %7479 = vsyncadd [#allocation3], 4294958080 }
  0xc9   :  { %7480 = dma.done.wait [#allocation8], 36960  }
  0xca   :  { %7481 = vsyncadd [#allocation8], 4294930336 }
  0xcb   :  { %7482 = dma.done.wait [#allocation11], 192  }
  0xcc   :  { %7483 = vsyncadd [#allocation11], 4294967104 }
  0xcd   :  { %7484 = dma.done.wait [#allocation14], 36960  }
  0xce   :  { %7485 = vsyncadd [#allocation14], 4294930336 }
  0xcf   :  { %7486 = dma.done.wait [#allocation17], 192  }
  0xd0   :  { %7487 = vsyncadd [#allocation17], 4294967104 }
  0xd1   :  { %7488 = dma.done.wait [#allocation20], 6160  }
  0xd2   :  { %7489 = vsyncadd [#allocation20], 4294961136 }
  0xd3   :  { %187 = sfence }
  0xd4   :  { %v6286_v0 = vld [vmem:[#allocation7 + $0x4] ss:$24 sps:$4 sm:$0xff]   ;;  %v6288_v1 = vld [vmem:[#allocation7] ss:$24 sps:$4 sm:$0xff]   ;;  %v6291_v3 = vld [vmem:[#allocation7 + $0x34] ss:$24 sps:$4 sm:$0xff]  }
  0xd5   :  { %2200 = vmatprep.subr.bf16.mxu0 %v6286_v0  ;;  %v6289_v2 = vld [vmem:[#allocation7 + $0xc] ss:$24 sps:$4 sm:$0xff]   ;;  %v6293_v4 = vld [vmem:[#allocation7 + $0x8] ss:$24 sps:$4 sm:$0xff]   ;;  %v6295_v6 = vld [vmem:[#allocation7 + $0x3c] ss:$24 sps:$4 sm:$0xff]  }
  0xd6   :  { %2201 = vmatpush1.bf16.msra.mxu0 %v6288_v1  ;;  %v6294_v5 = vld [vmem:[#allocation7 + $0x30] ss:$24 sps:$4 sm:$0xff]   ;;  %2323 = vmatprep.subr.bf16.mxu1 %v6289_v2  ;;  %v6297_v7 = vld [vmem:[#allocation7 + $0x64] ss:$24 sps:$4 sm:$0xff]   ;;  %v6300_v9 = vld [vmem:[#allocation7 + $0x60] ss:$24 sps:$4 sm:$0xff]  }
  0xd7   :  { %2202 = vmatprep.subr.bf16.mxu0 %v6291_v3  ;;  %2324 = vmatpush1.bf16.msra.mxu1 %v6293_v4  ;;  %v6299_v8 = vld [vmem:[#allocation7 + $0x38] ss:$24 sps:$4 sm:$0xff]   ;;  %v6301_v10 = vld [vmem:[#allocation7 + $0x6c] ss:$24 sps:$4 sm:$0xff]   ;;  %v6305_v12 = vld [vmem:[#allocation7 + $0x68] ss:$24 sps:$4 sm:$0xff]  }
  0xd8   :  { %2325 = vmatprep.subr.bf16.mxu1 %v6295_v6  ;;  %v6303_v11 = vld [vmem:[#allocation7 + $0x94] ss:$24 sps:$4 sm:$0xff]   ;;  %v6306_v14 = vld [vmem:[#allocation7 + $0x90] ss:$24 sps:$4 sm:$0xff]   ;;  %v6309_v15 = vld [vmem:[#allocation7 + $0xc4] ss:$24 sps:$4 sm:$0xff]  }
  0xd9   :  { %v6307_v13 = vld [vmem:[#allocation7 + $0x9c] ss:$24 sps:$4 sm:$0xff]   ;;  %v6311_v16 = vld [vmem:[#allocation7 + $0x98] ss:$24 sps:$4 sm:$0xff]   ;;  %v6313_v17 = vld [vmem:[#allocation7 + $0xcc] ss:$24 sps:$4 sm:$0xff]  }
  0xda   :  { %2203 = vmatpush1.bf16.msra.mxu0 %v6294_v5  ;;  %v6312_v18 = vld [vmem:[#allocation7 + $0xc0] ss:$24 sps:$4 sm:$0xff]   ;;  %v6315_v19 = vld [vmem:[#allocation7 + $0xf4] ss:$24 sps:$4 sm:$0xff]   ;;  %v6318_v22 = vld [vmem:[#allocation7 + $0xf0] ss:$24 sps:$4 sm:$0xff]  }
  0xdb   :  { %2204 = vmatprep.subr.bf16.mxu0 %v6297_v7  ;;  %2326 = vmatpush1.bf16.msra.mxu1 %v6299_v8  ;;  %v6317_v20 = vld [vmem:[#allocation7 + $0xc8] ss:$24 sps:$4 sm:$0xff]   ;;  %v6319_v21 = vld [vmem:[#allocation7 + $0xfc] ss:$24 sps:$4 sm:$0xff]   ;;  %v6323_v24 = vld [vmem:[#allocation7 + $0xf8] ss:$24 sps:$4 sm:$0xff]  }
  0xdc   :  { %2327 = vmatprep.subr.bf16.mxu1 %v6301_v10  ;;  %v6321_v23 = vld [vmem:[#allocation7 + $0x124] ss:$24 sps:$4 sm:$0xff]   ;;  %v6324_v26 = vld [vmem:[#allocation7 + $0x120] ss:$24 sps:$4 sm:$0xff]   ;;  %v6327_v27 = vld [vmem:[#allocation7 + $0x154] ss:$24 sps:$4 sm:$0xff]  }
  0xdd   :  { %v6325_v25 = vld [vmem:[#allocation7 + $0x12c] ss:$24 sps:$4 sm:$0xff]   ;;  %v6329_v28 = vld [vmem:[#allocation7 + $0x128] ss:$24 sps:$4 sm:$0xff]   ;;  %v6331_v29 = vld [vmem:[#allocation7 + $0x15c] ss:$24 sps:$4 sm:$0xff]  }
  0xde   :  { %2205 = vmatpush1.bf16.msra.mxu0 %v6300_v9  ;;  %v6330_v30 = vld [vmem:[#allocation7 + $0x150] ss:$24 sps:$4 sm:$0xff]   ;;  %v6333_v31 = vld [vmem:[#allocation7 + $0x184] ss:$24 sps:$4 sm:$0xff]   ;;  %v6336_v34 = vld [vmem:[#allocation7 + $0x180] ss:$24 sps:$4 sm:$0xff]  }
  0xdf   :  { %2206 = vmatprep.subr.bf16.mxu0 %v6303_v11  ;;  %2328 = vmatpush1.bf16.msra.mxu1 %v6305_v12  ;;  %v6335_v32 = vld [vmem:[#allocation7 + $0x158] ss:$24 sps:$4 sm:$0xff]   ;;  %v6337_v33 = vld [vmem:[#allocation7 + $0x18c] ss:$24 sps:$4 sm:$0xff]   ;;  %s189_s11 = sld [smem:[#allocation2]]  ;;  %s5504_s19 = sld [smem:[#allocation2 + $0x1]] }
  0xe0   :  { %2329 = vmatprep.subr.bf16.mxu1 %v6307_v13  ;;  %v6339_v35 = vld [vmem:[#allocation7 + $0x1b4] ss:$24 sps:$4 sm:$0xff]   ;;  %v6341_v36 = vld [vmem:[#allocation7 + $0x188] ss:$24 sps:$4 sm:$0xff]   ;;  %s5505_s21 = sld [smem:[#allocation2 + $0x2]]  ;;  %s5506_s23 = sld [smem:[#allocation2 + $0x3]] }
  0xe1   :  { %v6343_v37 = vld [vmem:[#allocation7 + $0x1bc] ss:$24 sps:$4 sm:$0xff]   ;;  %v6342_v38 = vld [vmem:[#allocation7 + $0x1b0] ss:$24 sps:$4 sm:$0xff]   ;;  %s7730_s5 = sld [smem:[#allocation2 + $0x4]]  ;;  %s7732_s13 = sld [smem:[#allocation2 + $0x5]] }
  0xe2   :  { %2207 = vmatpush1.bf16.msra.mxu0 %v6306_v14  ;;  %v6345_v39 = vld [vmem:[#allocation7 + $0x1e4] ss:$24 sps:$4 sm:$0xff]   ;;  %v6347_v40 = vld [vmem:[#allocation7 + $0x1b8] ss:$24 sps:$4 sm:$0xff]   ;;  %v6351_v43 = vld [vmem:[#allocation7 + $0x214] ss:$24 sps:$4 sm:$0xff]  }
  0xe3   :  { %2208 = vmatprep.subr.bf16.mxu0 %v6309_v15  ;;  %2330 = vmatpush1.bf16.msra.mxu1 %v6311_v16  ;;  %v6349_v41 = vld [vmem:[#allocation7 + $0x1ec] ss:$24 sps:$4 sm:$0xff]   ;;  %v6348_v42 = vld [vmem:[#allocation7 + $0x1e0] ss:$24 sps:$4 sm:$0xff]   ;;  %s7738_s24 = sld [smem:[#allocation2 + $0x6]]  ;;  %s7744_s1 = sld [smem:[#allocation2 + $0x7]] }
  0xe4   :  { %2331 = vmatprep.subr.bf16.mxu1 %v6313_v17  ;;  %v6353_v46 = vld [vmem:[#allocation7 + $0x1e8] ss:$24 sps:$4 sm:$0xff]   ;;  %v6355_v48 = vld [vmem:[#allocation7 + $0x21c] ss:$24 sps:$4 sm:$0xff]   ;;  %s7752_s28 = sld [smem:[#allocation2 + $0x8]]  ;;  %s7758_s4 = sld [smem:[#allocation2 + $0x9]] }
  0xe5   :  { %v7734_v44 = vstv %s189_s11  ;;  %v7736_v45 = vstv %s5504_s19  ;;  %v191_v49 = vld [vmem:[#allocation6 + $0x8] sm:$0xff]  ;;  %v206_v50 = vld [vmem:[#allocation6 + $0x38] sm:$0xff]  ;;  %s7765_s18 = sld [smem:[#allocation2 + $0xa]]  ;;  %v190_v10 = vld [vmem:[#allocation6] sm:$0xff]  ;;  %s7773_s25 = sld [smem:[#allocation2 + $0xb]] }
  0xe6   :  { %2209 = vmatpush1.bf16.msra.mxu0 %v6312_v18  ;;  %v7740_v47 = vstv %s5505_s21  ;;  %v7742_v51 = vstv %s5506_s23  ;;  %v6354_v52 = vld [vmem:[#allocation7 + $0x210] ss:$24 sps:$4 sm:$0xff]   ;;  %v198_v53 = vmul.f32 %v7734_v44, %v191_v49  ;;  %v213_v54 = vmul.f32 %v7736_v45, %v206_v50  ;;  %v248_v56 = vld [vmem:[#allocation6 + $0x98] sm:$0xff]  ;;  %v6361_v2 = vld [vmem:[#allocation7 + $0x24c] ss:$24 sps:$4 sm:$0xff]   ;;  %s7511_s8 = smov [#allocation22]  }
  0xe7   :  { %2210 = vmatprep.subr.bf16.mxu0 %v6315_v19  ;;  %2332 = vmatpush1.bf16.msra.mxu1 %v6317_v20  ;;  %v227_v55 = vld [vmem:[#allocation6 + $0x68] sm:$0xff]  ;;  %v6357_v57 = vld [vmem:[#allocation7 + $0x244] ss:$24 sps:$4 sm:$0xff]   ;;  %v7750_v60 = vstv %s7730_s5  ;;  %v6359_v61 = vld [vmem:[#allocation7 + $0x218] ss:$24 sps:$4 sm:$0xff]   ;;  %v255_v63 = vmul.f32 %v7742_v51, %v248_v56  ;;  %v7756_v1 = vstv %s7732_s13  ;;  %v197_v16 = vmul.f32 %v7734_v44, %v190_v10  ;;  %s5489_s26 = sshll.u32 %s7511_s8, 4  ;;  %s5490_s26 = int_to_ptr.vmem [resolvable:$true] %s5489_s26 }
  0xe8   :  { %2333 = vmatprep.subr.bf16.mxu1 %v6319_v21  ;;  %v234_v58 = vmul.f32 %v7740_v47, %v227_v55  ;;  %v269_v59 = vld [vmem:[#allocation6 + $0xc8] sm:$0xff]  ;;  %v219_v62 = vadd.f32 %v213_v54, %v198_v53  ;;  %v290_v0 = vld [vmem:[#allocation6 + $0xf8] sm:$0xff]  ;;  %v205_v11 = vld [vmem:[#allocation6 + $0x30] sm:$0xff]  ;;  %s7454_s27 = scalar_lea.vmem %s5490_s26, 128  ;;  %p7459_p10 = scmp.lt.s32.totalorder %s5490_s26, %s5490_s26 }
  0xe9   :  { %v6360_v3 = vld [vmem:[#allocation7 + $0x240] ss:$24 sps:$4 sm:$0xff]   ;;  %v6363_v4 = vld [vmem:[#allocation7 + $0x274] ss:$24 sps:$4 sm:$0xff]   ;;  %v276_v6 = vmul.f32 %v7750_v60, %v269_v59  ;;  %v297_v8 = vmul.f32 %v7756_v1, %v290_v0  ;;  %v7763_v9 = vstv %s7738_s24  ;;  %v6366_v14 = vld [vmem:[#allocation7 + $0x270] ss:$24 sps:$4 sm:$0xff]   ;;  %v212_v17 = vmul.f32 %v7736_v45, %v205_v11  ;;  %p7455_p9 = scmp.ne.s32.totalorder %s5490_s26, %s7454_s27  ;;  %p7460_p11 = scmp.lt.s32.totalorder %s7454_s27, %s7454_s27 }
  0xea   :  { %2211 = vmatpush1.bf16.msra.mxu0 %v6318_v22  ;;  %v240_v5 = vadd.f32 %v234_v58, %v219_v62  ;;  %v311_v7 = vld [vmem:[#allocation6 + $0x128] sm:$0xff]  ;;  %v226_v12 = vld [vmem:[#allocation6 + $0x60] sm:$0xff]  ;;  %v247_v19 = vld [vmem:[#allocation6 + $0x90] sm:$0xff]  ;;  %v7771_v22 = vstv %s7744_s1 }
  0xeb   :  { %2212 = vmatprep.subr.bf16.mxu0 %v6321_v23  ;;  %2334 = vmatpush1.bf16.msra.mxu1 %v6323_v24  ;;  %v6365_v13 = vld [vmem:[#allocation7 + $0x248] ss:$24 sps:$4 sm:$0xff]   ;;  %v233_v18 = vmul.f32 %v7740_v47, %v226_v12  ;;  %v6367_v20 = vld [vmem:[#allocation7 + $0x27c] ss:$24 sps:$4 sm:$0xff]   ;;  %v7788_v53 = vstv %s7765_s18  ;;  %v7793_v62 = vstv %s7773_s25  ;;  %v6384_v11 = vld [vmem:[#allocation7 + $0x2d8] ss:$24 sps:$4 sm:$0xff]   ;;  %p7461_p12 = por %p7460_p11, %p7459_p10 }
  0xec   :  { %2335 = vmatprep.subr.bf16.mxu1 %v6325_v25  ;;  %v261_v15 = vadd.f32 %v255_v63, %v240_v5  ;;  %v332_v21 = vld [vmem:[#allocation6 + $0x158] sm:$0xff]  ;;  %v268_v23 = vld [vmem:[#allocation6 + $0xc0] sm:$0xff]  ;;  %v395_v49 = vld [vmem:[#allocation6 + $0x1e8] sm:$0xff] }
  0xed   :  { %v6369_v24 = vld [vmem:[#allocation7 + $0x2a4] ss:$24 sps:$4 sm:$0xff]   ;;  %v6371_v25 = vld [vmem:[#allocation7 + $0x278] ss:$24 sps:$4 sm:$0xff]   ;;  %p7462_p13 = pnand %p7461_p12, %p7455_p9 }
  0xee   :  { %2213 = vmatpush1.bf16.msra.mxu0 %v6324_v26  ;;  %v282_v26 = vadd.f32 %v276_v6, %v261_v15  ;;  %v331_v54 = vld [vmem:[#allocation6 + $0x150] sm:$0xff]  ;;  %v352_v63 = vld [vmem:[#allocation6 + $0x180] sm:$0xff] }
  0xef   :  { %2214 = vmatprep.subr.bf16.mxu0 %v6327_v27  ;;  %2336 = vmatpush1.bf16.msra.mxu1 %v6329_v28  ;;  %v318_v27 = vmul.f32 %v7763_v9, %v311_v7  ;;  %v353_v28 = vld [vmem:[#allocation6 + $0x188] sm:$0xff]  ;;  %v6379_v55 = vld [vmem:[#allocation7 + $0x2dc] ss:$24 sps:$4 sm:$0xff]   ;;  %v338_v6 = vmul.f32 %v7771_v22, %v331_v54 }
  0xf0   :  { %2337 = vmatprep.subr.bf16.mxu1 %v6331_v29  ;;  %v218_v29 = vadd.f32 %v212_v17, %v197_v16  ;;  %v6378_v0 = vld [vmem:[#allocation7 + $0x2d0] ss:$24 sps:$4 sm:$0xff]   ;;  %v6387_v15 = vld [vmem:[#allocation7 + $0x30c] ss:$24 sps:$4 sm:$0xff]  }
  0xf1   :  { %v373_v7 = vld [vmem:[#allocation6 + $0x1b0] sm:$0xff]  ;;  %v6409_v54 = vld [vmem:[#allocation7 + $0x3c8] ss:$24 sps:$4 sm:$0xff]  }
  0xf2   :  { %2215 = vmatpush1.bf16.msra.mxu0 %v6330_v30  ;;  %v254_v30 = vmul.f32 %v7742_v51, %v247_v19  ;;  %v415_v19 = vld [vmem:[#allocation6 + $0x210] sm:$0xff] }
  0xf3   :  { %2216 = vmatprep.subr.bf16.mxu0 %v6333_v31  ;;  %2338 = vmatpush1.bf16.msra.mxu1 %v6335_v32  ;;  %v7778_v31 = vstv %s7752_s28  ;;  %v289_v32 = vld [vmem:[#allocation6 + $0xf0] sm:$0xff] }
  0xf4   :  { %2339 = vmatprep.subr.bf16.mxu1 %v6337_v33  ;;  %v6372_v33 = vld [vmem:[#allocation7 + $0x2a0] ss:$24 sps:$4 sm:$0xff]  }
  0xf6   :  { %2217 = vmatpush1.bf16.msra.mxu0 %v6336_v34  ;;  %v6373_v34 = vld [vmem:[#allocation7 + $0x2ac] ss:$24 sps:$4 sm:$0xff]  }
  0xf7   :  { %2218 = vmatprep.subr.bf16.mxu0 %v6339_v35  ;;  %2340 = vmatpush1.bf16.msra.mxu1 %v6341_v36  ;;  %v303_v35 = vadd.f32 %v297_v8, %v282_v26  ;;  %v339_v36 = vmul.f32 %v7771_v22, %v332_v21  ;;  %v422_v26 = vmul.f32 %v7793_v62, %v415_v19  ;;  %v192_v19 = vld [vmem:[#allocation6 + $0x10] sm:$0xff] }
  0xf8   :  { %2341 = vmatprep.subr.bf16.mxu1 %v6343_v37  ;;  %v239_v37 = vadd.f32 %v233_v18, %v218_v29 }
  0xfa   :  { %2219 = vmatpush1.bf16.msra.mxu0 %v6342_v38  ;;  %v275_v38 = vmul.f32 %v7750_v60, %v268_v23  ;;  %v260_v50 = vadd.f32 %v254_v30, %v239_v37  ;;  %v6385_v30 = vld [vmem:[#allocation7 + $0x308] ss:$24 sps:$4 sm:$0xff]   ;;  %v6396_v37 = vld [vmem:[#allocation7 + $0x364] ss:$24 sps:$4 sm:$0xff]  }
  0xfb   :  { %2220 = vmatprep.subr.bf16.mxu0 %v6345_v39  ;;  %2342 = vmatpush1.bf16.msra.mxu1 %v6347_v40  ;;  %v6375_v39 = vld [vmem:[#allocation7 + $0x2d4] ss:$24 sps:$4 sm:$0xff]   ;;  %v374_v40 = vld [vmem:[#allocation6 + $0x1b8] sm:$0xff] }
  0xfc   :  { %2343 = vmatprep.subr.bf16.mxu1 %v6349_v41  ;;  %v7783_v41 = vstv %s7758_s4  ;;  %v281_v58 = vadd.f32 %v275_v38, %v260_v50  ;;  %v6399_v38 = vld [vmem:[#allocation7 + $0x36c] ss:$24 sps:$4 sm:$0xff]  }
  0xfd   :  { %v380_v18 = vmul.f32 %v7783_v41, %v373_v7  ;;  %v6411_v50 = vld [vmem:[#allocation7 + $0x3cc] ss:$24 sps:$4 sm:$0xff]  }
  0xfe   :  { %2221 = vmatpush1.bf16.msra.mxu0 %v6348_v42  ;;  %v310_v42 = vld [vmem:[#allocation6 + $0x120] sm:$0xff] }
  0xff   :  { %2222 = vmatprep.subr.bf16.mxu0 %v6351_v43  ;;  %2344 = vmatpush1.bf16.msra.mxu1 %v6353_v46  ;;  %v6377_v43 = vld [vmem:[#allocation7 + $0x2a8] ss:$24 sps:$4 sm:$0xff]   ;;  %v324_v46 = vadd.f32 %v318_v27, %v303_v35  ;;  %v317_v59 = vmul.f32 %v7763_v9, %v310_v42  ;;  %v6402_v42 = vld [vmem:[#allocation7 + $0x394] ss:$24 sps:$4 sm:$0xff]  }
 0x100   :  { %2345 = vmatprep.subr.bf16.mxu1 %v6355_v48  ;;  %v360_v48 = vmul.f32 %v7778_v31, %v353_v28  ;;  %v6381_v28 = vld [vmem:[#allocation7 + $0x300] ss:$24 sps:$4 sm:$0xff]   ;;  %v6388_v35 = vld [vmem:[#allocation7 + $0x330] ss:$24 sps:$4 sm:$0xff]  }
 0x101   :  { %v345_v56 = vadd.f32 %v339_v36, %v324_v46  ;;  %v6391_v36 = vld [vmem:[#allocation7 + $0x338] ss:$24 sps:$4 sm:$0xff]  }
 0x102   :  { %2223 = vmatpush1.bf16.msra.mxu0 %v6354_v52  ;;  %v296_v52 = vmul.f32 %v7756_v1, %v289_v32  ;;  %v6390_v32 = vld [vmem:[#allocation7 + $0x334] ss:$24 sps:$4 sm:$0xff]   ;;  %v6400_v46 = vld [vmem:[#allocation7 + $0x390] ss:$24 sps:$4 sm:$0xff]  }
 0x103   :  { %2224 = vmatprep.subr.bf16.mxu0 %v6357_v57  ;;  %2346 = vmatpush1.bf16.msra.mxu1 %v6359_v61  ;;  %v381_v57 = vmul.f32 %v7783_v41, %v374_v40  ;;  %v416_v61 = vld [vmem:[#allocation6 + $0x218] sm:$0xff]  ;;  %v6397_v40 = vld [vmem:[#allocation7 + $0x368] ss:$24 sps:$4 sm:$0xff]  }
 0x104   :  { %2347 = vmatprep.subr.bf16.mxu1 %v6361_v2  ;;  %v366_v2 = vadd.f32 %v360_v48, %v345_v56  ;;  %v302_v5 = vadd.f32 %v296_v52, %v281_v58  ;;  %v423_v10 = vmul.f32 %v7793_v62, %v416_v61  ;;  %v6403_v48 = vld [vmem:[#allocation7 + $0x398] ss:$24 sps:$4 sm:$0xff]   ;;  %v6417_v56 = vld [vmem:[#allocation7 + $0x3fc] ss:$24 sps:$4 sm:$0xff]   ;;  %v6423_v61 = vld [vmem:[#allocation7 + $0x42c] ss:$24 sps:$4 sm:$0xff]  }
 0x105   :  { %v6406_v52 = vld [vmem:[#allocation7 + $0x3c0] ss:$24 sps:$4 sm:$0xff]  }
 0x106   :  { %2225 = vmatpush1.bf16.msra.mxu0 %v6360_v3  ;;  %v402_v3 = vmul.f32 %v7788_v53, %v395_v49  ;;  %v387_v8 = vadd.f32 %v381_v57, %v366_v2  ;;  %v323_v12 = vadd.f32 %v317_v59, %v302_v5  ;;  %v6408_v49 = vld [vmem:[#allocation7 + $0x3c4] ss:$24 sps:$4 sm:$0xff]   ;;  %v6412_v57 = vld [vmem:[#allocation7 + $0x3f0] ss:$24 sps:$4 sm:$0xff]  }
 0x107   :  { %2226 = vmatprep.subr.bf16.mxu0 %v6363_v4  ;;  %2348 = vmatpush1.bf16.msra.mxu1 %v6365_v13  ;;  %v6383_v4 = vld [vmem:[#allocation7 + $0x304] ss:$24 sps:$4 sm:$0xff]   ;;  %v359_v13 = vmul.f32 %v7778_v31, %v352_v63  ;;  %v6415_v58 = vld [vmem:[#allocation7 + $0x3f8] ss:$24 sps:$4 sm:$0xff]   ;;  %v250_v5 = vld [vmem:[#allocation6 + $0xa8] sm:$0xff] }
 0x108   :  { %2349 = vmatprep.subr.bf16.mxu1 %v6367_v20  ;;  %v408_v16 = vadd.f32 %v402_v3, %v387_v8  ;;  %v344_v17 = vadd.f32 %v338_v6, %v323_v12  ;;  %v6420_v59 = vld [vmem:[#allocation7 + $0x424] ss:$24 sps:$4 sm:$0xff]   ;;  %v6418_v6 = vld [vmem:[#allocation7 + $0x420] ss:$24 sps:$4 sm:$0xff]  }
 0x109   :  { %v193_v63 = vld [vmem:[#allocation6 + $0x18] sm:$0xff] }
 0x10a   :  { %2227 = vmatpush1.bf16.msra.mxu0 %v6366_v14  ;;  %v394_v14 = vld [vmem:[#allocation6 + $0x1e0] sm:$0xff]  ;;  %v429_v20 = vadd.f32 %v423_v10, %v408_v16  ;;  %v365_v21 = vadd.f32 %v359_v13, %v344_v17  ;;  %v200_v2 = vmul.f32 %v7734_v44, %v193_v63  ;;  %v271_v8 = vld [vmem:[#allocation6 + $0xd8] sm:$0xff]  ;;  %v257_v13 = vmul.f32 %v7742_v51, %v250_v5 }
 0x10b   :  { %2228 = vmatprep.subr.bf16.mxu0 %v6369_v24  ;;  %2350 = vmatpush1.bf16.msra.mxu1 %v6371_v25  ;;  %v401_v23 = vmul.f32 %v7788_v53, %v394_v14  ;;  %v6421_v10 = vld [vmem:[#allocation7 + $0x428] ss:$24 sps:$4 sm:$0xff]   ;;  %v278_v17 = vmul.f32 %v7750_v60, %v271_v8  ;;  %v6439_v63 = vld [vmem:[#allocation7 + $0x4b8] ss:$24 sps:$4 sm:$0xff]   ;;  %v6444_v5 = vld [vmem:[#allocation7 + $0x4e4] ss:$24 sps:$4 sm:$0xff]  }
 0x10c   :  { %2351 = vmatprep.subr.bf16.mxu1 %v6373_v34  ;;  %v7801_v24 = vpack.c.bf16 %v429_v20, %v429_v20  ;;  %v386_v25 = vadd.f32 %v380_v18, %v365_v21  ;;  %v6393_v34 = vld [vmem:[#allocation7 + $0x33c] ss:$24 sps:$4 sm:$0xff]   ;;  %v292_v14 = vld [vmem:[#allocation6 + $0x108] sm:$0xff]  ;;  %v199_v21 = vmul.f32 %v7734_v44, %v192_v19 }
 0x10d   :  { %v313_v18 = vld [vmem:[#allocation6 + $0x138] sm:$0xff]  ;;  %v299_v20 = vmul.f32 %v7756_v1, %v292_v14  ;;  %v418_v14 = vld [vmem:[#allocation6 + $0x228] sm:$0xff] }
 0x10e   :  { %2229 = vmatpush1.bf16.msra.mxu0 %v6372_v33  ;;  %2232 = vmatprep.mubr.bf16.mxu0 %v7801_v24  ;;  %v407_v27 = vadd.f32 %v401_v23, %v386_v25  ;;  %v207_v23 = vld [vmem:[#allocation6 + $0x40] sm:$0xff]  ;;  %v228_v25 = vld [vmem:[#allocation6 + $0x70] sm:$0xff]  ;;  %v397_v8 = vld [vmem:[#allocation6 + $0x1f8] sm:$0xff] }
 0x10f   :  { %2230 = vmatprep.subr.bf16.mxu0 %v6375_v39  ;;  %2352 = vmatpush1.bf16.msra.mxu1 %v6377_v43  ;;  %v6394_v39 = vld [vmem:[#allocation7 + $0x360] ss:$24 sps:$4 sm:$0xff]   ;;  %v6405_v43 = vld [vmem:[#allocation7 + $0x39c] ss:$24 sps:$4 sm:$0xff]  }
 0x110   :  { %2353 = vmatprep.subr.bf16.mxu1 %v6379_v55  ;;  %2355 = vmatprep.mubr.bf16.mxu1 %v7801_v24  ;;  %v428_v29 = vadd.f32 %v422_v26, %v407_v27  ;;  %v6414_v55 = vld [vmem:[#allocation7 + $0x3f4] ss:$24 sps:$4 sm:$0xff]   ;;  %v249_v26 = vld [vmem:[#allocation6 + $0xa0] sm:$0xff]  ;;  %v6424_v27 = vld [vmem:[#allocation7 + $0x450] ss:$24 sps:$4 sm:$0xff]  }
 0x111   :  { %v6445_v19 = vld [vmem:[#allocation7 + $0x4e8] ss:$24 sps:$4 sm:$0xff]  }
 0x112   :  { %2231 = vmatpush1.bf16.msra.mxu0 %v6378_v0  ;;  %v7806_v33 = vpack.c.bf16 %v428_v29, %v428_v29  ;;  %v208_v0 = vld [vmem:[#allocation6 + $0x48] sm:$0xff] }
 0x113   :  { %2241 = vmatprep.subr.bf16.mxu0 %v6383_v4  ;;  %2354 = vmatpush1.bf16.msra.mxu1 %v6384_v11  ;;  %v215_v3 = vmul.f32 %v7736_v45, %v208_v0  ;;  %v229_v4 = vld [vmem:[#allocation6 + $0x78] sm:$0xff]  ;;  %v6426_v11 = vld [vmem:[#allocation7 + $0x454] ss:$24 sps:$4 sm:$0xff]  }
 0x114   :  { %2364 = vmatprep.subr.bf16.mxu1 %v6387_v15  ;;  %v236_v7 = vmul.f32 %v7740_v47, %v229_v4  ;;  %v6429_v15 = vld [vmem:[#allocation7 + $0x45c] ss:$24 sps:$4 sm:$0xff]  }
 0x115   :  { %2233 = vmatmul.mubr.bf16.vlgmr.msra.gmra.mrb[0].mxu0 %v7806_v33  ;;  %v221_v12 = vadd.f32 %v215_v3, %v200_v2 }
 0x116   :  { %2356 = vmatmul.mubr.bf16.vlgmr.msra.gmra.mrb[0].mxu1 %v7806_v33  ;;  %2242 = vmatpush1.bf16.msra.mxu0 %v6381_v28  ;;  %v6427_v28 = vld [vmem:[#allocation7 + $0x458] ss:$24 sps:$4 sm:$0xff]  }
 0x117   :  { %2365 = vmatpush1.bf16.msra.mxu1 %v6385_v30  ;;  %2243 = vmatprep.subr.bf16.mxu0 %v6390_v32  ;;  %v242_v16 = vadd.f32 %v236_v7, %v221_v12  ;;  %v334_v30 = vld [vmem:[#allocation6 + $0x168] sm:$0xff]  ;;  %v214_v32 = vmul.f32 %v7736_v45, %v207_v23 }
 0x118   :  { %2366 = vmatprep.subr.bf16.mxu1 %v6393_v34  ;;  %v235_v34 = vmul.f32 %v7740_v47, %v228_v25  ;;  %v425_v25 = vmul.f32 %v7793_v62, %v418_v14  ;;  %v6481_v14 = vld [vmem:[#allocation7 + $0x608] ss:$24 sps:$4 sm:$0xff]  }
 0x119   :  { %v263_v29 = vadd.f32 %v257_v13, %v242_v16  ;;  %v333_v13 = vld [vmem:[#allocation6 + $0x160] sm:$0xff] }
 0x11a   :  { %2244 = vmatpush1.bf16.msra.mxu0 %v6388_v35  ;;  %v6432_v35 = vld [vmem:[#allocation7 + $0x484] ss:$24 sps:$4 sm:$0xff]  }
 0x11b   :  { %2367 = vmatpush1.bf16.msra.mxu1 %v6391_v36  ;;  %2245 = vmatprep.subr.bf16.mxu0 %v6396_v37  ;;  %v6435_v36 = vld [vmem:[#allocation7 + $0x48c] ss:$24 sps:$4 sm:$0xff]   ;;  %v270_v37 = vld [vmem:[#allocation6 + $0xd0] sm:$0xff] }
 0x11c   :  { %2368 = vmatprep.subr.bf16.mxu1 %v6399_v38  ;;  %v6430_v38 = vld [vmem:[#allocation7 + $0x480] ss:$24 sps:$4 sm:$0xff]  }
 0x11e   :  { %2246 = vmatpush1.bf16.msra.mxu0 %v6394_v39  ;;  %v6433_v39 = vld [vmem:[#allocation7 + $0x488] ss:$24 sps:$4 sm:$0xff]  }
 0x11f   :  { %2369 = vmatpush1.bf16.msra.mxu1 %v6397_v40  ;;  %2247 = vmatprep.subr.bf16.mxu0 %v6402_v42  ;;  %v284_v40 = vadd.f32 %v278_v17, %v263_v29  ;;  %v320_v42 = vmul.f32 %v7763_v9, %v313_v18  ;;  %v404_v17 = vmul.f32 %v7788_v53, %v397_v8  ;;  %v6448_v29 = vld [vmem:[#allocation7 + $0x510] ss:$24 sps:$4 sm:$0xff]  }
 0x120   :  { %2370 = vmatprep.subr.bf16.mxu1 %v6405_v43  ;;  %v220_v43 = vadd.f32 %v214_v32, %v199_v21  ;;  %v340_v21 = vmul.f32 %v7771_v22, %v333_v13  ;;  %v6451_v32 = vld [vmem:[#allocation7 + $0x518] ss:$24 sps:$4 sm:$0xff]  }
 0x122   :  { %2248 = vmatpush1.bf16.msra.mxu0 %v6400_v46  ;;  %v256_v46 = vmul.f32 %v7742_v51, %v249_v26 }
 0x123   :  { %2371 = vmatpush1.bf16.msra.mxu1 %v6403_v48  ;;  %2249 = vmatprep.subr.bf16.mxu0 %v6408_v49  ;;  %v6438_v48 = vld [vmem:[#allocation7 + $0x4b4] ss:$24 sps:$4 sm:$0xff]  }
 0x124   :  { %2372 = vmatprep.subr.bf16.mxu1 %v6411_v50  ;;  %v6441_v49 = vld [vmem:[#allocation7 + $0x4bc] ss:$24 sps:$4 sm:$0xff]   ;;  %v341_v50 = vmul.f32 %v7771_v22, %v334_v30 }
 0x126   :  { %2250 = vmatpush1.bf16.msra.mxu0 %v6406_v52  ;;  %v355_v52 = vld [vmem:[#allocation6 + $0x198] sm:$0xff] }
 0x127   :  { %2373 = vmatpush1.bf16.msra.mxu1 %v6409_v54  ;;  %2251 = vmatprep.subr.bf16.mxu0 %v6414_v55  ;;  %v291_v54 = vld [vmem:[#allocation6 + $0x100] sm:$0xff]  ;;  %v305_v55 = vadd.f32 %v299_v20, %v284_v40  ;;  %v362_v2 = vmul.f32 %v7778_v31, %v355_v52  ;;  %v6450_v20 = vld [vmem:[#allocation7 + $0x514] ss:$24 sps:$4 sm:$0xff]  }
 0x128   :  { %2374 = vmatprep.subr.bf16.mxu1 %v6417_v56  ;;  %v376_v56 = vld [vmem:[#allocation6 + $0x1c8] sm:$0xff]  ;;  %v298_v4 = vmul.f32 %v7756_v1, %v291_v54  ;;  %v6454_v40 = vld [vmem:[#allocation7 + $0x540] ss:$24 sps:$4 sm:$0xff]   ;;  %v6465_v52 = vld [vmem:[#allocation7 + $0x57c] ss:$24 sps:$4 sm:$0xff]  }
 0x129   :  { %v326_v0 = vadd.f32 %v320_v42, %v305_v55  ;;  %v383_v7 = vmul.f32 %v7783_v41, %v376_v56  ;;  %v6460_v54 = vld [vmem:[#allocation7 + $0x570] ss:$24 sps:$4 sm:$0xff]   ;;  %v6468_v56 = vld [vmem:[#allocation7 + $0x5a4] ss:$24 sps:$4 sm:$0xff]  }
 0x12a   :  { %2252 = vmatpush1.bf16.msra.mxu0 %v6412_v57  ;;  %v241_v57 = vadd.f32 %v235_v34, %v220_v43  ;;  %v6456_v34 = vld [vmem:[#allocation7 + $0x544] ss:$24 sps:$4 sm:$0xff]   ;;  %v6457_v43 = vld [vmem:[#allocation7 + $0x548] ss:$24 sps:$4 sm:$0xff]   ;;  %v6463_v55 = vld [vmem:[#allocation7 + $0x578] ss:$24 sps:$4 sm:$0xff]  }
 0x12b   :  { %2375 = vmatpush1.bf16.msra.mxu1 %v6415_v58  ;;  %2253 = vmatprep.subr.bf16.mxu0 %v6420_v59  ;;  %v277_v58 = vmul.f32 %v7750_v60, %v270_v37  ;;  %v312_v59 = vld [vmem:[#allocation6 + $0x130] sm:$0xff] }
 0x12c   :  { %2376 = vmatprep.subr.bf16.mxu1 %v6423_v61  ;;  %v6436_v61 = vld [vmem:[#allocation7 + $0x4b0] ss:$24 sps:$4 sm:$0xff]   ;;  %v262_v3 = vadd.f32 %v256_v46, %v241_v57  ;;  %v319_v12 = vmul.f32 %v7763_v9, %v312_v59  ;;  %v6462_v46 = vld [vmem:[#allocation7 + $0x574] ss:$24 sps:$4 sm:$0xff]   ;;  %v417_v59 = vld [vmem:[#allocation6 + $0x220] sm:$0xff] }
 0x12e   :  { %2254 = vmatpush1.bf16.msra.mxu0 %v6418_v6  ;;  %v6447_v6 = vld [vmem:[#allocation7 + $0x4ec] ss:$24 sps:$4 sm:$0xff]  }
 0x12f   :  { %2377 = vmatpush1.bf16.msra.mxu1 %v6421_v10  ;;  %2255 = vmatprep.subr.bf16.mxu0 %v6426_v11  ;;  %v347_v10 = vadd.f32 %v341_v50, %v326_v0  ;;  %v283_v11 = vadd.f32 %v277_v58, %v262_v3  ;;  %v396_v50 = vld [vmem:[#allocation6 + $0x1f0] sm:$0xff]  ;;  %v6469_v0 = vld [vmem:[#allocation7 + $0x5a8] ss:$24 sps:$4 sm:$0xff]   ;;  %v424_v3 = vmul.f32 %v7793_v62, %v417_v59 }
 0x130   :  { %2378 = vmatprep.subr.bf16.mxu1 %v6429_v15  ;;  %v6442_v15 = vld [vmem:[#allocation7 + $0x4e0] ss:$24 sps:$4 sm:$0xff]   ;;  %v403_v58 = vmul.f32 %v7788_v53, %v396_v50  ;;  %v209_v50 = vld [vmem:[#allocation6 + $0x50] sm:$0xff] }
 0x131   :  { %v368_v16 = vadd.f32 %v362_v2, %v347_v10  ;;  %v304_v18 = vadd.f32 %v298_v4, %v283_v11  ;;  %v6474_v4 = vld [vmem:[#allocation7 + $0x5d4] ss:$24 sps:$4 sm:$0xff]   ;;  %v6480_v10 = vld [vmem:[#allocation7 + $0x604] ss:$24 sps:$4 sm:$0xff]  }
 0x132   :  { %2256 = vmatpush1.bf16.msra.mxu0 %v6424_v27  ;;  %v354_v27 = vld [vmem:[#allocation6 + $0x190] sm:$0xff]  ;;  %v6483_v11 = vld [vmem:[#allocation7 + $0x60c] ss:$24 sps:$4 sm:$0xff]  }
 0x133   :  { %2379 = vmatpush1.bf16.msra.mxu1 %v6427_v28  ;;  %2257 = vmatprep.subr.bf16.mxu0 %v6432_v35  ;;  %v389_v23 = vadd.f32 %v383_v7, %v368_v16  ;;  %v325_v26 = vadd.f32 %v319_v12, %v304_v18  ;;  %v6453_v28 = vld [vmem:[#allocation7 + $0x51c] ss:$24 sps:$4 sm:$0xff]   ;;  %v6475_v7 = vld [vmem:[#allocation7 + $0x5d8] ss:$24 sps:$4 sm:$0xff]  }
 0x134   :  { %2380 = vmatprep.subr.bf16.mxu1 %v6435_v36  ;;  %v361_v36 = vmul.f32 %v7778_v31, %v354_v27  ;;  %v6478_v12 = vld [vmem:[#allocation7 + $0x600] ss:$24 sps:$4 sm:$0xff]   ;;  %v6489_v16 = vld [vmem:[#allocation7 + $0x63c] ss:$24 sps:$4 sm:$0xff]  }
 0x135   :  { %v410_v30 = vadd.f32 %v404_v17, %v389_v23  ;;  %v346_v35 = vadd.f32 %v340_v21, %v325_v26  ;;  %v6484_v17 = vld [vmem:[#allocation7 + $0x630] ss:$24 sps:$4 sm:$0xff]   ;;  %v252_v27 = vld [vmem:[#allocation6 + $0xb8] sm:$0xff] }
 0x136   :  { %2258 = vmatpush1.bf16.msra.mxu0 %v6430_v38  ;;  %v375_v38 = vld [vmem:[#allocation6 + $0x1c0] sm:$0xff]  ;;  %v6487_v18 = vld [vmem:[#allocation7 + $0x638] ss:$24 sps:$4 sm:$0xff]   ;;  %v195_v21 = vld [vmem:[#allocation6 + $0x28] sm:$0xff] }
 0x137   :  { %2381 = vmatpush1.bf16.msra.mxu1 %v6433_v39  ;;  %2259 = vmatprep.subr.bf16.mxu0 %v6438_v48  ;;  %v431_v37 = vadd.f32 %v425_v25, %v410_v30  ;;  %v6459_v39 = vld [vmem:[#allocation7 + $0x54c] ss:$24 sps:$4 sm:$0xff]   ;;  %v367_v48 = vadd.f32 %v361_v36, %v346_v35  ;;  %v202_v23 = vmul.f32 %v7734_v44, %v195_v21  ;;  %v210_v25 = vld [vmem:[#allocation6 + $0x58] sm:$0xff] }
 0x138   :  { %2382 = vmatprep.subr.bf16.mxu1 %v6441_v49  ;;  %v382_v49 = vmul.f32 %v7783_v41, %v375_v38  ;;  %v231_v26 = vld [vmem:[#allocation6 + $0x88] sm:$0xff]  ;;  %v217_v30 = vmul.f32 %v7736_v45, %v210_v25  ;;  %v6501_v35 = vld [vmem:[#allocation7 + $0x69c] ss:$24 sps:$4 sm:$0xff]   ;;  %v259_v38 = vmul.f32 %v7742_v51, %v252_v27  ;;  %v6514_v21 = vld [vmem:[#allocation7 + $0x720] ss:$24 sps:$4 sm:$0xff]  }
 0x139   :  { %v7831_v42 = vpack.c.bf16 %v431_v37, %v431_v37  ;;  %v273_v36 = vld [vmem:[#allocation6 + $0xe8] sm:$0xff] }
 0x13a   :  { %2260 = vmatpush1.bf16.msra.mxu0 %v6436_v61  ;;  %v388_v57 = vadd.f32 %v382_v49, %v367_v48  ;;  %v6471_v61 = vld [vmem:[#allocation7 + $0x5ac] ss:$24 sps:$4 sm:$0xff]   ;;  %v223_v37 = vadd.f32 %v217_v30, %v202_v23  ;;  %v280_v48 = vmul.f32 %v7750_v60, %v273_v36  ;;  %v6517_v23 = vld [vmem:[#allocation7 + $0x728] ss:$24 sps:$4 sm:$0xff]  }
 0x13b   :  { %2383 = vmatpush1.bf16.msra.mxu1 %v6439_v63  ;;  %2261 = vmatprep.subr.bf16.mxu0 %v6444_v5  ;;  %v6466_v63 = vld [vmem:[#allocation7 + $0x5a0] ss:$24 sps:$4 sm:$0xff]   ;;  %v6477_v5 = vld [vmem:[#allocation7 + $0x5dc] ss:$24 sps:$4 sm:$0xff]   ;;  %v6520_v36 = vld [vmem:[#allocation7 + $0x750] ss:$24 sps:$4 sm:$0xff]  }
 0x13c   :  { %2384 = vmatprep.subr.bf16.mxu1 %v6447_v6  ;;  %2273 = vmatprep.mubr.bf16.mxu0 %v7831_v42  ;;  %v409_v2 = vadd.f32 %v403_v58, %v388_v57  ;;  %v6472_v6 = vld [vmem:[#allocation7 + $0x5d0] ss:$24 sps:$4 sm:$0xff]   ;;  %v194_v49 = vld [vmem:[#allocation6 + $0x20] sm:$0xff]  ;;  %v6522_v27 = vld [vmem:[#allocation7 + $0x754] ss:$24 sps:$4 sm:$0xff]  }
 0x13d   :  { %2396 = vmatprep.mubr.bf16.mxu1 %v7831_v42  ;;  %v6505_v57 = vld [vmem:[#allocation7 + $0x6c8] ss:$24 sps:$4 sm:$0xff]  }
 0x13e   :  { %2262 = vmatpush1.bf16.msra.mxu0 %v6442_v15  ;;  %v430_v8 = vadd.f32 %v424_v3, %v409_v2  ;;  %v6486_v15 = vld [vmem:[#allocation7 + $0x634] ss:$24 sps:$4 sm:$0xff]   ;;  %v201_v2 = vmul.f32 %v7734_v44, %v194_v49  ;;  %v216_v3 = vmul.f32 %v7736_v45, %v209_v50  ;;  %v6526_v50 = vld [vmem:[#allocation7 + $0x780] ss:$24 sps:$4 sm:$0xff]  }
 0x13f   :  { %2385 = vmatpush1.bf16.msra.mxu1 %v6445_v19  ;;  %2263 = vmatprep.subr.bf16.mxu0 %v6450_v20  ;;  %v6492_v19 = vld [vmem:[#allocation7 + $0x664] ss:$24 sps:$4 sm:$0xff]  }
 0x140   :  { %2386 = vmatprep.subr.bf16.mxu1 %v6453_v28  ;;  %v7838_v13 = vpack.c.bf16 %v430_v8, %v430_v8  ;;  %v6495_v20 = vld [vmem:[#allocation7 + $0x66c] ss:$24 sps:$4 sm:$0xff]   ;;  %v6490_v28 = vld [vmem:[#allocation7 + $0x660] ss:$24 sps:$4 sm:$0xff]   ;;  %v6508_v8 = vld [vmem:[#allocation7 + $0x6f0] ss:$24 sps:$4 sm:$0xff]   ;;  %v222_v44 = vadd.f32 %v216_v3, %v201_v2 }
 0x141   :  { %v6531_v49 = vld [vmem:[#allocation7 + $0x78c] ss:$24 sps:$4 sm:$0xff]  }
 0x142   :  { %2264 = vmatpush1.bf16.msra.mxu0 %v6448_v29  ;;  %v6493_v29 = vld [vmem:[#allocation7 + $0x668] ss:$24 sps:$4 sm:$0xff]  }
 0x143   :  { %2387 = vmatpush1.bf16.msra.mxu1 %v6451_v32  ;;  %2265 = vmatprep.subr.bf16.mxu0 %v6456_v34  ;;  %v238_v32 = vmul.f32 %v7740_v47, %v231_v26  ;;  %v6498_v34 = vld [vmem:[#allocation7 + $0x694] ss:$24 sps:$4 sm:$0xff]  }
 0x144   :  { %2388 = vmatprep.subr.bf16.mxu1 %v6459_v39  ;;  %v6496_v39 = vld [vmem:[#allocation7 + $0x690] ss:$24 sps:$4 sm:$0xff]  }
 0x146   :  { %2266 = vmatpush1.bf16.msra.mxu0 %v6454_v40  ;;  %v294_v40 = vld [vmem:[#allocation6 + $0x118] sm:$0xff] }
 0x147   :  { %2389 = vmatpush1.bf16.msra.mxu1 %v6457_v43  ;;  %2267 = vmatprep.subr.bf16.mxu0 %v6462_v46  ;;  %v6499_v43 = vld [vmem:[#allocation7 + $0x698] ss:$24 sps:$4 sm:$0xff]   ;;  %v244_v46 = vadd.f32 %v238_v32, %v223_v37  ;;  %v301_v59 = vmul.f32 %v7756_v1, %v294_v40  ;;  %v6528_v40 = vld [vmem:[#allocation7 + $0x784] ss:$24 sps:$4 sm:$0xff]  }
 0x148   :  { %2390 = vmatprep.subr.bf16.mxu1 %v6465_v52  ;;  %v6504_v52 = vld [vmem:[#allocation7 + $0x6c4] ss:$24 sps:$4 sm:$0xff]  }
 0x149   :  { %v265_v58 = vadd.f32 %v259_v38, %v244_v46 }
 0x14a   :  { %2268 = vmatpush1.bf16.msra.mxu0 %v6460_v54  ;;  %v6507_v54 = vld [vmem:[#allocation7 + $0x6cc] ss:$24 sps:$4 sm:$0xff]  }
 0x14b   :  { %2391 = vmatpush1.bf16.msra.mxu1 %v6463_v55  ;;  %2269 = vmatprep.subr.bf16.mxu0 %v6468_v56  ;;  %v315_v55 = vld [vmem:[#allocation6 + $0x148] sm:$0xff]  ;;  %v6502_v56 = vld [vmem:[#allocation7 + $0x6c0] ss:$24 sps:$4 sm:$0xff]  }
 0x14c   :  { %2392 = vmatprep.subr.bf16.mxu1 %v6471_v61  ;;  %v6510_v61 = vld [vmem:[#allocation7 + $0x6f4] ss:$24 sps:$4 sm:$0xff]  }
 0x14e   :  { %2270 = vmatpush1.bf16.msra.mxu0 %v6466_v63  ;;  %v6513_v63 = vld [vmem:[#allocation7 + $0x6fc] ss:$24 sps:$4 sm:$0xff]  }
 0x14f   :  { %2393 = vmatpush1.bf16.msra.mxu1 %v6469_v0  ;;  %2271 = vmatprep.subr.bf16.mxu0 %v6474_v4  ;;  %v336_v0 = vld [vmem:[#allocation6 + $0x178] sm:$0xff]  ;;  %v286_v4 = vadd.f32 %v280_v48, %v265_v58  ;;  %v293_v48 = vld [vmem:[#allocation6 + $0x110] sm:$0xff] }
 0x150   :  { %2394 = vmatprep.subr.bf16.mxu1 %v6477_v5  ;;  %v322_v5 = vmul.f32 %v7763_v9, %v315_v55  ;;  %v6534_v55 = vld [vmem:[#allocation7 + $0x7b4] ss:$24 sps:$4 sm:$0xff]  }
 0x152   :  { %2272 = vmatpush1.bf16.msra.mxu0 %v6472_v6  ;;  %v230_v6 = vld [vmem:[#allocation6 + $0x80] sm:$0xff] }
 0x153   :  { %2395 = vmatpush1.bf16.msra.mxu1 %v6475_v7  ;;  %2282 = vmatprep.subr.bf16.mxu0 %v6480_v10  ;;  %v357_v7 = vld [vmem:[#allocation6 + $0x1a8] sm:$0xff]  ;;  %v6511_v10 = vld [vmem:[#allocation7 + $0x6f8] ss:$24 sps:$4 sm:$0xff]   ;;  %v237_v45 = vmul.f32 %v7740_v47, %v230_v6 }
 0x154   :  { %2405 = vmatprep.subr.bf16.mxu1 %v6483_v11  ;;  %v307_v11 = vadd.f32 %v301_v59, %v286_v4  ;;  %v314_v59 = vld [vmem:[#allocation6 + $0x140] sm:$0xff] }
 0x155   :  { %2274 = vmatmul.mubr.bf16.vlgmr.msra.gmra.mrb[0].mxu0 %v7838_v13  ;;  %v321_v3 = vmul.f32 %v7763_v9, %v314_v59  ;;  %v6543_v4 = vld [vmem:[#allocation7 + $0x7ec] ss:$24 sps:$4 sm:$0xff]   ;;  %v6541_v6 = vld [vmem:[#allocation7 + $0x7e8] ss:$24 sps:$4 sm:$0xff]   ;;  %v6547_v9 = vld [vmem:[#allocation7 + $0x818] ss:$24 sps:$4 sm:$0xff]  }
 0x156   :  { %2397 = vmatmul.mubr.bf16.vlgmr.msra.gmra.mrb[0].mxu1 %v7838_v13  ;;  %2283 = vmatpush1.bf16.msra.mxu0 %v6478_v12  ;;  %v343_v12 = vmul.f32 %v7771_v22, %v336_v0  ;;  %v6540_v0 = vld [vmem:[#allocation7 + $0x7e4] ss:$24 sps:$4 sm:$0xff]   ;;  %v6594_v59 = vld [vmem:[#allocation7 + $0x134] ss:$24 sps:$4 sm:$0xff]  }
 0x157   :  { %2406 = vmatpush1.bf16.msra.mxu1 %v6481_v14  ;;  %2284 = vmatprep.subr.bf16.mxu0 %v6486_v15  ;;  %v6516_v14 = vld [vmem:[#allocation7 + $0x724] ss:$24 sps:$4 sm:$0xff]  }
 0x158   :  { %2407 = vmatprep.subr.bf16.mxu1 %v6489_v16  ;;  %v6519_v15 = vld [vmem:[#allocation7 + $0x72c] ss:$24 sps:$4 sm:$0xff]   ;;  %v378_v16 = vld [vmem:[#allocation6 + $0x1d8] sm:$0xff] }
 0x159   :  { %v385_v26 = vmul.f32 %v7783_v41, %v378_v16 }
 0x15a   :  { %2285 = vmatpush1.bf16.msra.mxu0 %v6484_v17  ;;  %v328_v17 = vadd.f32 %v322_v5, %v307_v11  ;;  %v6538_v5 = vld [vmem:[#allocation7 + $0x7e0] ss:$24 sps:$4 sm:$0xff]  }
 0x15b   :  { %2408 = vmatpush1.bf16.msra.mxu1 %v6487_v18  ;;  %2286 = vmatprep.subr.bf16.mxu0 %v6492_v19  ;;  %v364_v18 = vmul.f32 %v7778_v31, %v357_v7  ;;  %v251_v19 = vld [vmem:[#allocation6 + $0xb0] sm:$0xff]  ;;  %v356_v11 = vld [vmem:[#allocation6 + $0x1a0] sm:$0xff] }
 0x15c   :  { %2409 = vmatprep.subr.bf16.mxu1 %v6495_v20  ;;  %v399_v20 = vld [vmem:[#allocation6 + $0x208] sm:$0xff]  ;;  %v349_v25 = vadd.f32 %v343_v12, %v328_v17  ;;  %v258_v30 = vmul.f32 %v7742_v51, %v251_v19  ;;  %v6549_v12 = vld [vmem:[#allocation7 + $0x81c] ss:$24 sps:$4 sm:$0xff]  }
 0x15d   :  { %v406_v32 = vmul.f32 %v7788_v53, %v399_v20  ;;  %v6546_v7 = vld [vmem:[#allocation7 + $0x814] ss:$24 sps:$4 sm:$0xff]  }
 0x15e   :  { %2287 = vmatpush1.bf16.msra.mxu0 %v6490_v28  ;;  %v420_v28 = vld [vmem:[#allocation6 + $0x238] sm:$0xff]  ;;  %v370_v47 = vadd.f32 %v364_v18, %v349_v25  ;;  %v6555_v17 = vld [vmem:[#allocation7 + $0x84c] ss:$24 sps:$4 sm:$0xff]  }
 0x15f   :  { %2410 = vmatpush1.bf16.msra.mxu1 %v6493_v29  ;;  %2288 = vmatprep.subr.bf16.mxu0 %v6498_v34  ;;  %v243_v29 = vadd.f32 %v237_v45, %v222_v44  ;;  %v272_v34 = vld [vmem:[#allocation6 + $0xe0] sm:$0xff]  ;;  %v427_v38 = vmul.f32 %v7793_v62, %v420_v28  ;;  %v363_v44 = vmul.f32 %v7778_v31, %v356_v11  ;;  %v377_v45 = vld [vmem:[#allocation6 + $0x1d0] sm:$0xff] }
 0x160   :  { %2411 = vmatprep.subr.bf16.mxu1 %v6501_v35  ;;  %v6525_v35 = vld [vmem:[#allocation7 + $0x75c] ss:$24 sps:$4 sm:$0xff]   ;;  %v391_v37 = vadd.f32 %v385_v26, %v370_v47  ;;  %v279_v46 = vmul.f32 %v7750_v60, %v272_v34  ;;  %v6550_v18 = vld [vmem:[#allocation7 + $0x840] ss:$24 sps:$4 sm:$0xff]   ;;  %v6556_v26 = vld [vmem:[#allocation7 + $0x870] ss:$24 sps:$4 sm:$0xff]  }
 0x161   :  { %v6537_v60 = vld [vmem:[#allocation7 + $0x7bc] ss:$24 sps:$4 sm:$0xff]   ;;  %v6559_v31 = vld [vmem:[#allocation7 + $0x878] ss:$24 sps:$4 sm:$0xff]   ;;  %v6567_v47 = vld [vmem:[#allocation7 + $0x8ac] ss:$24 sps:$4 sm:$0xff]  }
 0x162   :  { %2289 = vmatpush1.bf16.msra.mxu0 %v6496_v39  ;;  %v6523_v39 = vld [vmem:[#allocation7 + $0x758] ss:$24 sps:$4 sm:$0xff]   ;;  %v412_v51 = vadd.f32 %v406_v32, %v391_v37  ;;  %v6558_v19 = vld [vmem:[#allocation7 + $0x874] ss:$24 sps:$4 sm:$0xff]  }
 0x163   :  { %2412 = vmatpush1.bf16.msra.mxu1 %v6499_v43  ;;  %2290 = vmatprep.subr.bf16.mxu0 %v6504_v52  ;;  %v264_v43 = vadd.f32 %v258_v30, %v243_v29  ;;  %v6561_v25 = vld [vmem:[#allocation7 + $0x87c] ss:$24 sps:$4 sm:$0xff]   ;;  %v6562_v32 = vld [vmem:[#allocation7 + $0x8a0] ss:$24 sps:$4 sm:$0xff]  }
 0x164   :  { %2413 = vmatprep.subr.bf16.mxu1 %v6507_v54  ;;  %v433_v52 = vadd.f32 %v427_v38, %v412_v51  ;;  %v6529_v54 = vld [vmem:[#allocation7 + $0x788] ss:$24 sps:$4 sm:$0xff]   ;;  %v419_v30 = vld [vmem:[#allocation6 + $0x230] sm:$0xff] }
 0x165   :  { %v6573_v37 = vld [vmem:[#allocation7 + $0x8dc] ss:$24 sps:$4 sm:$0xff]   ;;  %v6568_v38 = vld [vmem:[#allocation7 + $0x8d0] ss:$24 sps:$4 sm:$0xff]   ;;  %v6577_v51 = vld [vmem:[#allocation7 + $0x40] ss:$24 sps:$4 sm:$0xff]  }
 0x166   :  { %2291 = vmatpush1.bf16.msra.mxu0 %v6502_v56  ;;  %v285_v56 = vadd.f32 %v279_v46, %v264_v43  ;;  %v7860_v58 = vpack.c.bf16 %v433_v52, %v433_v52  ;;  %v6574_v46 = vld [vmem:[#allocation7 + $0x10] ss:$24 sps:$4 sm:$0xff]   ;;  %v6583_v52 = vld [vmem:[#allocation7 + $0xa0] ss:$24 sps:$4 sm:$0xff]  }
 0x167   :  { %2414 = vmatpush1.bf16.msra.mxu1 %v6505_v57  ;;  %2292 = vmatprep.subr.bf16.mxu0 %v6510_v61  ;;  %v300_v57 = vmul.f32 %v7756_v1, %v293_v48  ;;  %v6532_v61 = vld [vmem:[#allocation7 + $0x7b0] ss:$24 sps:$4 sm:$0xff]   ;;  %v6582_v48 = vld [vmem:[#allocation7 + $0x74] ss:$24 sps:$4 sm:$0xff]   ;;  %v6613_v11 = vld [vmem:[#allocation7 + $0x280] ss:$24 sps:$4 sm:$0xff]  }
 0x168   :  { %2415 = vmatprep.subr.bf16.mxu1 %v6513_v63  ;;  %2314 = vmatprep.mubr.bf16.mxu0 %v7860_v58  ;;  %v6535_v63 = vld [vmem:[#allocation7 + $0x7b8] ss:$24 sps:$4 sm:$0xff]  }
 0x169   :  { %2437 = vmatprep.mubr.bf16.mxu1 %v7860_v58  ;;  %v306_v2 = vadd.f32 %v300_v57, %v285_v56  ;;  %v335_v1 = vld [vmem:[#allocation6 + $0x170] sm:$0xff]  ;;  %v6591_v56 = vld [vmem:[#allocation7 + $0x104] ss:$24 sps:$4 sm:$0xff]   ;;  %v6589_v57 = vld [vmem:[#allocation7 + $0x100] ss:$24 sps:$4 sm:$0xff]  }
 0x16a   :  { %2293 = vmatpush1.bf16.msra.mxu0 %v6508_v8 }
 0x16b   :  { %2416 = vmatpush1.bf16.msra.mxu1 %v6511_v10  ;;  %2294 = vmatprep.subr.bf16.mxu0 %v6516_v14  ;;  %v327_v8 = vadd.f32 %v321_v3, %v306_v2  ;;  %v342_v10 = vmul.f32 %v7771_v22, %v335_v1  ;;  %v6544_v14 = vld [vmem:[#allocation7 + $0x810] ss:$24 sps:$4 sm:$0xff]   ;;  %v6603_v2 = vld [vmem:[#allocation7 + $0x1c4] ss:$24 sps:$4 sm:$0xff]   ;;  %v6601_v3 = vld [vmem:[#allocation7 + $0x1c0] ss:$24 sps:$4 sm:$0xff]  }
 0x16c   :  { %2417 = vmatprep.subr.bf16.mxu1 %v6519_v15  ;;  %v6552_v15 = vld [vmem:[#allocation7 + $0x844] ss:$24 sps:$4 sm:$0xff]   ;;  %v6553_v22 = vld [vmem:[#allocation7 + $0x848] ss:$24 sps:$4 sm:$0xff]   ;;  %v6606_v1 = vld [vmem:[#allocation7 + $0x1f4] ss:$24 sps:$4 sm:$0xff]  }
 0x16d   :  { %v348_v16 = vadd.f32 %v342_v10, %v327_v8  ;;  %v6610_v8 = vld [vmem:[#allocation7 + $0x250] ss:$24 sps:$4 sm:$0xff]   ;;  %v6615_v10 = vld [vmem:[#allocation7 + $0x284] ss:$24 sps:$4 sm:$0xff]  }
 0x16e   :  { %2295 = vmatpush1.bf16.msra.mxu0 %v6514_v21  ;;  %v384_v21 = vmul.f32 %v7783_v41, %v377_v45  ;;  %v6565_v41 = vld [vmem:[#allocation7 + $0x8a8] ss:$24 sps:$4 sm:$0xff]   ;;  %v6627_v45 = vld [vmem:[#allocation7 + $0x344] ss:$24 sps:$4 sm:$0xff]  }
 0x16f   :  { %2418 = vmatpush1.bf16.msra.mxu1 %v6517_v23  ;;  %2296 = vmatprep.subr.bf16.mxu0 %v6522_v27  ;;  %v369_v20 = vadd.f32 %v363_v44, %v348_v16  ;;  %v398_v23 = vld [vmem:[#allocation6 + $0x200] sm:$0xff]  ;;  %v6624_v16 = vld [vmem:[#allocation7 + $0x314] ss:$24 sps:$4 sm:$0xff]   ;;  %v6622_v44 = vld [vmem:[#allocation7 + $0x310] ss:$24 sps:$4 sm:$0xff]  }
 0x170   :  { %2419 = vmatprep.subr.bf16.mxu1 %v6525_v35  ;;  %v6564_v27 = vld [vmem:[#allocation7 + $0x8a4] ss:$24 sps:$4 sm:$0xff]   ;;  %v405_v29 = vmul.f32 %v7788_v53, %v398_v23  ;;  %v426_v35 = vmul.f32 %v7793_v62, %v419_v30  ;;  %v6571_v53 = vld [vmem:[#allocation7 + $0x8d8] ss:$24 sps:$4 sm:$0xff]  }
 0x171   :  { %v390_v28 = vadd.f32 %v384_v21, %v369_v20  ;;  %v6579_v62 = vld [vmem:[#allocation7 + $0x44] ss:$24 sps:$4 sm:$0xff]   ;;  %v6631_v20 = vld [vmem:[#allocation7 + $0x3a0] ss:$24 sps:$4 sm:$0xff]   ;;  %v6636_v21 = vld [vmem:[#allocation7 + $0x3d4] ss:$24 sps:$4 sm:$0xff]  }
 0x172   :  { %2297 = vmatpush1.bf16.msra.mxu0 %v6520_v36  ;;  %v6570_v36 = vld [vmem:[#allocation7 + $0x8d4] ss:$24 sps:$4 sm:$0xff]   ;;  %v6634_v23 = vld [vmem:[#allocation7 + $0x3d0] ss:$24 sps:$4 sm:$0xff]   ;;  %v6651_v30 = vld [vmem:[#allocation7 + $0x4c4] ss:$24 sps:$4 sm:$0xff]  }
 0x173   :  { %2420 = vmatpush1.bf16.msra.mxu1 %v6523_v39  ;;  %2298 = vmatprep.subr.bf16.mxu0 %v6528_v40  ;;  %v411_v34 = vadd.f32 %v405_v29, %v390_v28  ;;  %v6576_v40 = vld [vmem:[#allocation7 + $0x14] ss:$24 sps:$4 sm:$0xff]   ;;  %v6646_v29 = vld [vmem:[#allocation7 + $0x490] ss:$24 sps:$4 sm:$0xff]  }
 0x174   :  { %2421 = vmatprep.subr.bf16.mxu1 %v6531_v49  ;;  %v6580_v49 = vld [vmem:[#allocation7 + $0x70] ss:$24 sps:$4 sm:$0xff]   ;;  %v6648_v28 = vld [vmem:[#allocation7 + $0x494] ss:$24 sps:$4 sm:$0xff]  }
 0x175   :  { %v432_v39 = vadd.f32 %v426_v35, %v411_v34  ;;  %v6657_v34 = vld [vmem:[#allocation7 + $0x524] ss:$24 sps:$4 sm:$0xff]   ;;  %v6655_v35 = vld [vmem:[#allocation7 + $0x520] ss:$24 sps:$4 sm:$0xff]  }
 0x176   :  { %2299 = vmatpush1.bf16.msra.mxu0 %v6526_v50  ;;  %v6585_v50 = vld [vmem:[#allocation7 + $0xa4] ss:$24 sps:$4 sm:$0xff]  }
 0x177   :  { %2422 = vmatpush1.bf16.msra.mxu1 %v6529_v54  ;;  %2300 = vmatprep.subr.bf16.mxu0 %v6534_v55  ;;  %v7870_v43 = vpack.c.bf16 %v432_v39, %v432_v39  ;;  %v6588_v54 = vld [vmem:[#allocation7 + $0xd4] ss:$24 sps:$4 sm:$0xff]   ;;  %v6586_v55 = vld [vmem:[#allocation7 + $0xd0] ss:$24 sps:$4 sm:$0xff]   ;;  %v6661_v39 = vld [vmem:[#allocation7 + $0x580] ss:$24 sps:$4 sm:$0xff]  }
 0x178   :  { %2423 = vmatprep.subr.bf16.mxu1 %v6537_v60  ;;  %v6592_v60 = vld [vmem:[#allocation7 + $0x130] ss:$24 sps:$4 sm:$0xff]  }
 0x17a   :  { %2301 = vmatpush1.bf16.msra.mxu0 %v6532_v61  ;;  %v6595_v61 = vld [vmem:[#allocation7 + $0x160] ss:$24 sps:$4 sm:$0xff]  }
 0x17b   :  { %2424 = vmatpush1.bf16.msra.mxu1 %v6535_v63  ;;  %2302 = vmatprep.subr.bf16.mxu0 %v6540_v0  ;;  %v6600_v63 = vld [vmem:[#allocation7 + $0x194] ss:$24 sps:$4 sm:$0xff]   ;;  %v6598_v0 = vld [vmem:[#allocation7 + $0x190] ss:$24 sps:$4 sm:$0xff]  }
 0x17c   :  { %2425 = vmatprep.subr.bf16.mxu1 %v6543_v4  ;;  %v6604_v4 = vld [vmem:[#allocation7 + $0x1f0] ss:$24 sps:$4 sm:$0xff]  }
 0x17e   :  { %2303 = vmatpush1.bf16.msra.mxu0 %v6538_v5  ;;  %v6609_v5 = vld [vmem:[#allocation7 + $0x224] ss:$24 sps:$4 sm:$0xff]  }
 0x17f   :  { %2426 = vmatpush1.bf16.msra.mxu1 %v6541_v6  ;;  %2304 = vmatprep.subr.bf16.mxu0 %v6546_v7  ;;  %v6607_v6 = vld [vmem:[#allocation7 + $0x220] ss:$24 sps:$4 sm:$0xff]   ;;  %v6612_v7 = vld [vmem:[#allocation7 + $0x254] ss:$24 sps:$4 sm:$0xff]  }
 0x180   :  { %2427 = vmatprep.subr.bf16.mxu1 %v6549_v12  ;;  %v6618_v12 = vld [vmem:[#allocation7 + $0x2b4] ss:$24 sps:$4 sm:$0xff]  }
 0x182   :  { %2305 = vmatpush1.bf16.msra.mxu0 %v6544_v14  ;;  %v6616_v14 = vld [vmem:[#allocation7 + $0x2b0] ss:$24 sps:$4 sm:$0xff]  }
 0x183   :  { %2428 = vmatpush1.bf16.msra.mxu1 %v6547_v9  ;;  %2306 = vmatprep.subr.bf16.mxu0 %v6552_v15  ;;  %v6621_v9 = vld [vmem:[#allocation7 + $0x2e4] ss:$24 sps:$4 sm:$0xff]   ;;  %v6619_v15 = vld [vmem:[#allocation7 + $0x2e0] ss:$24 sps:$4 sm:$0xff]  }
 0x184   :  { %2429 = vmatprep.subr.bf16.mxu1 %v6555_v17  ;;  %v6625_v17 = vld [vmem:[#allocation7 + $0x340] ss:$24 sps:$4 sm:$0xff]  }
 0x186   :  { %2307 = vmatpush1.bf16.msra.mxu0 %v6550_v18  ;;  %v6630_v18 = vld [vmem:[#allocation7 + $0x374] ss:$24 sps:$4 sm:$0xff]  }
 0x187   :  { %2430 = vmatpush1.bf16.msra.mxu1 %v6553_v22  ;;  %2308 = vmatprep.subr.bf16.mxu0 %v6558_v19  ;;  %v6628_v22 = vld [vmem:[#allocation7 + $0x370] ss:$24 sps:$4 sm:$0xff]   ;;  %v6633_v19 = vld [vmem:[#allocation7 + $0x3a4] ss:$24 sps:$4 sm:$0xff]  }
 0x188   :  { %2431 = vmatprep.subr.bf16.mxu1 %v6561_v25  ;;  %v6639_v25 = vld [vmem:[#allocation7 + $0x404] ss:$24 sps:$4 sm:$0xff]  }
 0x18a   :  { %2309 = vmatpush1.bf16.msra.mxu0 %v6556_v26  ;;  %v6637_v26 = vld [vmem:[#allocation7 + $0x400] ss:$24 sps:$4 sm:$0xff]  }
 0x18b   :  { %2432 = vmatpush1.bf16.msra.mxu1 %v6559_v31  ;;  %2310 = vmatprep.subr.bf16.mxu0 %v6564_v27  ;;  %v6642_v31 = vld [vmem:[#allocation7 + $0x434] ss:$24 sps:$4 sm:$0xff]   ;;  %v6645_v27 = vld [vmem:[#allocation7 + $0x464] ss:$24 sps:$4 sm:$0xff]  }
 0x18c   :  { %2433 = vmatprep.subr.bf16.mxu1 %v6567_v47  ;;  %v6649_v47 = vld [vmem:[#allocation7 + $0x4c0] ss:$24 sps:$4 sm:$0xff]  }
 0x18e   :  { %2311 = vmatpush1.bf16.msra.mxu0 %v6562_v32  ;;  %v6654_v32 = vld [vmem:[#allocation7 + $0x4f4] ss:$24 sps:$4 sm:$0xff]  }
 0x18f   :  { %2434 = vmatpush1.bf16.msra.mxu1 %v6565_v41  ;;  %2312 = vmatprep.subr.bf16.mxu0 %v6570_v36  ;;  %v6652_v41 = vld [vmem:[#allocation7 + $0x4f0] ss:$24 sps:$4 sm:$0xff]   ;;  %v6660_v36 = vld [vmem:[#allocation7 + $0x554] ss:$24 sps:$4 sm:$0xff]  }
 0x190   :  { %2435 = vmatprep.subr.bf16.mxu1 %v6573_v37  ;;  %v6658_v37 = vld [vmem:[#allocation7 + $0x550] ss:$24 sps:$4 sm:$0xff]  }
 0x192   :  { %2313 = vmatpush1.bf16.msra.mxu0 %v6568_v38  ;;  %v6663_v38 = vld [vmem:[#allocation7 + $0x584] ss:$24 sps:$4 sm:$0xff]  }
 0x193   :  { %2436 = vmatpush1.bf16.msra.mxu1 %v6571_v53  ;;  %2446 = vmatprep.subr.bf16.mxu0 %v6576_v40  ;;  %v6666_v53 = vld [vmem:[#allocation7 + $0x5b4] ss:$24 sps:$4 sm:$0xff]   ;;  %v6664_v40 = vld [vmem:[#allocation7 + $0x5b0] ss:$24 sps:$4 sm:$0xff]  }
 0x195   :  { %2315 = vmatmul.mubr.bf16.vlgmr.msra.gmra.mrb[0].mxu0 %v7870_v43 }
 0x196   :  { %2438 = vmatmul.mubr.bf16.vlgmr.msra.gmra.mrb[0].mxu1 %v7870_v43  ;;  %2447 = vmatpush1.bf16.msra.mxu0 %v6574_v46  ;;  %v6669_v46 = vld [vmem:[#allocation7 + $0x5e4] ss:$24 sps:$4 sm:$0xff]  }
 0x197   :  { %2478 = vmatprep.mubr.bf16.mxu0 %v7801_v24  ;;  %2448 = vmatprep.subr.bf16.mxu0 %v6579_v62  ;;  %v6597_v24 = vld [vmem:[#allocation7 + $0x164] ss:$24 sps:$4 sm:$0xff]   ;;  %v6667_v62 = vld [vmem:[#allocation7 + $0x5e0] ss:$24 sps:$4 sm:$0xff]  }
 0x19a   :  { %2449 = vmatpush1.bf16.msra.mxu0 %v6577_v51  ;;  %v6672_v51 = vld [vmem:[#allocation7 + $0x614] ss:$24 sps:$4 sm:$0xff]  }
 0x19b   :  { %2450 = vmatprep.subr.bf16.mxu0 %v6582_v48  ;;  %v6670_v48 = vld [vmem:[#allocation7 + $0x610] ss:$24 sps:$4 sm:$0xff]  }
 0x19e   :  { %2451 = vmatpush1.bf16.msra.mxu0 %v6580_v49  ;;  %v6675_v49 = vld [vmem:[#allocation7 + $0x644] ss:$24 sps:$4 sm:$0xff]  }
 0x19f   :  { %2452 = vmatprep.subr.bf16.mxu0 %v6585_v50  ;;  %v6673_v50 = vld [vmem:[#allocation7 + $0x640] ss:$24 sps:$4 sm:$0xff]  }
 0x1a2   :  { %2453 = vmatpush1.bf16.msra.mxu0 %v6583_v52  ;;  %v6678_v52 = vld [vmem:[#allocation7 + $0x674] ss:$24 sps:$4 sm:$0xff]  }
 0x1a3   :  { %2454 = vmatprep.subr.bf16.mxu0 %v6588_v54  ;;  %v6676_v54 = vld [vmem:[#allocation7 + $0x670] ss:$24 sps:$4 sm:$0xff]  }
 0x1a6   :  { %2455 = vmatpush1.bf16.msra.mxu0 %v6586_v55  ;;  %v6681_v55 = vld [vmem:[#allocation7 + $0x6a4] ss:$24 sps:$4 sm:$0xff]  }
 0x1a7   :  { %2456 = vmatprep.subr.bf16.mxu0 %v6591_v56  ;;  %v6679_v56 = vld [vmem:[#allocation7 + $0x6a0] ss:$24 sps:$4 sm:$0xff]  }
 0x1aa   :  { %2457 = vmatpush1.bf16.msra.mxu0 %v6589_v57  ;;  %v6684_v57 = vld [vmem:[#allocation7 + $0x6d4] ss:$24 sps:$4 sm:$0xff]  }
 0x1ab   :  { %2458 = vmatprep.subr.bf16.mxu0 %v6594_v59  ;;  %v6682_v59 = vld [vmem:[#allocation7 + $0x6d0] ss:$24 sps:$4 sm:$0xff]  }
 0x1ae   :  { %2459 = vmatpush1.bf16.msra.mxu0 %v6592_v60  ;;  %v6687_v60 = vld [vmem:[#allocation7 + $0x704] ss:$24 sps:$4 sm:$0xff]  }
 0x1af   :  { %2460 = vmatprep.subr.bf16.mxu0 %v6597_v24  ;;  %v6685_v24 = vld [vmem:[#allocation7 + $0x700] ss:$24 sps:$4 sm:$0xff]  }
 0x1b2   :  { %2461 = vmatpush1.bf16.msra.mxu0 %v6595_v61  ;;  %v6688_v61 = vld [vmem:[#allocation7 + $0x730] ss:$24 sps:$4 sm:$0xff]  }
 0x1b3   :  { %2462 = vmatprep.subr.bf16.mxu0 %v6600_v63  ;;  %v6691_v63 = vld [vmem:[#allocation7 + $0x760] ss:$24 sps:$4 sm:$0xff]  }
 0x1b6   :  { %2463 = vmatpush1.bf16.msra.mxu0 %v6598_v0  ;;  %v6696_v0 = vld [vmem:[#allocation7 + $0x794] ss:$24 sps:$4 sm:$0xff]  }
 0x1b7   :  { %2464 = vmatprep.subr.bf16.mxu0 %v6603_v2  ;;  %v6694_v2 = vld [vmem:[#allocation7 + $0x790] ss:$24 sps:$4 sm:$0xff]  }
 0x1ba   :  { %2465 = vmatpush1.bf16.msra.mxu0 %v6601_v3  ;;  %v6699_v3 = vld [vmem:[#allocation7 + $0x7c4] ss:$24 sps:$4 sm:$0xff]  }
 0x1bb   :  { %2466 = vmatprep.subr.bf16.mxu0 %v6606_v1  ;;  %v6697_v1 = vld [vmem:[#allocation7 + $0x7c0] ss:$24 sps:$4 sm:$0xff]  }
 0x1be   :  { %2467 = vmatpush1.bf16.msra.mxu0 %v6604_v4  ;;  %v6702_v4 = vld [vmem:[#allocation7 + $0x7f4] ss:$24 sps:$4 sm:$0xff]  }
 0x1bf   :  { %2468 = vmatprep.subr.bf16.mxu0 %v6609_v5  ;;  %v6700_v5 = vld [vmem:[#allocation7 + $0x7f0] ss:$24 sps:$4 sm:$0xff]  }
 0x1c2   :  { %2469 = vmatpush1.bf16.msra.mxu0 %v6607_v6  ;;  %v6705_v6 = vld [vmem:[#allocation7 + $0x824] ss:$24 sps:$4 sm:$0xff]  }
 0x1c3   :  { %2470 = vmatprep.subr.bf16.mxu0 %v6612_v7  ;;  %v6703_v7 = vld [vmem:[#allocation7 + $0x820] ss:$24 sps:$4 sm:$0xff]  }
 0x1c6   :  { %2471 = vmatpush1.bf16.msra.mxu0 %v6610_v8  ;;  %v6708_v8 = vld [vmem:[#allocation7 + $0x854] ss:$24 sps:$4 sm:$0xff]  }
 0x1c7   :  { %2472 = vmatprep.subr.bf16.mxu0 %v6615_v10  ;;  %v6706_v10 = vld [vmem:[#allocation7 + $0x850] ss:$24 sps:$4 sm:$0xff]  }
 0x1ca   :  { %2473 = vmatpush1.bf16.msra.mxu0 %v6613_v11  ;;  %v6711_v11 = vld [vmem:[#allocation7 + $0x884] ss:$24 sps:$4 sm:$0xff]  }
 0x1cb   :  { %2474 = vmatprep.subr.bf16.mxu0 %v6618_v12  ;;  %v6709_v12 = vld [vmem:[#allocation7 + $0x880] ss:$24 sps:$4 sm:$0xff]  }
 0x1ce   :  { %2475 = vmatpush1.bf16.msra.mxu0 %v6616_v14  ;;  %v6714_v14 = vld [vmem:[#allocation7 + $0x8b4] ss:$24 sps:$4 sm:$0xff]  }
 0x1cf   :  { %2476 = vmatprep.subr.bf16.mxu0 %v6621_v9  ;;  %v6712_v9 = vld [vmem:[#allocation7 + $0x8b0] ss:$24 sps:$4 sm:$0xff]  }
 0x1d2   :  { %2477 = vmatpush1.bf16.msra.mxu0 %v6619_v15  ;;  %v6717_v15 = vld [vmem:[#allocation7 + $0x8e4] ss:$24 sps:$4 sm:$0xff]  }
 0x1d3   :  { %2487 = vmatprep.subr.bf16.mxu0 %v6624_v16  ;;  %v6715_v16 = vld [vmem:[#allocation7 + $0x8e0] ss:$24 sps:$4 sm:$0xff]  }
 0x1d5   :  { %2479 = vmatmul.mubr.bf16.vlgmr.msra.gmra.mrb[4].mxu0 %v7806_v33  ;;  %v6640_v33 = vld [vmem:[#allocation7 + $0x430] ss:$24 sps:$4 sm:$0xff]  }
 0x1d6   :  { %2488 = vmatpush1.bf16.msra.mxu0 %v6622_v44  ;;  %2519 = vmatprep.mubr.bf16.mxu0 %v7831_v42  ;;  %v6643_v42 = vld [vmem:[#allocation7 + $0x460] ss:$24 sps:$4 sm:$0xff]  }
 0x1d7   :  { %2489 = vmatprep.subr.bf16.mxu0 %v6627_v45 }
 0x1da   :  { %2490 = vmatpush1.bf16.msra.mxu0 %v6625_v17 }
 0x1db   :  { %2491 = vmatprep.subr.bf16.mxu0 %v6630_v18 }
 0x1de   :  { %2492 = vmatpush1.bf16.msra.mxu0 %v6628_v22 }
 0x1df   :  { %2493 = vmatprep.subr.bf16.mxu0 %v6633_v19 }
 0x1e2   :  { %2494 = vmatpush1.bf16.msra.mxu0 %v6631_v20 }
 0x1e3   :  { %2495 = vmatprep.subr.bf16.mxu0 %v6636_v21 }
 0x1e6   :  { %2496 = vmatpush1.bf16.msra.mxu0 %v6634_v23  ;;  %v730_v23 = vlaneseq }
 0x1e7   :  { %2497 = vmatprep.subr.bf16.mxu0 %v6639_v25 }
 0x1e8   :  { %v731_v25 = vshrl.u32 %v730_v23, 7  ;;  %v6766_v23 = vld [vmem:[#allocation13 + $0x180] ss:$24 sps:$4 sm:$0xff]  }
 0x1ea   :  { %2498 = vmatpush1.bf16.msra.mxu0 %v6637_v26  ;;  %v7880_v26 = vsub.s32 0, %v731_v25 }
 0x1eb   :  { %2499 = vmatprep.subr.bf16.mxu0 %v6642_v31  ;;  %v7882_v31 = vsub.s32 1, %v731_v25 }
 0x1ee   :  { %2500 = vmatpush1.bf16.msra.mxu0 %v6640_v33  ;;  %v728_v33 = vld [vmem:[#allocation9] sm:$0x3f] }
 0x1ef   :  { %2501 = vmatprep.subr.bf16.mxu0 %v6645_v27  ;;  %v733_v27 = vrot.slane %v728_v33, %v7880_v26 }
 0x1f2   :  { %2502 = vmatpush1.bf16.msra.mxu0 %v6643_v42  ;;  %v737_v42 = vrot.slane %v728_v33, %v7882_v31 }
 0x1f3   :  { %2503 = vmatprep.subr.bf16.mxu0 %v6648_v28 }
 0x1f6   :  { %2504 = vmatpush1.bf16.msra.mxu0 %v6646_v29 }
 0x1f7   :  { %2505 = vmatprep.subr.bf16.mxu0 %v6651_v30 }
 0x1fa   :  { %2506 = vmatpush1.bf16.msra.mxu0 %v6649_v47  ;;  %v7893_v47 = vsub.s32 3, %v731_v25 }
 0x1fb   :  { %2507 = vmatprep.subr.bf16.mxu0 %v6654_v32 }
 0x1fe   :  { %2508 = vmatpush1.bf16.msra.mxu0 %v6652_v41 }
 0x1ff   :  { %2509 = vmatprep.subr.bf16.mxu0 %v6657_v34  ;;  %v745_v34 = vrot.slane %v728_v33, %v7893_v47 }
 0x202   :  { %2510 = vmatpush1.bf16.msra.mxu0 %v6655_v35  ;;  %v7900_v35 = vsub.s32 4, %v731_v25 }
 0x203   :  { %2511 = vmatprep.subr.bf16.mxu0 %v6660_v36  ;;  %v7902_v36 = vsub.s32 5, %v731_v25 }
 0x206   :  { %2512 = vmatpush1.bf16.msra.mxu0 %v6658_v37 }
 0x207   :  { %2513 = vmatprep.subr.bf16.mxu0 %v6663_v38 }
 0x20a   :  { %2514 = vmatpush1.bf16.msra.mxu0 %v6661_v39  ;;  %v749_v39 = vrot.slane %v728_v33, %v7900_v35 }
 0x20b   :  { %2515 = vmatprep.subr.bf16.mxu0 %v6666_v53  ;;  %v753_v53 = vrot.slane %v728_v33, %v7902_v36 }
 0x20e   :  { %2516 = vmatpush1.bf16.msra.mxu0 %v6664_v40 }
 0x20f   :  { %2517 = vmatprep.subr.bf16.mxu0 %v6669_v46 }
 0x212   :  { %2518 = vmatpush1.bf16.msra.mxu0 %v6667_v62 }
 0x213   :  { %2528 = vmatprep.subr.bf16.mxu0 %v6672_v51 }
 0x215   :  { %2520 = vmatmul.mubr.bf16.vlgmr.msra.gmra.mrb[4].mxu0 %v7838_v13  ;;  %v6690_v13 = vld [vmem:[#allocation7 + $0x734] ss:$24 sps:$4 sm:$0xff]  }
 0x216   :  { %2529 = vmatpush1.bf16.msra.mxu0 %v6670_v48  ;;  %2560 = vmatprep.mubr.bf16.mxu0 %v7860_v58  ;;  %v6693_v58 = vld [vmem:[#allocation7 + $0x764] ss:$24 sps:$4 sm:$0xff]  }
 0x217   :  { %2530 = vmatprep.subr.bf16.mxu0 %v6675_v49 }
 0x21a   :  { %2531 = vmatpush1.bf16.msra.mxu0 %v6673_v50 }
 0x21b   :  { %2532 = vmatprep.subr.bf16.mxu0 %v6678_v52 }
 0x21e   :  { %2533 = vmatpush1.bf16.msra.mxu0 %v6676_v54 }
 0x21f   :  { %2534 = vmatprep.subr.bf16.mxu0 %v6681_v55  ;;  %v6718_v55 = vld [vmem:[#allocation13] ss:$24 sps:$4 sm:$0xff]  }
 0x222   :  { %2535 = vmatpush1.bf16.msra.mxu0 %v6679_v56  ;;  %v6720_v56 = vld [vmem:[#allocation13 + $0x4] ss:$24 sps:$4 sm:$0xff]  }
 0x223   :  { %2536 = vmatprep.subr.bf16.mxu0 %v6684_v57  ;;  %v6721_v57 = vld [vmem:[#allocation13 + $0x8] ss:$24 sps:$4 sm:$0xff]   ;;  %4466 = vmatprep.subr.bf16.mxu1 %v6720_v56 }
 0x224   :  { %4467 = vmatpush1.bf16.msra.mxu1 %v6718_v55 }
 0x226   :  { %2537 = vmatpush1.bf16.msra.mxu0 %v6682_v59  ;;  %v6723_v59 = vld [vmem:[#allocation13 + $0xc] ss:$24 sps:$4 sm:$0xff]  }
 0x227   :  { %2538 = vmatprep.subr.bf16.mxu0 %v6687_v60  ;;  %v6726_v60 = vld [vmem:[#allocation13 + $0x34] ss:$24 sps:$4 sm:$0xff]  }
 0x228   :  { %4468 = vmatprep.subr.bf16.mxu1 %v6726_v60  ;;  %v6778_v60 = vld [vmem:[#allocation13 + $0x1e0] ss:$24 sps:$4 sm:$0xff]  }
 0x22a   :  { %2539 = vmatpush1.bf16.msra.mxu0 %v6685_v24  ;;  %v6729_v24 = vld [vmem:[#allocation13 + $0x3c] ss:$24 sps:$4 sm:$0xff]  }
 0x22b   :  { %2540 = vmatprep.subr.bf16.mxu0 %v6690_v13  ;;  %v6724_v13 = vld [vmem:[#allocation13 + $0x30] ss:$24 sps:$4 sm:$0xff]  }
 0x22c   :  { %4469 = vmatpush1.bf16.msra.mxu1 %v6724_v13  ;;  %v6786_v13 = vld [vmem:[#allocation13 + $0x214] ss:$24 sps:$4 sm:$0xff]  }
 0x22e   :  { %2541 = vmatpush1.bf16.msra.mxu0 %v6688_v61  ;;  %v6727_v61 = vld [vmem:[#allocation13 + $0x38] ss:$24 sps:$4 sm:$0xff]  }
 0x22f   :  { %2542 = vmatprep.subr.bf16.mxu0 %v6693_v58  ;;  %v6732_v58 = vld [vmem:[#allocation13 + $0x64] ss:$24 sps:$4 sm:$0xff]  }
 0x230   :  { %4470 = vmatprep.subr.bf16.mxu1 %v6732_v58  ;;  %v6789_v58 = vld [vmem:[#allocation13 + $0x21c] ss:$24 sps:$4 sm:$0xff]  }
 0x232   :  { %2543 = vmatpush1.bf16.msra.mxu0 %v6691_v63  ;;  %v6735_v63 = vld [vmem:[#allocation13 + $0x6c] ss:$24 sps:$4 sm:$0xff]  }
 0x233   :  { %2544 = vmatprep.subr.bf16.mxu0 %v6696_v0  ;;  %v6730_v0 = vld [vmem:[#allocation13 + $0x60] ss:$24 sps:$4 sm:$0xff]  }
 0x234   :  { %4471 = vmatpush1.bf16.msra.mxu1 %v6730_v0  ;;  %v6795_v0 = vld [vmem:[#allocation13 + $0x24c] ss:$24 sps:$4 sm:$0xff]  }
 0x236   :  { %2545 = vmatpush1.bf16.msra.mxu0 %v6694_v2  ;;  %v6733_v2 = vld [vmem:[#allocation13 + $0x68] ss:$24 sps:$4 sm:$0xff]  }
 0x237   :  { %2546 = vmatprep.subr.bf16.mxu0 %v6699_v3  ;;  %v6738_v3 = vld [vmem:[#allocation13 + $0x94] ss:$24 sps:$4 sm:$0xff]  }
 0x238   :  { %4472 = vmatprep.subr.bf16.mxu1 %v6738_v3  ;;  %v6793_v3 = vld [vmem:[#allocation13 + $0x248] ss:$24 sps:$4 sm:$0xff]  }
 0x23a   :  { %2547 = vmatpush1.bf16.msra.mxu0 %v6697_v1  ;;  %v6741_v1 = vld [vmem:[#allocation13 + $0x9c] ss:$24 sps:$4 sm:$0xff]  }
 0x23b   :  { %2548 = vmatprep.subr.bf16.mxu0 %v6702_v4  ;;  %v6736_v4 = vld [vmem:[#allocation13 + $0x90] ss:$24 sps:$4 sm:$0xff]  }
 0x23c   :  { %4473 = vmatpush1.bf16.msra.mxu1 %v6736_v4  ;;  %v6801_v4 = vld [vmem:[#allocation13 + $0x27c] ss:$24 sps:$4 sm:$0xff]  }
 0x23e   :  { %2549 = vmatpush1.bf16.msra.mxu0 %v6700_v5  ;;  %v6739_v5 = vld [vmem:[#allocation13 + $0x98] ss:$24 sps:$4 sm:$0xff]  }
 0x23f   :  { %2550 = vmatprep.subr.bf16.mxu0 %v6705_v6  ;;  %v6744_v6 = vld [vmem:[#allocation13 + $0xc4] ss:$24 sps:$4 sm:$0xff]  }
 0x240   :  { %4474 = vmatprep.subr.bf16.mxu1 %v6744_v6  ;;  %v6799_v6 = vld [vmem:[#allocation13 + $0x278] ss:$24 sps:$4 sm:$0xff]  }
 0x242   :  { %2551 = vmatpush1.bf16.msra.mxu0 %v6703_v7  ;;  %v6747_v7 = vld [vmem:[#allocation13 + $0xcc] ss:$24 sps:$4 sm:$0xff]  }
 0x243   :  { %2552 = vmatprep.subr.bf16.mxu0 %v6708_v8  ;;  %v6742_v8 = vld [vmem:[#allocation13 + $0xc0] ss:$24 sps:$4 sm:$0xff]  }
 0x244   :  { %4475 = vmatpush1.bf16.msra.mxu1 %v6742_v8  ;;  %v6807_v8 = vld [vmem:[#allocation13 + $0x2ac] ss:$24 sps:$4 sm:$0xff]  }
 0x246   :  { %2553 = vmatpush1.bf16.msra.mxu0 %v6706_v10  ;;  %v6745_v10 = vld [vmem:[#allocation13 + $0xc8] ss:$24 sps:$4 sm:$0xff]  }
 0x247   :  { %2554 = vmatprep.subr.bf16.mxu0 %v6711_v11  ;;  %v6750_v11 = vld [vmem:[#allocation13 + $0xf4] ss:$24 sps:$4 sm:$0xff]  }
 0x248   :  { %4476 = vmatprep.subr.bf16.mxu1 %v6750_v11  ;;  %v6805_v11 = vld [vmem:[#allocation13 + $0x2a8] ss:$24 sps:$4 sm:$0xff]  }
 0x24a   :  { %2555 = vmatpush1.bf16.msra.mxu0 %v6709_v12  ;;  %v6753_v12 = vld [vmem:[#allocation13 + $0xfc] ss:$24 sps:$4 sm:$0xff]  }
 0x24b   :  { %2556 = vmatprep.subr.bf16.mxu0 %v6714_v14  ;;  %v6748_v14 = vld [vmem:[#allocation13 + $0xf0] ss:$24 sps:$4 sm:$0xff]  }
 0x24c   :  { %4477 = vmatpush1.bf16.msra.mxu1 %v6748_v14  ;;  %v6813_v14 = vld [vmem:[#allocation13 + $0x2dc] ss:$24 sps:$4 sm:$0xff]  }
 0x24e   :  { %2557 = vmatpush1.bf16.msra.mxu0 %v6712_v9  ;;  %v6751_v9 = vld [vmem:[#allocation13 + $0xf8] ss:$24 sps:$4 sm:$0xff]  }
 0x24f   :  { %2558 = vmatprep.subr.bf16.mxu0 %v6717_v15  ;;  %v6756_v15 = vld [vmem:[#allocation13 + $0x124] ss:$24 sps:$4 sm:$0xff]  }
 0x250   :  { %4478 = vmatprep.subr.bf16.mxu1 %v6756_v15  ;;  %v6811_v15 = vld [vmem:[#allocation13 + $0x2d8] ss:$24 sps:$4 sm:$0xff]  }
 0x252   :  { %2559 = vmatpush1.bf16.msra.mxu0 %v6715_v16  ;;  %v6759_v16 = vld [vmem:[#allocation13 + $0x12c] ss:$24 sps:$4 sm:$0xff]  }
 0x253   :  { %4589 = vmatprep.subr.bf16.mxu0 %v6723_v59  ;;  %v6783_v59 = vld [vmem:[#allocation13 + $0x1ec] ss:$24 sps:$4 sm:$0xff]  }
 0x255   :  { %2561 = vmatmul.mubr.bf16.vlgmr.msra.gmra.mrb[4].mxu0 %v7870_v43  ;;  %v7886_v43 = vsub.s32 2, %v731_v25  ;;  %v6769_v25 = vld [vmem:[#allocation13 + $0x188] ss:$24 sps:$4 sm:$0xff]  }
 0x256   :  { %4590 = vmatpush1.bf16.msra.mxu0 %v6721_v57  ;;  %v6780_v57 = vld [vmem:[#allocation13 + $0x1e4] ss:$24 sps:$4 sm:$0xff]  }
 0x257   :  { %v741_v30 = vrot.slane %v728_v33, %v7886_v43  ;;  %4591 = vmatprep.subr.bf16.mxu0 %v6729_v24  ;;  %v6774_v33 = vld [vmem:[#allocation13 + $0x1b4] ss:$24 sps:$4 sm:$0xff]   ;;  %v6781_v24 = vld [vmem:[#allocation13 + $0x1e8] ss:$24 sps:$4 sm:$0xff]  }
 0x25a   :  { %4592 = vmatpush1.bf16.msra.mxu0 %v6727_v61  ;;  %v6787_v61 = vld [vmem:[#allocation13 + $0x218] ss:$24 sps:$4 sm:$0xff]  }
 0x25b   :  { %4593 = vmatprep.subr.bf16.mxu0 %v6735_v63  ;;  %v6792_v63 = vld [vmem:[#allocation13 + $0x244] ss:$24 sps:$4 sm:$0xff]  }
 0x25e   :  { %4594 = vmatpush1.bf16.msra.mxu0 %v6733_v2  ;;  %v6790_v2 = vld [vmem:[#allocation13 + $0x240] ss:$24 sps:$4 sm:$0xff]  }
 0x25f   :  { %4595 = vmatprep.subr.bf16.mxu0 %v6741_v1  ;;  %v6798_v1 = vld [vmem:[#allocation13 + $0x274] ss:$24 sps:$4 sm:$0xff]  }
 0x262   :  { %4596 = vmatpush1.bf16.msra.mxu0 %v6739_v5  ;;  %v6796_v5 = vld [vmem:[#allocation13 + $0x270] ss:$24 sps:$4 sm:$0xff]  }
 0x263   :  { %4597 = vmatprep.subr.bf16.mxu0 %v6747_v7  ;;  %v6804_v7 = vld [vmem:[#allocation13 + $0x2a4] ss:$24 sps:$4 sm:$0xff]  }
 0x266   :  { %4598 = vmatpush1.bf16.msra.mxu0 %v6745_v10  ;;  %v6802_v10 = vld [vmem:[#allocation13 + $0x2a0] ss:$24 sps:$4 sm:$0xff]  }
 0x267   :  { %4599 = vmatprep.subr.bf16.mxu0 %v6753_v12  ;;  %v6810_v12 = vld [vmem:[#allocation13 + $0x2d4] ss:$24 sps:$4 sm:$0xff]  }
 0x268   :  { %v2316_v44 = vpop.f32.mrb[0].mxu0 }
 0x269   :  { %v2439_v45 = vpop.f32.mrb[0].mxu1  ;;  %v2318_v17 = vpop.f32.mrb[1].mxu0  ;;  %v7888_v28 = vadd.f32 %v2316_v44, %v733_v27  ;;  %v6754_v44 = vld [vmem:[#allocation13 + $0x120] ss:$24 sps:$4 sm:$0xff]   ;;  %v6777_v27 = vld [vmem:[#allocation13 + $0x1bc] ss:$24 sps:$4 sm:$0xff]  }
 0x26a   :  { %v2441_v18 = vpop.f32.mrb[1].mxu1  ;;  %v2320_v22 = vpop.f32.mrb[2].mxu0  ;;  %v7890_v29 = vadd.f32 %v2318_v17, %v737_v42  ;;  %v7897_v41 = vadd.f32 %v2439_v45, %v741_v30  ;;  %4600 = vmatpush1.bf16.msra.mxu0 %v6751_v9  ;;  %v6757_v45 = vld [vmem:[#allocation13 + $0x128] ss:$24 sps:$4 sm:$0xff]   ;;  %v6762_v17 = vld [vmem:[#allocation13 + $0x154] ss:$24 sps:$4 sm:$0xff]   ;;  %4479 = vmatpush1.bf16.msra.mxu1 %v6754_v44 }
 0x26b   :  { %v2443_v19 = vpop.f32.mrb[2].mxu1  ;;  %v2321_v20 = vpop.f32.mrb[3].mxu0  ;;  %v7905_v38 = vadd.f32 %v2441_v18, %v745_v34  ;;  %4601 = vmatprep.subr.bf16.mxu0 %v6759_v16  ;;  %v6765_v18 = vld [vmem:[#allocation13 + $0x15c] ss:$24 sps:$4 sm:$0xff]   ;;  %v6760_v22 = vld [vmem:[#allocation13 + $0x150] ss:$24 sps:$4 sm:$0xff]   ;;  %4480 = vmatprep.subr.bf16.mxu1 %v6762_v17 }
 0x26c   :  { %v2444_v21 = vpop.f32.mrb[3].mxu1  ;;  %v2571_v32 = vadd.f32 %v7890_v29, %v7888_v28  ;;  %v6763_v19 = vld [vmem:[#allocation13 + $0x158] ss:$24 sps:$4 sm:$0xff]   ;;  %v6768_v20 = vld [vmem:[#allocation13 + $0x184] ss:$24 sps:$4 sm:$0xff]  }
 0x26d   :  { %v6771_v21 = vld [vmem:[#allocation13 + $0x18c] ss:$24 sps:$4 sm:$0xff]   ;;  %v6772_v42 = vld [vmem:[#allocation13 + $0x1b0] ss:$24 sps:$4 sm:$0xff]  }
 0x26e   :  { %v2572_v37 = vadd.f32 %v7897_v41, %v2571_v32  ;;  %4602 = vmatpush1.bf16.msra.mxu0 %v6757_v45  ;;  %4481 = vmatpush1.bf16.msra.mxu1 %v6760_v22  ;;  %v6775_v30 = vld [vmem:[#allocation13 + $0x1b8] ss:$24 sps:$4 sm:$0xff]   ;;  %v6816_v16 = vld [vmem:[#allocation13 + $0x304] ss:$24 sps:$4 sm:$0xff]  }
 0x26f   :  { %4603 = vmatprep.subr.bf16.mxu0 %v6765_v18  ;;  %4482 = vmatprep.subr.bf16.mxu1 %v6768_v20  ;;  %v6808_v9 = vld [vmem:[#allocation13 + $0x2d0] ss:$24 sps:$4 sm:$0xff]   ;;  %v6819_v44 = vld [vmem:[#allocation13 + $0x30c] ss:$24 sps:$4 sm:$0xff]   ;;  %v2569_v22 = vld [vmem:[#allocation10] sm:$0x3f] }
 0x270   :  { %v2573_v46 = vadd.f32 %v7905_v38, %v2572_v37  ;;  %v2616_v20 = vrot.slane %v2569_v22, %v7882_v31 }
 0x272   :  { %4604 = vmatpush1.bf16.msra.mxu0 %v6763_v19  ;;  %4483 = vmatpush1.bf16.msra.mxu1 %v6766_v23  ;;  %v2570_v19 = vld [vmem:[#allocation12] sm:$0x3f] }
 0x273   :  { %4605 = vmatprep.subr.bf16.mxu0 %v6771_v21  ;;  %4484 = vmatprep.subr.bf16.mxu1 %v6774_v33  ;;  %v2612_v21 = vrot.slane %v2569_v22, %v7880_v26  ;;  %v2653_v23 = vrot.slane %v2570_v19, %v7882_v31  ;;  %v2620_v33 = vrot.slane %v2569_v22, %v7886_v43 }
 0x276   :  { %4606 = vmatpush1.bf16.msra.mxu0 %v6769_v25  ;;  %4485 = vmatpush1.bf16.msra.mxu1 %v6772_v42  ;;  %v2624_v25 = vrot.slane %v2569_v22, %v7893_v47 }
 0x277   :  { %4607 = vmatprep.subr.bf16.mxu0 %v6777_v27  ;;  %4486 = vmatprep.subr.bf16.mxu1 %v6780_v57  ;;  %v2632_v27 = vrot.slane %v2569_v22, %v7902_v36 }
 0x27a   :  { %4608 = vmatpush1.bf16.msra.mxu0 %v6775_v30  ;;  %4487 = vmatpush1.bf16.msra.mxu1 %v6778_v60  ;;  %v2649_v30 = vrot.slane %v2570_v19, %v7880_v26 }
 0x27b   :  { %4609 = vmatprep.subr.bf16.mxu0 %v6783_v59  ;;  %4488 = vmatprep.subr.bf16.mxu1 %v6786_v13 }
 0x27e   :  { %4610 = vmatpush1.bf16.msra.mxu0 %v6781_v24 }
 0x27f   :  { %4611 = vmatprep.subr.bf16.mxu0 %v6789_v58 }
 0x282   :  { %4612 = vmatpush1.bf16.msra.mxu0 %v6787_v61 }
 0x283   :  { %4613 = vmatprep.subr.bf16.mxu0 %v6795_v0 }
 0x286   :  { %4614 = vmatpush1.bf16.msra.mxu0 %v6793_v3  ;;  %v6817_v3 = vld [vmem:[#allocation13 + $0x308] ss:$24 sps:$4 sm:$0xff]  }
 0x287   :  { %4615 = vmatprep.subr.bf16.mxu0 %v6801_v4 }
 0x28a   :  { %4616 = vmatpush1.bf16.msra.mxu0 %v6799_v6  ;;  %v6825_v6 = vld [vmem:[#allocation13 + $0x33c] ss:$24 sps:$4 sm:$0xff]  }
 0x28b   :  { %4617 = vmatprep.subr.bf16.mxu0 %v6807_v8  ;;  %v6820_v8 = vld [vmem:[#allocation13 + $0x330] ss:$24 sps:$4 sm:$0xff]  }
 0x28e   :  { %4618 = vmatpush1.bf16.msra.mxu0 %v6805_v11  ;;  %v6828_v11 = vld [vmem:[#allocation13 + $0x364] ss:$24 sps:$4 sm:$0xff]  }
 0x28f   :  { %4619 = vmatprep.subr.bf16.mxu0 %v6813_v14  ;;  %v6826_v14 = vld [vmem:[#allocation13 + $0x360] ss:$24 sps:$4 sm:$0xff]  }
 0x292   :  { %4620 = vmatpush1.bf16.msra.mxu0 %v6811_v15  ;;  %v6834_v15 = vld [vmem:[#allocation13 + $0x394] ss:$24 sps:$4 sm:$0xff]  }
 0x293   :  { %4630 = vmatprep.subr.bf16.mxu0 %v6819_v44  ;;  %v6832_v44 = vld [vmem:[#allocation13 + $0x390] ss:$24 sps:$4 sm:$0xff]  }
 0x328   :  { %v2562_v40 = vpop.f32.mrb[4].mxu0 }
 0x329   :  { %v7910_v62 = vadd.f32 %v2562_v40, %v749_v39  ;;  %v2564_v51 = vpop.f32.mrb[5].mxu0 }
 0x32a   :  { %v7912_v48 = vadd.f32 %v2564_v51, %v753_v53  ;;  %v2566_v49 = vpop.f32.mrb[6].mxu0 }
 0x32b   :  { %v2567_v50 = vpop.f32.mrb[7].mxu0  ;;  %v2574_v52 = vadd.f32 %v7910_v62, %v2573_v46 }
 0x32d   :  { %v2575_v54 = vadd.f32 %v7912_v48, %v2574_v52 }
 0x32f   :  { %2576 = vadd.xlane.f32.xlu0 %v2575_v54 }
 0x3bc   :  { %v2577_v32 = vpop.xlane.xlu0 %2576 }
 0x3bd   :  { %v2579_v34 = vmul.f32 0.0013020834, %v2577_v32  ;;  %v2661_v32 = vrot.slane %v2570_v19, %v7893_v47 }
 0x3bf   :  { %v7917_v37 = vsub.f32 %v7888_v28, %v2579_v34  ;;  %v7920_v39 = vsub.f32 %v7890_v29, %v2579_v34  ;;  %v7923_v53 = vsub.f32 %v7897_v41, %v2579_v34  ;;  %v7926_v40 = vsub.f32 %v7905_v38, %v2579_v34 }
 0x3c0   :  { %v7933_v49 = vsub.f32 %v7910_v62, %v2579_v34  ;;  %v7938_v50 = vsub.f32 %v7912_v48, %v2579_v34  ;;  %v6784_v48 = vld [vmem:[#allocation13 + $0x210] ss:$24 sps:$4 sm:$0xff]   ;;  %v2657_v34 = vrot.slane %v2570_v19, %v7886_v43 }
 0x3c1   :  { %v2586_v46 = vmul.f32 %v7917_v37, %v7917_v37  ;;  %v2587_v51 = vmul.f32 %v7920_v39, %v7920_v39  ;;  %v2588_v28 = vmul.f32 %v7923_v53, %v7923_v53  ;;  %v2589_v41 = vmul.f32 %v7926_v40, %v7926_v40  ;;  %4489 = vmatpush1.bf16.msra.mxu1 %v6784_v48 }
 0x3c2   :  { %v2590_v52 = vmul.f32 %v7933_v49, %v7933_v49  ;;  %v2591_v55 = vmul.f32 %v7938_v50, %v7938_v50  ;;  %4490 = vmatprep.subr.bf16.mxu1 %v6792_v63 }
 0x3c3   :  { %v2592_v29 = vadd.f32 %v2587_v51, %v2586_v46  ;;  %v2628_v46 = vrot.slane %v2569_v22, %v7900_v35  ;;  %v6838_v22 = vld [vmem:[#allocation13 + $0x3c0] ss:$24 sps:$4 sm:$0xff]  }
 0x3c5   :  { %v2593_v38 = vadd.f32 %v2592_v29, %v2588_v28  ;;  %4491 = vmatpush1.bf16.msra.mxu1 %v6790_v2  ;;  %v6814_v2 = vld [vmem:[#allocation13 + $0x300] ss:$24 sps:$4 sm:$0xff]  }
 0x3c6   :  { %4492 = vmatprep.subr.bf16.mxu1 %v6798_v1 }
 0x3c7   :  { %v2594_v54 = vadd.f32 %v2593_v38, %v2589_v41 }
 0x3c9   :  { %v2595_v62 = vadd.f32 %v2594_v54, %v2590_v52  ;;  %4493 = vmatpush1.bf16.msra.mxu1 %v6796_v5  ;;  %v2669_v52 = vrot.slane %v2570_v19, %v7902_v36  ;;  %v6822_v5 = vld [vmem:[#allocation13 + $0x334] ss:$24 sps:$4 sm:$0xff]  }
 0x3ca   :  { %4494 = vmatprep.subr.bf16.mxu1 %v6804_v7 }
 0x3cb   :  { %v2596_v56 = vadd.f32 %v2595_v62, %v2591_v55  ;;  %v2665_v55 = vrot.slane %v2570_v19, %v7900_v35  ;;  %v6841_v19 = vld [vmem:[#allocation13 + $0x3c8] ss:$24 sps:$4 sm:$0xff]  }
 0x3cd   :  { %2597 = vadd.xlane.f32.xlu0 %v2596_v56  ;;  %4495 = vmatpush1.bf16.msra.mxu1 %v6802_v10  ;;  %v6823_v10 = vld [vmem:[#allocation13 + $0x338] ss:$24 sps:$4 sm:$0xff]  }
 0x3ce   :  { %4496 = vmatprep.subr.bf16.mxu1 %v6810_v12  ;;  %v6831_v12 = vld [vmem:[#allocation13 + $0x36c] ss:$24 sps:$4 sm:$0xff]  }
 0x3d1   :  { %4497 = vmatpush1.bf16.msra.mxu1 %v6808_v9  ;;  %v6829_v9 = vld [vmem:[#allocation13 + $0x368] ss:$24 sps:$4 sm:$0xff]  }
 0x3d2   :  { %4507 = vmatprep.subr.bf16.mxu1 %v6816_v16  ;;  %v6837_v16 = vld [vmem:[#allocation13 + $0x39c] ss:$24 sps:$4 sm:$0xff]  }
 0x45a   :  { %v2598_v45 = vpop.xlane.xlu0 %2597 }
 0x45b   :  { %v2599_v17 = vmul.f32 0.0013020834, %v2598_v45  ;;  %v6835_v45 = vld [vmem:[#allocation13 + $0x398] ss:$24 sps:$4 sm:$0xff]  }
 0x45d   :  { %v2600_v18 = vadd.f32 1e-05, %v2599_v17  ;;  %v6840_v17 = vld [vmem:[#allocation13 + $0x3c4] ss:$24 sps:$4 sm:$0xff]  }
 0x45f   :  { %7198 = vrsqrt.f32 %v2600_v18  ;;  %v6843_v18 = vld [vmem:[#allocation13 + $0x3cc] ss:$24 sps:$4 sm:$0xff]  }
 0x469   :  { %v7199_v42 = vpop.eup %7198 }
 0x46a   :  { %v2603_v51 = vmul.f32 %v7199_v42, %v7920_v39  ;;  %v2602_v28 = vmul.f32 %v7199_v42, %v7917_v37  ;;  %v2605_v29 = vmul.f32 %v7199_v42, %v7926_v40  ;;  %v2604_v41 = vmul.f32 %v7199_v42, %v7923_v53 }
 0x46b   :  { %v2607_v38 = vmul.f32 %v7199_v42, %v7938_v50  ;;  %v2606_v54 = vmul.f32 %v7199_v42, %v7933_v49  ;;  %v6850_v42 = vld [vmem:[#allocation13 + $0x420] ss:$24 sps:$4 sm:$0xff]  }
 0x46c   :  { %v2640_v62 = vmul.f32 %v2616_v20, %v2603_v51  ;;  %v2639_v56 = vmul.f32 %v2612_v21, %v2602_v28  ;;  %v2642_v57 = vmul.f32 %v2624_v25, %v2605_v29  ;;  %v2641_v59 = vmul.f32 %v2620_v33, %v2604_v41  ;;  %v6846_v20 = vld [vmem:[#allocation13 + $0x3f4] ss:$24 sps:$4 sm:$0xff]   ;;  %v6847_v25 = vld [vmem:[#allocation13 + $0x3f8] ss:$24 sps:$4 sm:$0xff]   ;;  %v6852_v33 = vld [vmem:[#allocation13 + $0x424] ss:$24 sps:$4 sm:$0xff]  }
 0x46d   :  { %v2644_v60 = vmul.f32 %v2632_v27, %v2607_v38  ;;  %v2643_v39 = vmul.f32 %v2628_v46, %v2606_v54  ;;  %v6849_v21 = vld [vmem:[#allocation13 + $0x3fc] ss:$24 sps:$4 sm:$0xff]   ;;  %v6855_v27 = vld [vmem:[#allocation13 + $0x42c] ss:$24 sps:$4 sm:$0xff]   ;;  %v6856_v46 = vld [vmem:[#allocation13 + $0x450] ss:$24 sps:$4 sm:$0xff]  }
 0x46e   :  { %v2677_v24 = vadd.f32 %v2653_v23, %v2640_v62  ;;  %v2676_v37 = vadd.f32 %v2649_v30, %v2639_v56  ;;  %v2679_v48 = vadd.f32 %v2661_v32, %v2642_v57  ;;  %v7964_v40 = vadd.f32 %v2657_v34, %v2641_v59  ;;  %v6844_v23 = vld [vmem:[#allocation13 + $0x3f0] ss:$24 sps:$4 sm:$0xff]   ;;  %v6858_v32 = vld [vmem:[#allocation13 + $0x454] ss:$24 sps:$4 sm:$0xff]   ;;  %v6864_v28 = vld [vmem:[#allocation13 + $0x484] ss:$24 sps:$4 sm:$0xff]  }
 0x46f   :  { %v7966_v53 = vadd.f32 %v2669_v52, %v2644_v60  ;;  %v7968_v50 = vadd.f32 %v2665_v55, %v2643_v39  ;;  %v6853_v30 = vld [vmem:[#allocation13 + $0x428] ss:$24 sps:$4 sm:$0xff]   ;;  %v6861_v34 = vld [vmem:[#allocation13 + $0x45c] ss:$24 sps:$4 sm:$0xff]   ;;  %v6859_v51 = vld [vmem:[#allocation13 + $0x458] ss:$24 sps:$4 sm:$0xff]  }
 0x470   :  { %vm2683_vm0 = vcmp.gt.f32.partialorder %v2677_v24, 0.0  ;;  %v2689_v13 = vmul.f32 0.01, %v2677_v24  ;;  %vm2682_vm1 = vcmp.gt.f32.partialorder %v2676_v37, 0.0  ;;  %v2688_v49 = vmul.f32 0.01, %v2676_v37 }
 0x471   :  { %vm2685_vm2 = vcmp.gt.f32.partialorder %v2679_v48, 0.0  ;;  %v2691_v61 = vmul.f32 0.01, %v2679_v48  ;;  %v6867_v29 = vld [vmem:[#allocation13 + $0x48c] ss:$24 sps:$4 sm:$0xff]   ;;  %vm2684_vm3 = vcmp.gt.f32.partialorder %v7964_v40, 0.0 }
 0x472   :  { %v2695_v58 = vsel %vm2683_vm0, %v2677_v24, %v2689_v13  ;;  %v2694_v63 = vsel %vm2682_vm1, %v2676_v37, %v2688_v49  ;;  %v6862_v41 = vld [vmem:[#allocation13 + $0x480] ss:$24 sps:$4 sm:$0xff]   ;;  %v6870_v52 = vld [vmem:[#allocation13 + $0x4b4] ss:$24 sps:$4 sm:$0xff]   ;;  %v6868_v55 = vld [vmem:[#allocation13 + $0x4b0] ss:$24 sps:$4 sm:$0xff]  }
 0x473   :  { %v7970_v0 = vpack.c.bf16 %v2695_v58, %v2695_v58  ;;  %v7972_v1 = vpack.c.bf16 %v2694_v63, %v2694_v63  ;;  %v2697_v4 = vsel %vm2685_vm2, %v2679_v48, %v2691_v61  ;;  %v6865_v38 = vld [vmem:[#allocation13 + $0x488] ss:$24 sps:$4 sm:$0xff]   ;;  %v6873_v54 = vld [vmem:[#allocation13 + $0x4bc] ss:$24 sps:$4 sm:$0xff]   ;;  %v6871_v62 = vld [vmem:[#allocation13 + $0x4b8] ss:$24 sps:$4 sm:$0xff]  }
 0x474   :  { %v7978_v7 = vpack.c.bf16 %v2697_v4, %v2697_v4  ;;  %v6876_v56 = vld [vmem:[#allocation13 + $0x4e4] ss:$24 sps:$4 sm:$0xff]   ;;  %v6874_v59 = vld [vmem:[#allocation13 + $0x4e0] ss:$24 sps:$4 sm:$0xff]   ;;  %v6882_v39 = vld [vmem:[#allocation13 + $0x514] ss:$24 sps:$4 sm:$0xff]  }
 0x475   :  { %4498 = vmatprep.mubr.bf16.mxu1 %v7970_v0  ;;  %4621 = vmatprep.mubr.bf16.mxu0 %v7970_v0  ;;  %v6879_v57 = vld [vmem:[#allocation13 + $0x4ec] ss:$24 sps:$4 sm:$0xff]   ;;  %v6877_v60 = vld [vmem:[#allocation13 + $0x4e8] ss:$24 sps:$4 sm:$0xff]   ;;  %v6885_v24 = vld [vmem:[#allocation13 + $0x51c] ss:$24 sps:$4 sm:$0xff]  }
 0x476   :  { %4499 = vmatmul.mubr.bf16.vlgmr.msra.gmra.mrb[4].mxu1 %v7972_v1  ;;  %4622 = vmatmul.mubr.bf16.vlgmr.msra.gmra.mrb[8].mxu0 %v7972_v1  ;;  %v6880_v37 = vld [vmem:[#allocation13 + $0x510] ss:$24 sps:$4 sm:$0xff]   ;;  %v6888_v13 = vld [vmem:[#allocation13 + $0x544] ss:$24 sps:$4 sm:$0xff]   ;;  %v6886_v61 = vld [vmem:[#allocation13 + $0x540] ss:$24 sps:$4 sm:$0xff]  }
 0x477   :  { %4508 = vmatpush1.bf16.msra.mxu1 %v6814_v2  ;;  %4631 = vmatpush1.bf16.msra.mxu0 %v6817_v3  ;;  %v6883_v48 = vld [vmem:[#allocation13 + $0x518] ss:$24 sps:$4 sm:$0xff]   ;;  %v6891_v49 = vld [vmem:[#allocation13 + $0x54c] ss:$24 sps:$4 sm:$0xff]   ;;  %v6889_v58 = vld [vmem:[#allocation13 + $0x548] ss:$24 sps:$4 sm:$0xff]  }
 0x478   :  { %4539 = vmatprep.mubr.bf16.mxu1 %v7978_v7  ;;  %4662 = vmatprep.mubr.bf16.mxu0 %v7978_v7  ;;  %v6894_v63 = vld [vmem:[#allocation13 + $0x574] ss:$24 sps:$4 sm:$0xff]   ;;  %v6892_v3 = vld [vmem:[#allocation13 + $0x570] ss:$24 sps:$4 sm:$0xff]   ;;  %vm2687_vm4 = vcmp.gt.f32.partialorder %v7966_v53, 0.0  ;;  %vm2686_vm5 = vcmp.gt.f32.partialorder %v7968_v50, 0.0 }
 0x479   :  { %4509 = vmatprep.subr.bf16.mxu1 %v6822_v5  ;;  %4632 = vmatprep.subr.bf16.mxu0 %v6825_v6  ;;  %v6897_v2 = vld [vmem:[#allocation13 + $0x57c] ss:$24 sps:$4 sm:$0xff]   ;;  %v6895_v4 = vld [vmem:[#allocation13 + $0x578] ss:$24 sps:$4 sm:$0xff]   ;;  %v6903_v6 = vld [vmem:[#allocation13 + $0x5ac] ss:$24 sps:$4 sm:$0xff]  }
 0x47a   :  { %v6900_v5 = vld [vmem:[#allocation13 + $0x5a4] ss:$24 sps:$4 sm:$0xff]  }
 0x47b   :  { %4510 = vmatpush1.bf16.msra.mxu1 %v6820_v8  ;;  %4633 = vmatpush1.bf16.msra.mxu0 %v6823_v10  ;;  %v6898_v8 = vld [vmem:[#allocation13 + $0x5a0] ss:$24 sps:$4 sm:$0xff]  }
 0x47c   :  { %4511 = vmatprep.subr.bf16.mxu1 %v6828_v11  ;;  %4634 = vmatprep.subr.bf16.mxu0 %v6831_v12  ;;  %v6901_v10 = vld [vmem:[#allocation13 + $0x5a8] ss:$24 sps:$4 sm:$0xff]   ;;  %v6906_v11 = vld [vmem:[#allocation13 + $0x5d4] ss:$24 sps:$4 sm:$0xff]  }
 0x47d   :  { %v6909_v12 = vld [vmem:[#allocation13 + $0x5dc] ss:$24 sps:$4 sm:$0xff]  }
 0x47f   :  { %4512 = vmatpush1.bf16.msra.mxu1 %v6826_v14  ;;  %4635 = vmatpush1.bf16.msra.mxu0 %v6829_v9  ;;  %v2690_v14 = vmul.f32 0.01, %v7964_v40  ;;  %v2693_v9 = vmul.f32 0.01, %v7966_v53 }
 0x480   :  { %4513 = vmatprep.subr.bf16.mxu1 %v6834_v15  ;;  %4636 = vmatprep.subr.bf16.mxu0 %v6837_v16  ;;  %v6904_v15 = vld [vmem:[#allocation13 + $0x5d0] ss:$24 sps:$4 sm:$0xff]  }
 0x481   :  { %v6907_v16 = vld [vmem:[#allocation13 + $0x5d8] ss:$24 sps:$4 sm:$0xff]  }
 0x483   :  { %4514 = vmatpush1.bf16.msra.mxu1 %v6832_v44  ;;  %4637 = vmatpush1.bf16.msra.mxu0 %v6835_v45  ;;  %v6912_v44 = vld [vmem:[#allocation13 + $0x604] ss:$24 sps:$4 sm:$0xff]  }
 0x484   :  { %4515 = vmatprep.subr.bf16.mxu1 %v6840_v17  ;;  %4638 = vmatprep.subr.bf16.mxu0 %v6843_v18  ;;  %v6915_v45 = vld [vmem:[#allocation13 + $0x60c] ss:$24 sps:$4 sm:$0xff]   ;;  %v2696_v17 = vsel %vm2684_vm3, %v7964_v40, %v2690_v14  ;;  %v2699_v18 = vsel %vm2687_vm4, %v7966_v53, %v2693_v9  ;;  %v6916_v40 = vld [vmem:[#allocation13 + $0x630] ss:$24 sps:$4 sm:$0xff]  }
 0x485   :  { %v6919_v53 = vld [vmem:[#allocation13 + $0x638] ss:$24 sps:$4 sm:$0xff]  }
 0x486   :  { %v6976_v14 = vld [vmem:[#allocation13 + $0x810] ss:$24 sps:$4 sm:$0xff]  }
 0x487   :  { %4516 = vmatpush1.bf16.msra.mxu1 %v6838_v22  ;;  %4639 = vmatpush1.bf16.msra.mxu0 %v6841_v19  ;;  %v6910_v22 = vld [vmem:[#allocation13 + $0x600] ss:$24 sps:$4 sm:$0xff]   ;;  %v7988_v19 = vpack.c.bf16 %v2696_v17, %v2696_v17  ;;  %v6990_v17 = vld [vmem:[#allocation13 + $0x874] ss:$24 sps:$4 sm:$0xff]  }
 0x488   :  { %4517 = vmatprep.subr.bf16.mxu1 %v6846_v20  ;;  %4640 = vmatprep.subr.bf16.mxu0 %v6849_v21  ;;  %v6913_v20 = vld [vmem:[#allocation13 + $0x608] ss:$24 sps:$4 sm:$0xff]   ;;  %v7990_v21 = vpack.c.bf16 %v2699_v18, %v2699_v18  ;;  %v6979_v9 = vld [vmem:[#allocation13 + $0x818] ss:$24 sps:$4 sm:$0xff]   ;;  %v6993_v18 = vld [vmem:[#allocation13 + $0x87c] ss:$24 sps:$4 sm:$0xff]  }
 0x48b   :  { %4518 = vmatpush1.bf16.msra.mxu1 %v6844_v23  ;;  %4641 = vmatpush1.bf16.msra.mxu0 %v6847_v25  ;;  %v6918_v23 = vld [vmem:[#allocation13 + $0x634] ss:$24 sps:$4 sm:$0xff]  }
 0x48c   :  { %4519 = vmatprep.subr.bf16.mxu1 %v6852_v33  ;;  %4642 = vmatprep.subr.bf16.mxu0 %v6855_v27  ;;  %v6921_v25 = vld [vmem:[#allocation13 + $0x63c] ss:$24 sps:$4 sm:$0xff]   ;;  %v6927_v27 = vld [vmem:[#allocation13 + $0x66c] ss:$24 sps:$4 sm:$0xff]  }
 0x48d   :  { %v6924_v33 = vld [vmem:[#allocation13 + $0x664] ss:$24 sps:$4 sm:$0xff]  }
 0x48f   :  { %4520 = vmatpush1.bf16.msra.mxu1 %v6850_v42  ;;  %4643 = vmatpush1.bf16.msra.mxu0 %v6853_v30  ;;  %v6922_v42 = vld [vmem:[#allocation13 + $0x660] ss:$24 sps:$4 sm:$0xff]  }
 0x490   :  { %4521 = vmatprep.subr.bf16.mxu1 %v6858_v32  ;;  %4644 = vmatprep.subr.bf16.mxu0 %v6861_v34  ;;  %v6925_v30 = vld [vmem:[#allocation13 + $0x668] ss:$24 sps:$4 sm:$0xff]   ;;  %v6930_v32 = vld [vmem:[#allocation13 + $0x694] ss:$24 sps:$4 sm:$0xff]  }
 0x491   :  { %v6933_v34 = vld [vmem:[#allocation13 + $0x69c] ss:$24 sps:$4 sm:$0xff]  }
 0x493   :  { %4522 = vmatpush1.bf16.msra.mxu1 %v6856_v46  ;;  %4645 = vmatpush1.bf16.msra.mxu0 %v6859_v51  ;;  %v6928_v46 = vld [vmem:[#allocation13 + $0x690] ss:$24 sps:$4 sm:$0xff]  }
 0x494   :  { %4523 = vmatprep.subr.bf16.mxu1 %v6864_v28  ;;  %4646 = vmatprep.subr.bf16.mxu0 %v6867_v29  ;;  %v6931_v51 = vld [vmem:[#allocation13 + $0x698] ss:$24 sps:$4 sm:$0xff]   ;;  %v6936_v28 = vld [vmem:[#allocation13 + $0x6c4] ss:$24 sps:$4 sm:$0xff]  }
 0x495   :  { %v6939_v29 = vld [vmem:[#allocation13 + $0x6cc] ss:$24 sps:$4 sm:$0xff]  }
 0x497   :  { %4524 = vmatpush1.bf16.msra.mxu1 %v6862_v41  ;;  %4647 = vmatpush1.bf16.msra.mxu0 %v6865_v38  ;;  %v6934_v41 = vld [vmem:[#allocation13 + $0x6c0] ss:$24 sps:$4 sm:$0xff]  }
 0x498   :  { %4525 = vmatprep.subr.bf16.mxu1 %v6870_v52  ;;  %4648 = vmatprep.subr.bf16.mxu0 %v6873_v54  ;;  %v6937_v38 = vld [vmem:[#allocation13 + $0x6c8] ss:$24 sps:$4 sm:$0xff]   ;;  %v6942_v52 = vld [vmem:[#allocation13 + $0x6f4] ss:$24 sps:$4 sm:$0xff]  }
 0x499   :  { %v6945_v54 = vld [vmem:[#allocation13 + $0x6fc] ss:$24 sps:$4 sm:$0xff]  }
 0x49b   :  { %4526 = vmatpush1.bf16.msra.mxu1 %v6868_v55  ;;  %4649 = vmatpush1.bf16.msra.mxu0 %v6871_v62  ;;  %v6940_v55 = vld [vmem:[#allocation13 + $0x6f0] ss:$24 sps:$4 sm:$0xff]  }
 0x49c   :  { %4527 = vmatprep.subr.bf16.mxu1 %v6876_v56  ;;  %4650 = vmatprep.subr.bf16.mxu0 %v6879_v57  ;;  %v6943_v62 = vld [vmem:[#allocation13 + $0x6f8] ss:$24 sps:$4 sm:$0xff]   ;;  %v6948_v56 = vld [vmem:[#allocation13 + $0x724] ss:$24 sps:$4 sm:$0xff]  }
 0x49d   :  { %v6951_v57 = vld [vmem:[#allocation13 + $0x72c] ss:$24 sps:$4 sm:$0xff]  }
 0x49f   :  { %4528 = vmatpush1.bf16.msra.mxu1 %v6874_v59  ;;  %4651 = vmatpush1.bf16.msra.mxu0 %v6877_v60  ;;  %v6946_v59 = vld [vmem:[#allocation13 + $0x720] ss:$24 sps:$4 sm:$0xff]  }
 0x4a0   :  { %4529 = vmatprep.subr.bf16.mxu1 %v6882_v39  ;;  %4652 = vmatprep.subr.bf16.mxu0 %v6885_v24  ;;  %v6949_v60 = vld [vmem:[#allocation13 + $0x728] ss:$24 sps:$4 sm:$0xff]   ;;  %v6954_v39 = vld [vmem:[#allocation13 + $0x754] ss:$24 sps:$4 sm:$0xff]  }
 0x4a1   :  { %v6957_v24 = vld [vmem:[#allocation13 + $0x75c] ss:$24 sps:$4 sm:$0xff]  }
 0x4a3   :  { %4530 = vmatpush1.bf16.msra.mxu1 %v6880_v37  ;;  %4653 = vmatpush1.bf16.msra.mxu0 %v6883_v48  ;;  %v6952_v37 = vld [vmem:[#allocation13 + $0x750] ss:$24 sps:$4 sm:$0xff]  }
 0x4a4   :  { %4531 = vmatprep.subr.bf16.mxu1 %v6888_v13  ;;  %4654 = vmatprep.subr.bf16.mxu0 %v6891_v49  ;;  %v6955_v48 = vld [vmem:[#allocation13 + $0x758] ss:$24 sps:$4 sm:$0xff]   ;;  %v6960_v13 = vld [vmem:[#allocation13 + $0x784] ss:$24 sps:$4 sm:$0xff]  }
 0x4a5   :  { %v6963_v49 = vld [vmem:[#allocation13 + $0x78c] ss:$24 sps:$4 sm:$0xff]  }
 0x4a7   :  { %4532 = vmatpush1.bf16.msra.mxu1 %v6886_v61  ;;  %4655 = vmatpush1.bf16.msra.mxu0 %v6889_v58  ;;  %v6958_v61 = vld [vmem:[#allocation13 + $0x780] ss:$24 sps:$4 sm:$0xff]  }
 0x4a8   :  { %4533 = vmatprep.subr.bf16.mxu1 %v6894_v63  ;;  %4656 = vmatprep.subr.bf16.mxu0 %v6897_v2  ;;  %v6961_v58 = vld [vmem:[#allocation13 + $0x788] ss:$24 sps:$4 sm:$0xff]   ;;  %v6966_v63 = vld [vmem:[#allocation13 + $0x7b4] ss:$24 sps:$4 sm:$0xff]  }
 0x4a9   :  { %v6969_v2 = vld [vmem:[#allocation13 + $0x7bc] ss:$24 sps:$4 sm:$0xff]  }
 0x4ab   :  { %4534 = vmatpush1.bf16.msra.mxu1 %v6892_v3  ;;  %4657 = vmatpush1.bf16.msra.mxu0 %v6895_v4  ;;  %v6964_v3 = vld [vmem:[#allocation13 + $0x7b0] ss:$24 sps:$4 sm:$0xff]  }
 0x4ac   :  { %4535 = vmatprep.subr.bf16.mxu1 %v6900_v5  ;;  %4658 = vmatprep.subr.bf16.mxu0 %v6903_v6  ;;  %v6967_v4 = vld [vmem:[#allocation13 + $0x7b8] ss:$24 sps:$4 sm:$0xff]   ;;  %v6972_v5 = vld [vmem:[#allocation13 + $0x7e4] ss:$24 sps:$4 sm:$0xff]  }
 0x4ad   :  { %v6975_v6 = vld [vmem:[#allocation13 + $0x7ec] ss:$24 sps:$4 sm:$0xff]  }
 0x4af   :  { %4536 = vmatpush1.bf16.msra.mxu1 %v6898_v8  ;;  %4659 = vmatpush1.bf16.msra.mxu0 %v6901_v10  ;;  %v6970_v8 = vld [vmem:[#allocation13 + $0x7e0] ss:$24 sps:$4 sm:$0xff]  }
 0x4b0   :  { %4537 = vmatprep.subr.bf16.mxu1 %v6906_v11  ;;  %4660 = vmatprep.subr.bf16.mxu0 %v6909_v12  ;;  %v6973_v10 = vld [vmem:[#allocation13 + $0x7e8] ss:$24 sps:$4 sm:$0xff]   ;;  %v6978_v11 = vld [vmem:[#allocation13 + $0x814] ss:$24 sps:$4 sm:$0xff]  }
 0x4b1   :  { %v6981_v12 = vld [vmem:[#allocation13 + $0x81c] ss:$24 sps:$4 sm:$0xff]  }
 0x4b3   :  { %4538 = vmatpush1.bf16.msra.mxu1 %v6904_v15  ;;  %4661 = vmatpush1.bf16.msra.mxu0 %v6907_v16  ;;  %v6984_v15 = vld [vmem:[#allocation13 + $0x844] ss:$24 sps:$4 sm:$0xff]  }
 0x4b4   :  { %4548 = vmatprep.subr.bf16.mxu1 %v6912_v44  ;;  %4671 = vmatprep.subr.bf16.mxu0 %v6915_v45  ;;  %v6987_v16 = vld [vmem:[#allocation13 + $0x84c] ss:$24 sps:$4 sm:$0xff]   ;;  %v6982_v44 = vld [vmem:[#allocation13 + $0x840] ss:$24 sps:$4 sm:$0xff]  }
 0x4b5   :  { %v6985_v45 = vld [vmem:[#allocation13 + $0x848] ss:$24 sps:$4 sm:$0xff]  }
 0x4b6   :  { %4540 = vmatmul.mubr.bf16.vlgmr.msra.gmra.mrb[4].mxu1 %v7988_v19  ;;  %4663 = vmatmul.mubr.bf16.vlgmr.msra.gmra.mrb[8].mxu0 %v7988_v19 }
 0x4b7   :  { %4549 = vmatpush1.bf16.msra.mxu1 %v6910_v22  ;;  %4580 = vmatprep.mubr.bf16.mxu1 %v7990_v21  ;;  %v6988_v22 = vld [vmem:[#allocation13 + $0x870] ss:$24 sps:$4 sm:$0xff]  }
 0x4b8   :  { %4672 = vmatpush1.bf16.msra.mxu0 %v6913_v20  ;;  %4703 = vmatprep.mubr.bf16.mxu0 %v7990_v21  ;;  %v6991_v20 = vld [vmem:[#allocation13 + $0x878] ss:$24 sps:$4 sm:$0xff]  }
 0x4b9   :  { %4550 = vmatprep.subr.bf16.mxu1 %v6918_v23  ;;  %4673 = vmatprep.subr.bf16.mxu0 %v6921_v25  ;;  %v6996_v23 = vld [vmem:[#allocation13 + $0x8a4] ss:$24 sps:$4 sm:$0xff]  }
 0x4ba   :  { %v6999_v25 = vld [vmem:[#allocation13 + $0x8ac] ss:$24 sps:$4 sm:$0xff]  }
 0x4bb   :  { %4551 = vmatpush1.bf16.msra.mxu1 %v6916_v40  ;;  %v6994_v40 = vld [vmem:[#allocation13 + $0x8a0] ss:$24 sps:$4 sm:$0xff]  }
 0x4bc   :  { %4674 = vmatpush1.bf16.msra.mxu0 %v6919_v53  ;;  %4552 = vmatprep.subr.bf16.mxu1 %v6924_v33  ;;  %v6997_v53 = vld [vmem:[#allocation13 + $0x8a8] ss:$24 sps:$4 sm:$0xff]   ;;  %v7002_v33 = vld [vmem:[#allocation13 + $0x8d4] ss:$24 sps:$4 sm:$0xff]  }
 0x4bd   :  { %4675 = vmatprep.subr.bf16.mxu0 %v6927_v27  ;;  %v7005_v27 = vld [vmem:[#allocation13 + $0x8dc] ss:$24 sps:$4 sm:$0xff]  }
 0x4bf   :  { %4553 = vmatpush1.bf16.msra.mxu1 %v6922_v42  ;;  %v2692_v42 = vmul.f32 0.01, %v7968_v50 }
 0x4c0   :  { %4676 = vmatpush1.bf16.msra.mxu0 %v6925_v30  ;;  %4554 = vmatprep.subr.bf16.mxu1 %v6930_v32  ;;  %v7000_v30 = vld [vmem:[#allocation13 + $0x8d0] ss:$24 sps:$4 sm:$0xff]  }
 0x4c1   :  { %4677 = vmatprep.subr.bf16.mxu0 %v6933_v34  ;;  %v7003_v32 = vld [vmem:[#allocation13 + $0x8d8] ss:$24 sps:$4 sm:$0xff]   ;;  %v7008_v34 = vld [vmem:[#allocation13 + $0x14] ss:$24 sps:$4 sm:$0xff]  }
 0x4c3   :  { %4555 = vmatpush1.bf16.msra.mxu1 %v6928_v46  ;;  %v2698_v46 = vsel %vm2686_vm5, %v7968_v50, %v2692_v42  ;;  %v7017_v50 = vld [vmem:[#allocation13 + $0xa4] ss:$24 sps:$4 sm:$0xff]   ;;  %v7081_v42 = vld [vmem:[#allocation13 + $0x4c0] ss:$24 sps:$4 sm:$0xff]  }
 0x4c4   :  { %4678 = vmatpush1.bf16.msra.mxu0 %v6931_v51  ;;  %4556 = vmatprep.subr.bf16.mxu1 %v6936_v28  ;;  %v7006_v51 = vld [vmem:[#allocation13 + $0x10] ss:$24 sps:$4 sm:$0xff]   ;;  %v7999_v28 = vpack.c.bf16 %v2698_v46, %v2698_v46  ;;  %v7087_v46 = vld [vmem:[#allocation13 + $0x520] ss:$24 sps:$4 sm:$0xff]  }
 0x4c5   :  { %4679 = vmatprep.subr.bf16.mxu0 %v6939_v29  ;;  %v7011_v29 = vld [vmem:[#allocation13 + $0x44] ss:$24 sps:$4 sm:$0xff]  }
 0x4c7   :  { %4557 = vmatpush1.bf16.msra.mxu1 %v6934_v41  ;;  %v7009_v41 = vld [vmem:[#allocation13 + $0x40] ss:$24 sps:$4 sm:$0xff]  }
 0x4c8   :  { %4680 = vmatpush1.bf16.msra.mxu0 %v6937_v38  ;;  %4558 = vmatprep.subr.bf16.mxu1 %v6942_v52  ;;  %v7014_v38 = vld [vmem:[#allocation13 + $0x74] ss:$24 sps:$4 sm:$0xff]   ;;  %v7012_v52 = vld [vmem:[#allocation13 + $0x70] ss:$24 sps:$4 sm:$0xff]  }
 0x4c9   :  { %4681 = vmatprep.subr.bf16.mxu0 %v6945_v54  ;;  %v7015_v54 = vld [vmem:[#allocation13 + $0xa0] ss:$24 sps:$4 sm:$0xff]  }
 0x4cb   :  { %4559 = vmatpush1.bf16.msra.mxu1 %v6940_v55  ;;  %v7020_v55 = vld [vmem:[#allocation13 + $0xd4] ss:$24 sps:$4 sm:$0xff]  }
 0x4cc   :  { %4682 = vmatpush1.bf16.msra.mxu0 %v6943_v62  ;;  %4560 = vmatprep.subr.bf16.mxu1 %v6948_v56  ;;  %v7018_v62 = vld [vmem:[#allocation13 + $0xd0] ss:$24 sps:$4 sm:$0xff]   ;;  %v7023_v56 = vld [vmem:[#allocation13 + $0x104] ss:$24 sps:$4 sm:$0xff]  }
 0x4cd   :  { %4683 = vmatprep.subr.bf16.mxu0 %v6951_v57  ;;  %v7021_v57 = vld [vmem:[#allocation13 + $0x100] ss:$24 sps:$4 sm:$0xff]  }
 0x4cf   :  { %4561 = vmatpush1.bf16.msra.mxu1 %v6946_v59  ;;  %v7026_v59 = vld [vmem:[#allocation13 + $0x134] ss:$24 sps:$4 sm:$0xff]  }
 0x4d0   :  { %4684 = vmatpush1.bf16.msra.mxu0 %v6949_v60  ;;  %4562 = vmatprep.subr.bf16.mxu1 %v6954_v39  ;;  %v7029_v60 = vld [vmem:[#allocation13 + $0x164] ss:$24 sps:$4 sm:$0xff]   ;;  %v7027_v39 = vld [vmem:[#allocation13 + $0x160] ss:$24 sps:$4 sm:$0xff]  }
 0x4d1   :  { %4685 = vmatprep.subr.bf16.mxu0 %v6957_v24  ;;  %v7032_v24 = vld [vmem:[#allocation13 + $0x194] ss:$24 sps:$4 sm:$0xff]  }
 0x4d3   :  { %4563 = vmatpush1.bf16.msra.mxu1 %v6952_v37  ;;  %v7030_v37 = vld [vmem:[#allocation13 + $0x190] ss:$24 sps:$4 sm:$0xff]  }
 0x4d4   :  { %4686 = vmatpush1.bf16.msra.mxu0 %v6955_v48  ;;  %4564 = vmatprep.subr.bf16.mxu1 %v6960_v13  ;;  %v7035_v48 = vld [vmem:[#allocation13 + $0x1c4] ss:$24 sps:$4 sm:$0xff]   ;;  %v7033_v13 = vld [vmem:[#allocation13 + $0x1c0] ss:$24 sps:$4 sm:$0xff]  }
 0x4d5   :  { %4687 = vmatprep.subr.bf16.mxu0 %v6963_v49  ;;  %v7038_v49 = vld [vmem:[#allocation13 + $0x1f4] ss:$24 sps:$4 sm:$0xff]  }
 0x4d7   :  { %4565 = vmatpush1.bf16.msra.mxu1 %v6958_v61  ;;  %v7036_v61 = vld [vmem:[#allocation13 + $0x1f0] ss:$24 sps:$4 sm:$0xff]  }
 0x4d8   :  { %4688 = vmatpush1.bf16.msra.mxu0 %v6961_v58  ;;  %4566 = vmatprep.subr.bf16.mxu1 %v6966_v63  ;;  %v7041_v58 = vld [vmem:[#allocation13 + $0x224] ss:$24 sps:$4 sm:$0xff]   ;;  %v7039_v63 = vld [vmem:[#allocation13 + $0x220] ss:$24 sps:$4 sm:$0xff]  }
 0x4d9   :  { %4689 = vmatprep.subr.bf16.mxu0 %v6969_v2  ;;  %v7044_v2 = vld [vmem:[#allocation13 + $0x254] ss:$24 sps:$4 sm:$0xff]  }
 0x4db   :  { %4567 = vmatpush1.bf16.msra.mxu1 %v6964_v3  ;;  %v7042_v3 = vld [vmem:[#allocation13 + $0x250] ss:$24 sps:$4 sm:$0xff]  }
 0x4dc   :  { %4690 = vmatpush1.bf16.msra.mxu0 %v6967_v4  ;;  %4568 = vmatprep.subr.bf16.mxu1 %v6972_v5  ;;  %v7047_v4 = vld [vmem:[#allocation13 + $0x284] ss:$24 sps:$4 sm:$0xff]   ;;  %v7045_v5 = vld [vmem:[#allocation13 + $0x280] ss:$24 sps:$4 sm:$0xff]  }
 0x4dd   :  { %4691 = vmatprep.subr.bf16.mxu0 %v6975_v6  ;;  %v7050_v6 = vld [vmem:[#allocation13 + $0x2b4] ss:$24 sps:$4 sm:$0xff]  }
 0x4df   :  { %4569 = vmatpush1.bf16.msra.mxu1 %v6970_v8  ;;  %v7048_v8 = vld [vmem:[#allocation13 + $0x2b0] ss:$24 sps:$4 sm:$0xff]  }
 0x4e0   :  { %4692 = vmatpush1.bf16.msra.mxu0 %v6973_v10  ;;  %4570 = vmatprep.subr.bf16.mxu1 %v6978_v11  ;;  %v7053_v10 = vld [vmem:[#allocation13 + $0x2e4] ss:$24 sps:$4 sm:$0xff]   ;;  %v7051_v11 = vld [vmem:[#allocation13 + $0x2e0] ss:$24 sps:$4 sm:$0xff]  }
 0x4e1   :  { %4693 = vmatprep.subr.bf16.mxu0 %v6981_v12  ;;  %v7056_v12 = vld [vmem:[#allocation13 + $0x314] ss:$24 sps:$4 sm:$0xff]  }
 0x4e3   :  { %4571 = vmatpush1.bf16.msra.mxu1 %v6976_v14  ;;  %v7054_v14 = vld [vmem:[#allocation13 + $0x310] ss:$24 sps:$4 sm:$0xff]  }
 0x4e4   :  { %4694 = vmatpush1.bf16.msra.mxu0 %v6979_v9  ;;  %4572 = vmatprep.subr.bf16.mxu1 %v6984_v15  ;;  %v7059_v9 = vld [vmem:[#allocation13 + $0x344] ss:$24 sps:$4 sm:$0xff]   ;;  %v7057_v15 = vld [vmem:[#allocation13 + $0x340] ss:$24 sps:$4 sm:$0xff]  }
 0x4e5   :  { %4695 = vmatprep.subr.bf16.mxu0 %v6987_v16  ;;  %v7062_v16 = vld [vmem:[#allocation13 + $0x374] ss:$24 sps:$4 sm:$0xff]  }
 0x4e7   :  { %4573 = vmatpush1.bf16.msra.mxu1 %v6982_v44  ;;  %v7060_v44 = vld [vmem:[#allocation13 + $0x370] ss:$24 sps:$4 sm:$0xff]  }
 0x4e8   :  { %4696 = vmatpush1.bf16.msra.mxu0 %v6985_v45  ;;  %4574 = vmatprep.subr.bf16.mxu1 %v6990_v17  ;;  %v7065_v45 = vld [vmem:[#allocation13 + $0x3a4] ss:$24 sps:$4 sm:$0xff]   ;;  %v7063_v17 = vld [vmem:[#allocation13 + $0x3a0] ss:$24 sps:$4 sm:$0xff]  }
 0x4e9   :  { %4697 = vmatprep.subr.bf16.mxu0 %v6993_v18  ;;  %v7068_v18 = vld [vmem:[#allocation13 + $0x3d4] ss:$24 sps:$4 sm:$0xff]  }
 0x4eb   :  { %4575 = vmatpush1.bf16.msra.mxu1 %v6988_v22  ;;  %v7066_v22 = vld [vmem:[#allocation13 + $0x3d0] ss:$24 sps:$4 sm:$0xff]  }
 0x4ec   :  { %4698 = vmatpush1.bf16.msra.mxu0 %v6991_v20  ;;  %4576 = vmatprep.subr.bf16.mxu1 %v6996_v23  ;;  %v7071_v20 = vld [vmem:[#allocation13 + $0x404] ss:$24 sps:$4 sm:$0xff]   ;;  %v7074_v23 = vld [vmem:[#allocation13 + $0x434] ss:$24 sps:$4 sm:$0xff]  }
 0x4ed   :  { %4699 = vmatprep.subr.bf16.mxu0 %v6999_v25  ;;  %v7077_v25 = vld [vmem:[#allocation13 + $0x464] ss:$24 sps:$4 sm:$0xff]  }
 0x4ef   :  { %4577 = vmatpush1.bf16.msra.mxu1 %v6994_v40  ;;  %v7075_v40 = vld [vmem:[#allocation13 + $0x460] ss:$24 sps:$4 sm:$0xff]  }
 0x4f0   :  { %4700 = vmatpush1.bf16.msra.mxu0 %v6997_v53  ;;  %4578 = vmatprep.subr.bf16.mxu1 %v7002_v33  ;;  %v7080_v53 = vld [vmem:[#allocation13 + $0x494] ss:$24 sps:$4 sm:$0xff]   ;;  %v7078_v33 = vld [vmem:[#allocation13 + $0x490] ss:$24 sps:$4 sm:$0xff]  }
 0x4f1   :  { %4701 = vmatprep.subr.bf16.mxu0 %v7005_v27  ;;  %v7083_v27 = vld [vmem:[#allocation13 + $0x4c4] ss:$24 sps:$4 sm:$0xff]  }
 0x4f3   :  { %4579 = vmatpush1.bf16.msra.mxu1 %v7000_v30  ;;  %v7086_v30 = vld [vmem:[#allocation13 + $0x4f4] ss:$24 sps:$4 sm:$0xff]  }
 0x4f4   :  { %4702 = vmatpush1.bf16.msra.mxu0 %v7003_v32  ;;  %4712 = vmatprep.subr.bf16.mxu1 %v7008_v34  ;;  %v7084_v32 = vld [vmem:[#allocation13 + $0x4f0] ss:$24 sps:$4 sm:$0xff]   ;;  %v7089_v34 = vld [vmem:[#allocation13 + $0x524] ss:$24 sps:$4 sm:$0xff]  }
 0x4f6   :  { %4581 = vmatmul.mubr.bf16.vlgmr.msra.gmra.mrb[4].mxu1 %v7999_v28 }
 0x4f7   :  { %4704 = vmatmul.mubr.bf16.vlgmr.msra.gmra.mrb[8].mxu0 %v7999_v28  ;;  %4713 = vmatpush1.bf16.msra.mxu1 %v7006_v51  ;;  %v7092_v51 = vld [vmem:[#allocation13 + $0x554] ss:$24 sps:$4 sm:$0xff]  }
 0x4f8   :  { %4744 = vmatprep.mubr.bf16.mxu1 %v7970_v0  ;;  %4714 = vmatprep.subr.bf16.mxu1 %v7011_v29  ;;  %v7024_v0 = vld [vmem:[#allocation13 + $0x130] ss:$24 sps:$4 sm:$0xff]  }
 0x4f9   :  { %v7090_v29 = vld [vmem:[#allocation13 + $0x550] ss:$24 sps:$4 sm:$0xff]  }
 0x4fb   :  { %4715 = vmatpush1.bf16.msra.mxu1 %v7009_v41  ;;  %v7095_v41 = vld [vmem:[#allocation13 + $0x584] ss:$24 sps:$4 sm:$0xff]  }
 0x4fc   :  { %4716 = vmatprep.subr.bf16.mxu1 %v7014_v38  ;;  %v7093_v38 = vld [vmem:[#allocation13 + $0x580] ss:$24 sps:$4 sm:$0xff]  }
 0x4ff   :  { %4717 = vmatpush1.bf16.msra.mxu1 %v7012_v52  ;;  %v7098_v52 = vld [vmem:[#allocation13 + $0x5b4] ss:$24 sps:$4 sm:$0xff]  }
 0x500   :  { %4718 = vmatprep.subr.bf16.mxu1 %v7017_v50  ;;  %v7096_v50 = vld [vmem:[#allocation13 + $0x5b0] ss:$24 sps:$4 sm:$0xff]  }
 0x503   :  { %4719 = vmatpush1.bf16.msra.mxu1 %v7015_v54  ;;  %v7101_v54 = vld [vmem:[#allocation13 + $0x5e4] ss:$24 sps:$4 sm:$0xff]  }
 0x504   :  { %4720 = vmatprep.subr.bf16.mxu1 %v7020_v55  ;;  %v7099_v55 = vld [vmem:[#allocation13 + $0x5e0] ss:$24 sps:$4 sm:$0xff]  }
 0x507   :  { %4721 = vmatpush1.bf16.msra.mxu1 %v7018_v62  ;;  %v7104_v62 = vld [vmem:[#allocation13 + $0x614] ss:$24 sps:$4 sm:$0xff]  }
 0x508   :  { %4722 = vmatprep.subr.bf16.mxu1 %v7023_v56  ;;  %v7102_v56 = vld [vmem:[#allocation13 + $0x610] ss:$24 sps:$4 sm:$0xff]  }
 0x50b   :  { %4723 = vmatpush1.bf16.msra.mxu1 %v7021_v57  ;;  %v7107_v57 = vld [vmem:[#allocation13 + $0x644] ss:$24 sps:$4 sm:$0xff]  }
 0x50c   :  { %4724 = vmatprep.subr.bf16.mxu1 %v7026_v59  ;;  %v7105_v59 = vld [vmem:[#allocation13 + $0x640] ss:$24 sps:$4 sm:$0xff]  }
 0x50f   :  { %4725 = vmatpush1.bf16.msra.mxu1 %v7024_v0  ;;  %v7110_v0 = vld [vmem:[#allocation13 + $0x674] ss:$24 sps:$4 sm:$0xff]  }
 0x510   :  { %4726 = vmatprep.subr.bf16.mxu1 %v7029_v60  ;;  %v7108_v60 = vld [vmem:[#allocation13 + $0x670] ss:$24 sps:$4 sm:$0xff]  }
 0x513   :  { %4727 = vmatpush1.bf16.msra.mxu1 %v7027_v39  ;;  %v7113_v39 = vld [vmem:[#allocation13 + $0x6a4] ss:$24 sps:$4 sm:$0xff]  }
 0x514   :  { %4728 = vmatprep.subr.bf16.mxu1 %v7032_v24  ;;  %v7111_v24 = vld [vmem:[#allocation13 + $0x6a0] ss:$24 sps:$4 sm:$0xff]  }
 0x517   :  { %4729 = vmatpush1.bf16.msra.mxu1 %v7030_v37  ;;  %v7116_v37 = vld [vmem:[#allocation13 + $0x6d4] ss:$24 sps:$4 sm:$0xff]  }
 0x518   :  { %4730 = vmatprep.subr.bf16.mxu1 %v7035_v48  ;;  %v7114_v48 = vld [vmem:[#allocation13 + $0x6d0] ss:$24 sps:$4 sm:$0xff]  }
 0x51b   :  { %4731 = vmatpush1.bf16.msra.mxu1 %v7033_v13  ;;  %v7119_v13 = vld [vmem:[#allocation13 + $0x704] ss:$24 sps:$4 sm:$0xff]  }
 0x51c   :  { %4732 = vmatprep.subr.bf16.mxu1 %v7038_v49  ;;  %v7122_v49 = vld [vmem:[#allocation13 + $0x734] ss:$24 sps:$4 sm:$0xff]  }
 0x51f   :  { %4733 = vmatpush1.bf16.msra.mxu1 %v7036_v61  ;;  %v7125_v61 = vld [vmem:[#allocation13 + $0x764] ss:$24 sps:$4 sm:$0xff]  }
 0x520   :  { %4734 = vmatprep.subr.bf16.mxu1 %v7041_v58  ;;  %v7123_v58 = vld [vmem:[#allocation13 + $0x760] ss:$24 sps:$4 sm:$0xff]  }
 0x523   :  { %4735 = vmatpush1.bf16.msra.mxu1 %v7039_v63  ;;  %v7128_v63 = vld [vmem:[#allocation13 + $0x794] ss:$24 sps:$4 sm:$0xff]  }
 0x524   :  { %4736 = vmatprep.subr.bf16.mxu1 %v7044_v2  ;;  %v7126_v2 = vld [vmem:[#allocation13 + $0x790] ss:$24 sps:$4 sm:$0xff]  }
 0x527   :  { %4737 = vmatpush1.bf16.msra.mxu1 %v7042_v3  ;;  %v7131_v3 = vld [vmem:[#allocation13 + $0x7c4] ss:$24 sps:$4 sm:$0xff]  }
 0x528   :  { %4738 = vmatprep.subr.bf16.mxu1 %v7047_v4  ;;  %v7129_v4 = vld [vmem:[#allocation13 + $0x7c0] ss:$24 sps:$4 sm:$0xff]  }
 0x52b   :  { %4739 = vmatpush1.bf16.msra.mxu1 %v7045_v5  ;;  %v7134_v5 = vld [vmem:[#allocation13 + $0x7f4] ss:$24 sps:$4 sm:$0xff]  }
 0x52c   :  { %4740 = vmatprep.subr.bf16.mxu1 %v7050_v6  ;;  %v7132_v6 = vld [vmem:[#allocation13 + $0x7f0] ss:$24 sps:$4 sm:$0xff]  }
 0x52f   :  { %4741 = vmatpush1.bf16.msra.mxu1 %v7048_v8  ;;  %v7137_v8 = vld [vmem:[#allocation13 + $0x824] ss:$24 sps:$4 sm:$0xff]  }
 0x530   :  { %4742 = vmatprep.subr.bf16.mxu1 %v7053_v10  ;;  %v7135_v10 = vld [vmem:[#allocation13 + $0x820] ss:$24 sps:$4 sm:$0xff]  }
 0x533   :  { %4743 = vmatpush1.bf16.msra.mxu1 %v7051_v11  ;;  %v7140_v11 = vld [vmem:[#allocation13 + $0x854] ss:$24 sps:$4 sm:$0xff]  }
 0x534   :  { %4753 = vmatprep.subr.bf16.mxu1 %v7056_v12  ;;  %v7138_v12 = vld [vmem:[#allocation13 + $0x850] ss:$24 sps:$4 sm:$0xff]  }
 0x536   :  { %4745 = vmatmul.mubr.bf16.vlgmr.msra.gmra.mrb[8].mxu1 %v7972_v1  ;;  %v7069_v1 = vld [vmem:[#allocation13 + $0x400] ss:$24 sps:$4 sm:$0xff]  }
 0x537   :  { %4754 = vmatpush1.bf16.msra.mxu1 %v7054_v14  ;;  %4785 = vmatprep.mubr.bf16.mxu1 %v7978_v7  ;;  %v7072_v7 = vld [vmem:[#allocation13 + $0x430] ss:$24 sps:$4 sm:$0xff]   ;;  %v7143_v14 = vld [vmem:[#allocation13 + $0x884] ss:$24 sps:$4 sm:$0xff]  }
 0x538   :  { %4755 = vmatprep.subr.bf16.mxu1 %v7059_v9  ;;  %v7141_v9 = vld [vmem:[#allocation13 + $0x880] ss:$24 sps:$4 sm:$0xff]  }
 0x53b   :  { %4756 = vmatpush1.bf16.msra.mxu1 %v7057_v15  ;;  %v7146_v15 = vld [vmem:[#allocation13 + $0x8b4] ss:$24 sps:$4 sm:$0xff]  }
 0x53c   :  { %4757 = vmatprep.subr.bf16.mxu1 %v7062_v16  ;;  %v7144_v16 = vld [vmem:[#allocation13 + $0x8b0] ss:$24 sps:$4 sm:$0xff]  }
 0x53f   :  { %4758 = vmatpush1.bf16.msra.mxu1 %v7060_v44  ;;  %v7149_v44 = vld [vmem:[#allocation13 + $0x8e4] ss:$24 sps:$4 sm:$0xff]  }
 0x540   :  { %4759 = vmatprep.subr.bf16.mxu1 %v7065_v45  ;;  %v7147_v45 = vld [vmem:[#allocation13 + $0x8e0] ss:$24 sps:$4 sm:$0xff]  }
 0x543   :  { %4760 = vmatpush1.bf16.msra.mxu1 %v7063_v17 }
 0x544   :  { %4761 = vmatprep.subr.bf16.mxu1 %v7068_v18 }
 0x547   :  { %4762 = vmatpush1.bf16.msra.mxu1 %v7066_v22 }
 0x548   :  { %4763 = vmatprep.subr.bf16.mxu1 %v7071_v20 }
 0x54b   :  { %4764 = vmatpush1.bf16.msra.mxu1 %v7069_v1 }
 0x54c   :  { %4765 = vmatprep.subr.bf16.mxu1 %v7074_v23 }
 0x54f   :  { %4766 = vmatpush1.bf16.msra.mxu1 %v7072_v7 }
 0x550   :  { %4767 = vmatprep.subr.bf16.mxu1 %v7077_v25 }
 0x553   :  { %4768 = vmatpush1.bf16.msra.mxu1 %v7075_v40  ;;  %v2994_v40 = vld [vmem:[#allocation15] sm:$0x3f] }
 0x554   :  { %4769 = vmatprep.subr.bf16.mxu1 %v7080_v53  ;;  %v2999_v53 = vrot.slane %v2994_v40, %v7880_v26 }
 0x557   :  { %4770 = vmatpush1.bf16.msra.mxu1 %v7078_v33  ;;  %v3003_v33 = vrot.slane %v2994_v40, %v7882_v31 }
 0x558   :  { %4771 = vmatprep.subr.bf16.mxu1 %v7083_v27 }
 0x55b   :  { %4772 = vmatpush1.bf16.msra.mxu1 %v7081_v42 }
 0x55c   :  { %4773 = vmatprep.subr.bf16.mxu1 %v7086_v30  ;;  %v3007_v30 = vrot.slane %v2994_v40, %v7886_v43 }
 0x55f   :  { %4774 = vmatpush1.bf16.msra.mxu1 %v7084_v32 }
 0x560   :  { %4775 = vmatprep.subr.bf16.mxu1 %v7089_v34 }
 0x563   :  { %4776 = vmatpush1.bf16.msra.mxu1 %v7087_v46 }
 0x564   :  { %4777 = vmatprep.subr.bf16.mxu1 %v7092_v51  ;;  %v3015_v51 = vrot.slane %v2994_v40, %v7900_v35 }
 0x567   :  { %4778 = vmatpush1.bf16.msra.mxu1 %v7090_v29  ;;  %v3019_v29 = vrot.slane %v2994_v40, %v7902_v36 }
 0x568   :  { %4779 = vmatprep.subr.bf16.mxu1 %v7095_v41 }
 0x56b   :  { %4780 = vmatpush1.bf16.msra.mxu1 %v7093_v38 }
 0x56c   :  { %4781 = vmatprep.subr.bf16.mxu1 %v7098_v52 }
 0x56f   :  { %4782 = vmatpush1.bf16.msra.mxu1 %v7096_v50 }
 0x570   :  { %4783 = vmatprep.subr.bf16.mxu1 %v7101_v54 }
 0x573   :  { %4784 = vmatpush1.bf16.msra.mxu1 %v7099_v55 }
 0x574   :  { %4794 = vmatprep.subr.bf16.mxu1 %v7104_v62 }
 0x576   :  { %4786 = vmatmul.mubr.bf16.vlgmr.msra.gmra.mrb[8].mxu1 %v7988_v19  ;;  %v7117_v19 = vld [vmem:[#allocation13 + $0x700] ss:$24 sps:$4 sm:$0xff]  }
 0x577   :  { %4795 = vmatpush1.bf16.msra.mxu1 %v7102_v56  ;;  %4826 = vmatprep.mubr.bf16.mxu1 %v7990_v21  ;;  %v7120_v21 = vld [vmem:[#allocation13 + $0x730] ss:$24 sps:$4 sm:$0xff]  }
 0x578   :  { %4796 = vmatprep.subr.bf16.mxu1 %v7107_v57 }
 0x57b   :  { %4797 = vmatpush1.bf16.msra.mxu1 %v7105_v59 }
 0x57c   :  { %4798 = vmatprep.subr.bf16.mxu1 %v7110_v0  ;;  %v7150_v0 = vld [vmem:[#allocation19 + $0x40] sm:$0xff]  }
 0x57d   :  { %6140 = vmatprep.subr.bf16.mxu0 %v7150_v0 }
 0x57f   :  { %4799 = vmatpush1.bf16.msra.mxu1 %v7108_v60  ;;  %v7151_v60 = vld [vmem:[#allocation19] sm:$0xff]  }
 0x580   :  { %4800 = vmatprep.subr.bf16.mxu1 %v7113_v39  ;;  %v7152_v39 = vld [vmem:[#allocation19 + $0xc0] sm:$0xff]   ;;  %6141 = vmatpush3.bf16.msra.mxu0 %v7151_v60 }
 0x583   :  { %4801 = vmatpush1.bf16.msra.mxu1 %v7111_v24  ;;  %v7153_v24 = vld [vmem:[#allocation19 + $0x80] sm:$0xff]  }
 0x584   :  { %4802 = vmatprep.subr.bf16.mxu1 %v7116_v37  ;;  %v7154_v37 = vld [vmem:[#allocation19 + $0x48] sm:$0xff]  }
 0x585   :  { %6142 = vmatprep.subr.bf16.mxu0 %v7154_v37 }
 0x587   :  { %4803 = vmatpush1.bf16.msra.mxu1 %v7114_v48  ;;  %v7156_v48 = vld [vmem:[#allocation19 + $0xc8] sm:$0xff]  }
 0x588   :  { %4804 = vmatprep.subr.bf16.mxu1 %v7119_v13  ;;  %v7155_v13 = vld [vmem:[#allocation19 + $0x8] sm:$0xff]  }
 0x589   :  { %6143 = vmatpush3.bf16.msra.mxu0 %v7155_v13 }
 0x58b   :  { %4805 = vmatpush1.bf16.msra.mxu1 %v7117_v19 }
 0x58c   :  { %4806 = vmatprep.subr.bf16.mxu1 %v7122_v49 }
 0x58f   :  { %4807 = vmatpush1.bf16.msra.mxu1 %v7120_v21 }
 0x590   :  { %4808 = vmatprep.subr.bf16.mxu1 %v7125_v61 }
 0x593   :  { %4809 = vmatpush1.bf16.msra.mxu1 %v7123_v58 }
 0x594   :  { %4810 = vmatprep.subr.bf16.mxu1 %v7128_v63 }
 0x597   :  { %4811 = vmatpush1.bf16.msra.mxu1 %v7126_v2 }
 0x598   :  { %4812 = vmatprep.subr.bf16.mxu1 %v7131_v3 }
 0x59b   :  { %4813 = vmatpush1.bf16.msra.mxu1 %v7129_v4 }
 0x59c   :  { %4814 = vmatprep.subr.bf16.mxu1 %v7134_v5 }
 0x59f   :  { %4815 = vmatpush1.bf16.msra.mxu1 %v7132_v6 }
 0x5a0   :  { %4816 = vmatprep.subr.bf16.mxu1 %v7137_v8 }
 0x5a3   :  { %4817 = vmatpush1.bf16.msra.mxu1 %v7135_v10 }
 0x5a4   :  { %4818 = vmatprep.subr.bf16.mxu1 %v7140_v11 }
 0x5a7   :  { %4819 = vmatpush1.bf16.msra.mxu1 %v7138_v12 }
 0x5a8   :  { %4820 = vmatprep.subr.bf16.mxu1 %v7143_v14 }
 0x5ab   :  { %4821 = vmatpush1.bf16.msra.mxu1 %v7141_v9 }
 0x5ac   :  { %4822 = vmatprep.subr.bf16.mxu1 %v7146_v15 }
 0x5af   :  { %4823 = vmatpush1.bf16.msra.mxu1 %v7144_v16 }
 0x5b0   :  { %4824 = vmatprep.subr.bf16.mxu1 %v7149_v44  ;;  %v7157_v44 = vld [vmem:[#allocation19 + $0x88] sm:$0xff]  }
 0x5b3   :  { %4825 = vmatpush1.bf16.msra.mxu1 %v7147_v45  ;;  %v7158_v45 = vld [vmem:[#allocation19 + $0x50] sm:$0xff]  }
 0x5b4   :  { %6162 = vmatprep.subr.bf16.mxu1 %v7152_v39  ;;  %6144 = vmatprep.subr.bf16.mxu0 %v7158_v45 }
 0x5b6   :  { %4827 = vmatmul.mubr.bf16.vlgmr.msra.gmra.mrb[8].mxu1 %v7999_v28  ;;  %v3011_v28 = vrot.slane %v2994_v40, %v7893_v47  ;;  %v7168_v40 = vld [vmem:[#allocation19 + $0xe0] sm:$0xff]  }
 0x5b7   :  { %6163 = vmatpush3.bf16.msra.mxu1 %v7153_v24 }
 0x5b8   :  { %6164 = vmatprep.subr.bf16.mxu1 %v7156_v48 }
 0x5bb   :  { %6165 = vmatpush3.bf16.msra.mxu1 %v7157_v44 }
 0x5c9   :  { %v4582_v17 = vpop.f32.mrb[4].mxu1 }
 0x5ca   :  { %v4705_v18 = vpop.f32.mrb[8].mxu0  ;;  %v4584_v22 = vpop.f32.mrb[5].mxu1  ;;  %v6212_v27 = vadd.f32 %v4582_v17, %v2999_v53  ;;  %v7159_v17 = vld [vmem:[#allocation19 + $0x10] sm:$0xff]   ;;  %v7167_v53 = vld [vmem:[#allocation19 + $0x20] sm:$0xff]  }
 0x5cb   :  { %v4707_v20 = vpop.f32.mrb[9].mxu0  ;;  %v4586_v1 = vpop.f32.mrb[6].mxu1  ;;  %v6213_v42 = vadd.f32 %v4584_v22, %v3003_v33  ;;  %v6214_v34 = vadd.f32 %v4705_v18, %v3007_v30  ;;  %v7160_v18 = vld [vmem:[#allocation19 + $0xd0] sm:$0xff]   ;;  %6145 = vmatpush3.bf16.msra.mxu0 %v7159_v17  ;;  %v7169_v33 = vld [vmem:[#allocation19 + $0xa0] sm:$0xff]   ;;  %v7171_v30 = vld [vmem:[#allocation19 + $0x28] sm:$0xff]  }
 0x5cc   :  { %v4709_v23 = vpop.f32.mrb[10].mxu0  ;;  %v4587_v7 = vpop.f32.mrb[7].mxu1  ;;  %v6215_v41 = vadd.f32 %v4707_v20, %v3011_v28  ;;  %v7161_v22 = vld [vmem:[#allocation19 + $0x90] sm:$0xff]   ;;  %v7162_v20 = vld [vmem:[#allocation19 + $0x58] sm:$0xff]   ;;  %6166 = vmatprep.subr.bf16.mxu1 %v7160_v18 }
 0x5cd   :  { %v4710_v25 = vpop.f32.mrb[11].mxu0  ;;  %v4837_v32 = vadd.f32 %v6213_v42, %v6212_v27  ;;  %v7164_v1 = vld [vmem:[#allocation19 + $0xd8] sm:$0xff]   ;;  %6167 = vmatpush3.bf16.msra.mxu1 %v7161_v22  ;;  %6146 = vmatprep.subr.bf16.mxu0 %v7162_v20  ;;  %v7176_v28 = vld [vmem:[#allocation19 + $0xf0] sm:$0xff]  }
 0x5ce   :  { %v7163_v23 = vld [vmem:[#allocation19 + $0x18] sm:$0xff]   ;;  %v7166_v25 = vld [vmem:[#allocation19 + $0x60] sm:$0xff]   ;;  %6168 = vmatprep.subr.bf16.mxu1 %v7164_v1 }
 0x5cf   :  { %v4838_v46 = vadd.f32 %v6214_v34, %v4837_v32  ;;  %v7165_v7 = vld [vmem:[#allocation19 + $0x98] sm:$0xff]   ;;  %6147 = vmatpush3.bf16.msra.mxu0 %v7163_v23  ;;  %v7173_v32 = vld [vmem:[#allocation19 + $0xa8] sm:$0xff]   ;;  %v7183_v1 = vld [vmem:[#allocation19 + $0x100] sm:$0xff]  }
 0x5d0   :  { %6148 = vmatprep.subr.bf16.mxu0 %v7166_v25 }
 0x5d1   :  { %v4839_v52 = vadd.f32 %v6215_v41, %v4838_v46  ;;  %6169 = vmatpush3.bf16.msra.mxu1 %v7165_v7  ;;  %v7175_v46 = vld [vmem:[#allocation19 + $0x30] sm:$0xff]  }
 0x5d2   :  { %6170 = vmatprep.subr.bf16.mxu1 %v7168_v40  ;;  %v7184_v40 = vld [vmem:[#allocation19 + $0x148] sm:$0xff]  }
 0x5d3   :  { %6149 = vmatpush3.bf16.msra.mxu0 %v7167_v53 }
 0x5d5   :  { %6171 = vmatpush3.bf16.msra.mxu1 %v7169_v33  ;;  %v7185_v33 = vld [vmem:[#allocation19 + $0x108] sm:$0xff]  }
 0x689   :  { %v4828_v38 = vpop.f32.mrb[8].mxu1 }
 0x68a   :  { %v6216_v50 = vadd.f32 %v4828_v38, %v3015_v51  ;;  %v4830_v54 = vpop.f32.mrb[9].mxu1  ;;  %v7177_v51 = vld [vmem:[#allocation19 + $0xb0] sm:$0xff]   ;;  %v7179_v38 = vld [vmem:[#allocation19 + $0x38] sm:$0xff]  }
 0x68b   :  { %v6217_v55 = vadd.f32 %v4830_v54, %v3019_v29  ;;  %v4832_v62 = vpop.f32.mrb[10].mxu1  ;;  %v7178_v29 = vld [vmem:[#allocation19 + $0x78] sm:$0xff]  }
 0x68c   :  { %v4833_v56 = vpop.f32.mrb[11].mxu1  ;;  %v4840_v57 = vadd.f32 %v6216_v50, %v4839_v52  ;;  %v7181_v52 = vld [vmem:[#allocation19 + $0xb8] sm:$0xff]  }
 0x68d   :  { %v8039_v56 = vld [vmem:[#allocation16] sm:$0x3f] }
 0x68e   :  { %v4841_v59 = vadd.f32 %v6217_v55, %v4840_v57  ;;  %v8041_v57 = vld [vmem:[#allocation18] sm:$0x3f]  ;;  %v4889_v60 = vrot.slane %v8039_v56, %v7893_v47  ;;  %v4877_v39 = vrot.slane %v8039_v56, %v7880_v26  ;;  %v4885_v24 = vrot.slane %v8039_v56, %v7886_v43 }
 0x68f   :  { %v4918_v0 = vrot.slane %v8041_v57, %v7882_v31  ;;  %v4926_v48 = vrot.slane %v8041_v57, %v7893_v47  ;;  %v4914_v13 = vrot.slane %v8041_v57, %v7880_v26  ;;  %v4934_v47 = vrot.slane %v8041_v57, %v7902_v36 }
 0x690   :  { %4842 = vadd.xlane.f32.xlu1 %v4841_v59  ;;  %v4881_v59 = vrot.slane %v8039_v56, %v7882_v31  ;;  %v4897_v31 = vrot.slane %v8039_v56, %v7902_v36 }
 0x71d   :  { %v4843_v19 = vpop.xlane.xlu1 %4842 }
 0x71e   :  { %v4844_v49 = vmul.f32 0.0013020834, %v4843_v19  ;;  %v4922_v19 = vrot.slane %v8041_v57, %v7886_v43 }
 0x720   :  { %v8015_v21 = vsub.f32 %v6212_v27, %v4844_v49  ;;  %v8017_v61 = vsub.f32 %v6213_v42, %v4844_v49  ;;  %v8019_v58 = vsub.f32 %v6214_v34, %v4844_v49  ;;  %v8021_v63 = vsub.f32 %v6215_v41, %v4844_v49  ;;  %v7170_v27 = vld [vmem:[#allocation19 + $0x68] sm:$0xff]   ;;  %v7174_v34 = vld [vmem:[#allocation19 + $0x70] sm:$0xff]   ;;  %v7180_v41 = vld [vmem:[#allocation19 + $0xf8] sm:$0xff]  }
 0x721   :  { %v8027_v4 = vsub.f32 %v6216_v50, %v4844_v49  ;;  %v8031_v8 = vsub.f32 %v6217_v55, %v4844_v49  ;;  %v7172_v42 = vld [vmem:[#allocation19 + $0xe8] sm:$0xff]   ;;  %6150 = vmatprep.subr.bf16.mxu0 %v7170_v27  ;;  %v7182_v50 = vld [vmem:[#allocation19 + $0x140] sm:$0xff]   ;;  %v7186_v27 = vld [vmem:[#allocation19 + $0x150] sm:$0xff]  }
 0x722   :  { %v4851_v2 = vmul.f32 %v8015_v21, %v8015_v21  ;;  %v4852_v3 = vmul.f32 %v8017_v61, %v8017_v61  ;;  %v4853_v5 = vmul.f32 %v8019_v58, %v8019_v58  ;;  %v4854_v10 = vmul.f32 %v8021_v63, %v8021_v63  ;;  %6172 = vmatprep.subr.bf16.mxu1 %v7172_v42  ;;  %v7187_v42 = vld [vmem:[#allocation19 + $0x110] sm:$0xff]  }
 0x723   :  { %v4855_v12 = vmul.f32 %v8027_v4, %v8027_v4  ;;  %v4856_v9 = vmul.f32 %v8031_v8, %v8031_v8  ;;  %6151 = vmatpush3.bf16.msra.mxu0 %v7171_v30  ;;  %6173 = vmatpush3.bf16.msra.mxu1 %v7173_v32  ;;  %v7188_v30 = vld [vmem:[#allocation19 + $0x158] sm:$0xff]  }
 0x724   :  { %v4857_v6 = vadd.f32 %v4852_v3, %v4851_v2  ;;  %6152 = vmatprep.subr.bf16.mxu0 %v7174_v34  ;;  %6174 = vmatprep.subr.bf16.mxu1 %v7176_v28  ;;  %v7189_v32 = vld [vmem:[#allocation19 + $0x118] sm:$0xff]   ;;  %v7190_v34 = vld [vmem:[#allocation19 + $0x160] sm:$0xff]  }
 0x726   :  { %v4858_v11 = vadd.f32 %v4857_v6, %v4853_v5 }
 0x727   :  { %6153 = vmatpush3.bf16.msra.mxu0 %v7175_v46  ;;  %6175 = vmatpush3.bf16.msra.mxu1 %v7177_v51  ;;  %v4893_v46 = vrot.slane %v8039_v56, %v7900_v35  ;;  %v7191_v51 = vld [vmem:[#allocation19 + $0x120] sm:$0xff]   ;;  %v7197_v56 = vld [vmem:[#allocation19 + $0x138] sm:$0xff]  }
 0x728   :  { %v4859_v14 = vadd.f32 %v4858_v11, %v4854_v10  ;;  %6154 = vmatprep.subr.bf16.mxu0 %v7178_v29  ;;  %6176 = vmatprep.subr.bf16.mxu1 %v7180_v41  ;;  %v7192_v29 = vld [vmem:[#allocation19 + $0x168] sm:$0xff]  }
 0x72a   :  { %v4860_v15 = vadd.f32 %v4859_v14, %v4855_v12 }
 0x72b   :  { %6155 = vmatpush3.bf16.msra.mxu0 %v7179_v38  ;;  %6177 = vmatpush3.bf16.msra.mxu1 %v7181_v52  ;;  %v4930_v38 = vrot.slane %v8041_v57, %v7900_v35  ;;  %v7193_v52 = vld [vmem:[#allocation19 + $0x128] sm:$0xff]   ;;  %v6091_v57 = vld [vmem:[#allocation21] ss:$0 sm:$0xff] }
 0x72c   :  { %v4861_v16 = vadd.f32 %v4860_v15, %v4856_v9  ;;  %6184 = vmatprep.subr.bf16.mxu0 %v7182_v50  ;;  %v7194_v50 = vld [vmem:[#allocation19 + $0x170] sm:$0xff]  }
 0x72e   :  { %4862 = vadd.xlane.f32.xlu1 %v4861_v16 }
 0x7bb   :  { %v4863_v54 = vpop.xlane.xlu1 %4862 }
 0x7bc   :  { %v4864_v55 = vmul.f32 0.0013020834, %v4863_v54 }
 0x7be   :  { %v4865_v62 = vadd.f32 1e-05, %v4864_v55  ;;  %v7195_v55 = vld [vmem:[#allocation19 + $0x130] sm:$0xff]  }
 0x7c0   :  { %7200 = vrsqrt.f32 %v4865_v62 }
 0x7ca   :  { %v7201_v37 = vpop.eup %7200 }
 0x7cb   :  { %v4868_v49 = vmul.f32 %v7201_v37, %v8017_v61  ;;  %v4870_v2 = vmul.f32 %v7201_v37, %v8021_v63  ;;  %v4867_v3 = vmul.f32 %v7201_v37, %v8015_v21  ;;  %v4869_v5 = vmul.f32 %v7201_v37, %v8019_v58 }
 0x7cc   :  { %v4872_v6 = vmul.f32 %v7201_v37, %v8031_v8  ;;  %v4871_v28 = vmul.f32 %v7201_v37, %v8027_v4  ;;  %v7196_v4 = vld [vmem:[#allocation19 + $0x178] sm:$0xff]  }
 0x7cd   :  { %v4905_v26 = vmul.f32 %v4881_v59, %v4868_v49  ;;  %v4907_v10 = vmul.f32 %v4889_v60, %v4870_v2  ;;  %v4904_v11 = vmul.f32 %v4877_v39, %v4867_v3  ;;  %v4906_v43 = vmul.f32 %v4885_v24, %v4869_v5 }
 0x7ce   :  { %v4909_v12 = vmul.f32 %v4897_v31, %v4872_v6  ;;  %v4908_v41 = vmul.f32 %v4893_v46, %v4871_v28 }
 0x7cf   :  { %v4942_v14 = vadd.f32 %v4918_v0, %v4905_v26  ;;  %v4944_v9 = vadd.f32 %v4926_v48, %v4907_v10  ;;  %v4941_v15 = vadd.f32 %v4914_v13, %v4904_v11  ;;  %v4943_v61 = vadd.f32 %v4922_v19, %v4906_v43 }
 0x7d0   :  { %v4946_v16 = vadd.f32 %v4934_v47, %v4909_v12  ;;  %v4945_v54 = vadd.f32 %v4930_v38, %v4908_v41 }
 0x7d1   :  { %vm4948_vm6 = vcmp.gt.f32.partialorder %v4942_v14, 0.0  ;;  %v4954_v63 = vmul.f32 0.01, %v4942_v14  ;;  %vm4950_vm7 = vcmp.gt.f32.partialorder %v4944_v9, 0.0  ;;  %v4956_v21 = vmul.f32 0.01, %v4944_v9 }
 0x7d2   :  { %vm4947_vm8 = vcmp.gt.f32.partialorder %v4941_v15, 0.0  ;;  %v4953_v58 = vmul.f32 0.01, %v4941_v15  ;;  %vm4949_vm9 = vcmp.gt.f32.partialorder %v4943_v61, 0.0  ;;  %v4955_v8 = vmul.f32 0.01, %v4943_v61 }
 0x7d3   :  { %v4960_v44 = vsel %vm4948_vm6, %v4942_v14, %v4954_v63  ;;  %v4962_v36 = vsel %vm4950_vm7, %v4944_v9, %v4956_v21  ;;  %vm4952_vm10 = vcmp.gt.f32.partialorder %v4946_v16, 0.0  ;;  %v4958_v45 = vmul.f32 0.01, %v4946_v16 }
 0x7d4   :  { %v4966_v17 = vpack.c.bf16 %v4960_v44, %v4960_v44  ;;  %v4968_v18 = vpack.c.bf16 %v4962_v36, %v4962_v36  ;;  %v4959_v22 = vsel %vm4947_vm8, %v4941_v15, %v4953_v58  ;;  %v4961_v20 = vsel %vm4949_vm9, %v4943_v61, %v4955_v8 }
 0x7d5   :  { %v4965_v23 = vpack.c.bf16 %v4959_v22, %v4959_v22  ;;  %v4967_v7 = vpack.c.bf16 %v4961_v20, %v4961_v20  ;;  %v4964_v25 = vsel %vm4952_vm10, %v4946_v16, %v4958_v45  ;;  %v4957_v62 = vmul.f32 0.01, %v4945_v54 }
 0x7d6   :  { %5394 = vmatprep.mubr.bf16.mxu0 %v4966_v17  ;;  %5434 = vmatprep.mubr.bf16.mxu1 %v4968_v18  ;;  %v4970_v53 = vpack.c.bf16 %v4964_v25, %v4964_v25  ;;  %vm4951_vm11 = vcmp.gt.f32.partialorder %v4945_v54, 0.0 }
 0x7d7   :  { %5395 = vmatmul.mubr.bf16.vlgmr.msra.gmra.mrb[12].mxu0 %v4965_v23  ;;  %5435 = vmatmul.mubr.bf16.vlgmr.msra.gmra.mrb[12].mxu1 %v4967_v7  ;;  %v4963_v59 = vsel %vm4951_vm11, %v4945_v54, %v4957_v62 }
 0x7d8   :  { %6185 = vmatpush3.bf16.msra.mxu0 %v7183_v1  ;;  %5474 = vmatprep.mubr.bf16.mxu0 %v4970_v53  ;;  %v4969_v0 = vpack.c.bf16 %v4963_v59, %v4963_v59 }
 0x7d9   :  { %6186 = vmatprep.subr.bf16.mxu0 %v7184_v40 }
 0x7dc   :  { %6187 = vmatpush3.bf16.msra.mxu0 %v7185_v33 }
 0x7dd   :  { %6188 = vmatprep.subr.bf16.mxu0 %v7186_v27 }
 0x7e0   :  { %6189 = vmatpush3.bf16.msra.mxu0 %v7187_v42 }
 0x7e1   :  { %6190 = vmatprep.subr.bf16.mxu0 %v7188_v30 }
 0x7e4   :  { %6191 = vmatpush3.bf16.msra.mxu0 %v7189_v32 }
 0x7e5   :  { %6192 = vmatprep.subr.bf16.mxu0 %v7190_v34 }
 0x7e8   :  { %6193 = vmatpush3.bf16.msra.mxu0 %v7191_v51 }
 0x7e9   :  { %6194 = vmatprep.subr.bf16.mxu0 %v7192_v29 }
 0x7ec   :  { %6195 = vmatpush3.bf16.msra.mxu0 %v7193_v52 }
 0x7ed   :  { %6196 = vmatprep.subr.bf16.mxu0 %v7194_v50 }
 0x7f0   :  { %6197 = vmatpush3.bf16.msra.mxu0 %v7195_v55 }
 0x7f1   :  { %6198 = vmatprep.subr.bf16.mxu0 %v7196_v4 }
 0x7f4   :  { %6199 = vmatpush3.bf16.msra.mxu0 %v7197_v56 }
 0x7f7   :  { %5475 = vmatmul.mubr.bf16.vlgmr.msra.gmra.mrb[16].mxu0 %v4969_v0 }
 0x8aa   :  { %v6156_v60 = vpop.f32.mrb[12].mxu0  ;;  %v6178_v35 = vpop.f32.mrb[12].mxu1 }
 0x8ab   :  { %v6157_v39 = vpop.f32.mrb[13].mxu0  ;;  %v6179_v24 = vpop.f32.mrb[13].mxu1 }
 0x8ac   :  { %v6158_v37 = vadd.f32 %v6157_v39, %v6156_v60  ;;  %v6180_v48 = vadd.f32 %v6179_v24, %v6178_v35  ;;  %v6159_v13 = vpop.f32.mrb[14].mxu0  ;;  %v6181_v19 = vpop.f32.mrb[14].mxu1 }
 0x8ad   :  { %v6160_v31 = vpop.f32.mrb[15].mxu0  ;;  %v6182_v49 = vpop.f32.mrb[15].mxu1 }
 0x8ae   :  { %v5397_v2 = vadd.f32 %v6158_v37, %v6091_v57 }
 0x8b0   :  { %v5437_v3 = vadd.f32 %v6180_v48, %v5397_v2 }
 0x8ca   :  { %v6200_v5 = vpop.f32.mrb[16].mxu0 }
 0x8cb   :  { %v6201_v6 = vpop.f32.mrb[17].mxu0 }
 0x8cc   :  { %v6202_v47 = vadd.f32 %v6201_v6, %v6200_v5  ;;  %v6203_v26 = vpop.f32.mrb[18].mxu0 }
 0x8cd   :  { %v6204_v10 = vpop.f32.mrb[19].mxu0 }
 0x8ce   :  { %v5477_v11 = vadd.f32 %v6202_v47, %v5437_v3 }
 0x8d0   :  { %5482 = vst [vmem:[#allocation22] sm:$0xff] %v5477_v11 }
 0x8d1   :  { %7465 = shalt.err (!%p7462_p13)
}
 0x8d2   :  { %s7466_s2 = scalar_lea.hbm %s8097_s12, 128 }
 0x8d3   :  { %p7467_p0 = scmp.ne.s32.totalorder %s8097_s12, %s7466_s2  ;;  %p7470_p1 = scmp.lt.u32.totalorder %s7466_s2, %s8097_s12 }
 0x8d5   :  { %p7472_p2 = pnand %p7470_p1, %p7467_p0 }
 0x8d7   :  { %7475 = shalt.err (!%p7472_p2)
}
 0x8d8   :  { %5492 = dma.vmem_to_hbm [thread:$0]  %s5490_s26, 128, %s8097_s12, [#allocation4]  }
 0x8d9   :  { %7490 = dma.done.wait [#allocation4], 128  }
 0x8da   :  { %7491 = vsyncadd [#allocation4], 4294967168 }
 0x8db   :  { %5496 = vsyncpa [#allocation3], 1 }
 0x8dc   :  { %5497 = vsyncpa [#allocation8], 1 }
 0x8dd   :  { %5498 = vsyncpa [#allocation11], 1 }
 0x8de   :  { %5499 = vsyncpa [#allocation14], 1 }
 0x8df   :  { %5500 = vsyncpa [#allocation17], 1 }
 0x8e0   :  { %5501 = vsyncpa [#allocation20], 1 }
 0x8e1   :  { %5502 = vsyncpa [#allocation4], 1 }
 0x8e2   :  { %5503 = vsyncpa [#allocation5], 1 }

</bundles_post_ra>
